<compile_context>
chip_gen: v6e
topology: v6e:2x2x1
jax: 0.10.0
libtpu: 0.0.40
codegen_flags: <defaults>
</compile_context>

<pallas_src>
import functools
import math

import jax
import jax.numpy as jnp
from jax.experimental import pallas as pl
from jax.experimental.pallas import tpu as pltpu

C = 1000000000.0
_LN_EPS = 1e-5


# ----------------------------------------------------------------------------
# Fused transformer kernel (one pallas_call per Model forward)
# ----------------------------------------------------------------------------
def _layernorm(x, g, b, eps=_LN_EPS):
    mu = jnp.mean(x, axis=-1, keepdims=True)
    xc = x - mu
    var = jnp.mean(xc * xc, axis=-1, keepdims=True)
    return xc * jax.lax.rsqrt(var + eps) * g + b


def _model_kernel(x_ref, emb_w_ref, emb_b_ref, pos_ref,
                  ln1_g_ref, ln1_b_ref, qkv_w_ref, qkv_b_ref, wo_ref, bo_ref,
                  ln2_g_ref, ln2_b_ref, w1_ref, b1_ref, w2_ref, b2_ref,
                  lnf_g_ref, lnf_b_ref, hw_ref, hb_ref, o_ref,
                  *, num_layers, num_heads, dim):
    S = x_ref.shape[0]
    Dh = dim // num_heads

    x = x_ref[...]                                          # (S, 2) one-hot (float)
    # Embedding as a VPU mul-add (exactly equal to x @ emb_w since x is one-hot).
    h = (x[:, 0:1] * emb_w_ref[0:1, :] + x[:, 1:2] * emb_w_ref[1:2, :]
         + emb_b_ref[...] + pos_ref[...])                   # (S, dim)

    for l in range(num_layers):                             # static unrolled loop
        # ---- self-attention block (pre-LN), fused QKV matmul ----
        hn = _layernorm(h, ln1_g_ref[l], ln1_b_ref[l])
        qkv = jnp.dot(hn, qkv_w_ref[l],
                      preferred_element_type=jnp.float32) + qkv_b_ref[l]   # (S, 3*dim)
        o = bo_ref[l]                                       # (1, dim) -> broadcasts
        for hd in range(num_heads):
            # 1/sqrt(Dh) is already folded into the Q weights/bias.
            q = qkv[:, hd * Dh:(hd + 1) * Dh]
            k = qkv[:, dim + hd * Dh:dim + (hd + 1) * Dh]
            v = qkv[:, 2 * dim + hd * Dh:2 * dim + (hd + 1) * Dh]
            s = jax.lax.dot_general(q, k, (((1,), (1,)), ((), ())),
                                    preferred_element_type=jnp.float32)    # (S, S)
            s = s - jnp.max(s, axis=-1, keepdims=True)
            p = jnp.exp(s)
            p = p * pl.reciprocal(jnp.sum(p, axis=-1, keepdims=True), approx=True)
            ah = jnp.dot(p, v, preferred_element_type=jnp.float32)          # (S, Dh)
            # Accumulate directly through the matching rows of Wo: no head concat,
            # no transposes, residual fused below.
            o = o + jnp.dot(ah, wo_ref[l][hd * Dh:(hd + 1) * Dh, :],
                            preferred_element_type=jnp.float32)
        h = h + o

        # ---- MLP block (pre-LN), residual fused ----
        hn = _layernorm(h, ln2_g_ref[l], ln2_b_ref[l])
        m = jnp.dot(hn, w1_ref[l], preferred_element_type=jnp.float32) + b1_ref[l]
        # TODO(synk): switch to exact erf GELU if the reference Model uses nn.GELU().
        m = jax.nn.gelu(m, approximate=True)
        h = h + jnp.dot(m, w2_ref[l], preferred_element_type=jnp.float32) + b2_ref[l]

    hn = _layernorm(h, lnf_g_ref[...], lnf_b_ref[...])

    # ---- head: Linear(S*dim -> Nout) over flattened h, computed as a sum of
    # per-position (1, dim) x (dim, Nout) matmuls (avoids an in-kernel reshape).
    acc = hb_ref[...]                                        # (1, Nout)
    for s in range(S):
        acc = acc + jnp.dot(hn[s:s + 1, :], hw_ref[s],
                            preferred_element_type=jnp.float32)
    o_ref[...] = acc


def model_forward(p, x, *, num_heads):
    """x: (B, S, 2) float32 one-hot -> logits (B, out_len, 2). One pallas_call."""
    B, S, nc = x.shape
    dim = p["emb_w"].shape[1]
    L = p["qkv_w"].shape[0]
    Nout = p["head_w"].shape[-1]

    def rep(shape):
        # full-array block with constant index map: stays resident across grid steps
        zeros = (0,) * len(shape)
        return pl.BlockSpec(shape, lambda b, z=zeros: z)

    kern = functools.partial(_model_kernel, num_layers=L, num_heads=num_heads, dim=dim)
    out = pl.pallas_call(
        kern,
        out_shape=jax.ShapeDtypeStruct((B, 1, Nout), jnp.float32),
        grid=(B,),
        in_specs=[
            pl.BlockSpec((pl.Squeezed(), S, nc), lambda b: (b, 0, 0)),
            rep(p["emb_w"].shape), rep(p["emb_b"].shape), rep(p["pos"].shape),
            rep(p["ln1_g"].shape), rep(p["ln1_b"].shape),
            rep(p["qkv_w"].shape), rep(p["qkv_b"].shape),
            rep(p["wo"].shape), rep(p["bo"].shape),
            rep(p["ln2_g"].shape), rep(p["ln2_b"].shape),
            rep(p["w1"].shape), rep(p["b1"].shape),
            rep(p["w2"].shape), rep(p["b2"].shape),
            rep(p["lnf_g"].shape), rep(p["lnf_b"].shape),
            rep(p["head_w"].shape), rep(p["head_b"].shape),
        ],
        out_specs=pl.BlockSpec((pl.Squeezed(), 1, Nout), lambda b: (b, 0, 0)),
        compiler_params=pltpu.CompilerParams(dimension_semantics=("parallel",)),
    )(x, p["emb_w"], p["emb_b"], p["pos"],
      p["ln1_g"], p["ln1_b"], p["qkv_w"], p["qkv_b"], p["wo"], p["bo"],
      p["ln2_g"], p["ln2_b"], p["w1"], p["b1"], p["w2"], p["b2"],
      p["lnf_g"], p["lnf_b"], p["head_w"], p["head_b"])
    return out.reshape(B, Nout // 2, 2)


# ----------------------------------------------------------------------------
# Parameter construction (packed for the fused kernel)
# ----------------------------------------------------------------------------
def init_model_params(key, num_layers, dim, num_heads, in_len, out_len, num_classes):
    assert num_classes == 2 and dim % num_heads == 0
    Dh = dim // num_heads
    scale = 1.0 / math.sqrt(Dh)
    keys = jax.random.split(key, 2 + 6 * num_layers + 1)

    def lin(k, fi, fo):
        return (jax.random.normal(k, (fi, fo), jnp.float32) * 0.02,
                jnp.zeros((fo,), jnp.float32))

    emb_w, emb_b = lin(keys[0], num_classes, dim)
    pos = jax.random.normal(keys[1], (in_len, dim), jnp.float32) * 0.02

    qkv_w, qkv_b, wo, bo, w1, b1, w2, b2 = [], [], [], [], [], [], [], []
    for l in range(num_layers):
        k0 = 2 + 6 * l
        wq, bq = lin(keys[k0 + 0], dim, dim)
        wk, bk = lin(keys[k0 + 1], dim, dim)
        wv, bv = lin(keys[k0 + 2], dim, dim)
        # fold attention scale 1/sqrt(Dh) into the Q projection
        qkv_w.append(jnp.concatenate([wq * scale, wk, wv], axis=1))
        qkv_b.append(jnp.concatenate([bq * scale, bk, bv], axis=0)[None, :])
        w, b = lin(keys[k0 + 3], dim, dim);     wo.append(w); bo.append(b[None, :])
        w, b = lin(keys[k0 + 4], dim, 4 * dim); w1.append(w); b1.append(b[None, :])
        w, b = lin(keys[k0 + 5], 4 * dim, dim); w2.append(w); b2.append(b[None, :])

    hw, hb = lin(keys[-1], in_len * dim, out_len * num_classes)
    ones = jnp.ones((num_layers, 1, dim), jnp.float32)
    zeros = jnp.zeros((num_layers, 1, dim), jnp.float32)
    return {
        "emb_w": emb_w, "emb_b": emb_b[None, :], "pos": pos,
        "ln1_g": ones, "ln1_b": zeros, "ln2_g": ones, "ln2_b": zeros,
        "qkv_w": jnp.stack(qkv_w), "qkv_b": jnp.stack(qkv_b),
        "wo": jnp.stack(wo), "bo": jnp.stack(bo),
        "w1": jnp.stack(w1), "b1": jnp.stack(b1),
        "w2": jnp.stack(w2), "b2": jnp.stack(b2),
        "lnf_g": jnp.ones((1, dim), jnp.float32),
        "lnf_b": jnp.zeros((1, dim), jnp.float32),
        "head_w": hw.reshape(in_len, dim, out_len * num_classes),
        "head_b": hb[None, :],
    }


def init_crypto_params(key, cfg):
    sk_len, message_len, ct_len = cfg["sk_len"], cfg["message_len"], cfg["ct_len"]
    num_layers, dim, num_heads = cfg["num_layers"], cfg["dim"], cfg["num_heads"]
    ks, kr, ka = jax.random.split(key, 3)
    return {
        "sender": init_model_params(ks, num_layers, dim, num_heads,
                                    sk_len + message_len, ct_len, 2),
        # receiver exists in __init__ but is not used in forward()
        "receiver": init_model_params(kr, num_layers, dim, num_heads,
                                      sk_len + ct_len, message_len, 2),
        "adversary": init_model_params(ka, num_layers, dim, num_heads,
                                       ct_len, message_len, 2),
    }


# ----------------------------------------------------------------------------
# Crypto forward
# ----------------------------------------------------------------------------
def gumbel_softmax_hard(key, logits, tau):
    # F.gumbel_softmax(hard=True): forward value is the hard one-hot.
    # TODO(synk): straight-through gradient (hard - soft.detach() + soft) not implemented.
    g = jax.random.gumbel(key, logits.shape, dtype=logits.dtype)
    y = (logits + g) / tau
    idx = jnp.argmax(y, axis=-1)
    return jax.nn.one_hot(idx, logits.shape[-1], dtype=logits.dtype)


@functools.partial(jax.jit, static_argnames=("num_heads",))
def crypto_forward(params, sk, message, gumbel_key, num_heads, temperature=1.0):
    sk_onehot = jax.nn.one_hot(sk, 2, dtype=jnp.float32)
    message_onehot = jax.nn.one_hot(message, 2, dtype=jnp.float32)
    sk_message = jnp.concatenate([sk_onehot, message_onehot], axis=1)

    ct_logits = model_forward(params["sender"], sk_message, num_heads=num_heads)
    ct_onehot = gumbel_softmax_hard(gumbel_key, ct_logits, temperature)
    ct = jnp.argmax(ct_onehot, axis=-1)

    _sk_ct_onehot = jnp.concatenate([sk_onehot, ct_onehot], axis=1)  # computed in torch, unused

    logits_0 = jnp.sum(ct_onehot * sk_onehot, axis=-1, keepdims=True)
    logits_1 = 1.0 - logits_0
    # rec_distribution = Categorical(probs=...) in torch; we return the (unnormalized) probs.
    rec_probs = jnp.concatenate([logits_0 * C, logits_1 * C], axis=2)

    # adv_distribution = Categorical(logits=...); we return the logits.
    adv_logits = model_forward(params["adversary"], ct_onehot, num_heads=num_heads)
    return ct, rec_probs, adv_logits


# ----------------------------------------------------------------------------
if __name__ == "__main__":
    cfg = dict(sk_len=8, message_len=8, ct_len=8, num_layers=2, dim=32, num_heads=2)
    B = 2

    params = init_crypto_params(jax.random.PRNGKey(42), cfg)

    key = jax.random.PRNGKey(0)
    k_sk, k_msg, k_gumbel = jax.random.split(key, 3)
    sk = jax.random.randint(k_sk, (B, cfg["sk_len"]), 0, 2)
    message = jax.random.randint(k_msg, (B, cfg["message_len"]), 0, 2)

    ct, rec_probs, adv_logits = crypto_forward(
        params, sk, message, k_gumbel, num_heads=cfg["num_heads"], temperature=1.0
    )
    jax.block_until_ready((ct, rec_probs, adv_logits))

    assert ct.shape == (B, cfg["ct_len"])
    assert rec_probs.shape == (B, cfg["sk_len"], 2)
    assert adv_logits.shape == (B, cfg["message_len"], 2)
    print("KERNEL_OK")
</pallas_src>

<mosaic_0001>
module attributes {stable_mosaic.version = 11 : i64} {
  func.func @_model_kernel(%arg0: i32, %arg1: memref<1x16x2xf32, #tpu.memory_space<vmem>>, %arg2: memref<2x32xf32, #tpu.memory_space<vmem>>, %arg3: memref<1x32xf32, #tpu.memory_space<vmem>>, %arg4: memref<16x32xf32, #tpu.memory_space<vmem>>, %arg5: memref<2x1x32xf32, #tpu.memory_space<vmem>>, %arg6: memref<2x1x32xf32, #tpu.memory_space<vmem>>, %arg7: memref<2x32x96xf32, #tpu.memory_space<vmem>>, %arg8: memref<2x1x96xf32, #tpu.memory_space<vmem>>, %arg9: memref<2x32x32xf32, #tpu.memory_space<vmem>>, %arg10: memref<2x1x32xf32, #tpu.memory_space<vmem>>, %arg11: memref<2x1x32xf32, #tpu.memory_space<vmem>>, %arg12: memref<2x1x32xf32, #tpu.memory_space<vmem>>, %arg13: memref<2x32x128xf32, #tpu.memory_space<vmem>>, %arg14: memref<2x1x128xf32, #tpu.memory_space<vmem>>, %arg15: memref<2x128x32xf32, #tpu.memory_space<vmem>>, %arg16: memref<2x1x32xf32, #tpu.memory_space<vmem>>, %arg17: memref<1x32xf32, #tpu.memory_space<vmem>>, %arg18: memref<1x32xf32, #tpu.memory_space<vmem>>, %arg19: memref<16x32x16xf32, #tpu.memory_space<vmem>>, %arg20: memref<1x16xf32, #tpu.memory_space<vmem>>, %arg21: memref<1x1x16xf32, #tpu.memory_space<vmem>>) attributes {dimension_semantics = [#tpu.dimension_semantics<parallel>], iteration_bounds = array<i64: 2>, scalar_prefetch = 0 : i64, scratch_operands = 0 : i64, tpu.core_type = #tpu.core_type<tc>, window_params = [{transform_indices = @transform_0, window_bounds = array<i64: 1, 16, 2>}, {pipeline_mode = #tpu.pipeline_mode<synchronous>, transform_indices = @transform_1, window_bounds = array<i64: 2, 32>}, {pipeline_mode = #tpu.pipeline_mode<synchronous>, transform_indices = @transform_2, window_bounds = array<i64: 1, 32>}, {pipeline_mode = #tpu.pipeline_mode<synchronous>, transform_indices = @transform_3, window_bounds = array<i64: 16, 32>}, {pipeline_mode = #tpu.pipeline_mode<synchronous>, transform_indices = @transform_4, window_bounds = array<i64: 2, 1, 32>}, {pipeline_mode = #tpu.pipeline_mode<synchronous>, transform_indices = @transform_5, window_bounds = array<i64: 2, 1, 32>}, {pipeline_mode = #tpu.pipeline_mode<synchronous>, transform_indices = @transform_6, window_bounds = array<i64: 2, 32, 96>}, {pipeline_mode = #tpu.pipeline_mode<synchronous>, transform_indices = @transform_7, window_bounds = array<i64: 2, 1, 96>}, {pipeline_mode = #tpu.pipeline_mode<synchronous>, transform_indices = @transform_8, window_bounds = array<i64: 2, 32, 32>}, {pipeline_mode = #tpu.pipeline_mode<synchronous>, transform_indices = @transform_9, window_bounds = array<i64: 2, 1, 32>}, {pipeline_mode = #tpu.pipeline_mode<synchronous>, transform_indices = @transform_10, window_bounds = array<i64: 2, 1, 32>}, {pipeline_mode = #tpu.pipeline_mode<synchronous>, transform_indices = @transform_11, window_bounds = array<i64: 2, 1, 32>}, {pipeline_mode = #tpu.pipeline_mode<synchronous>, transform_indices = @transform_12, window_bounds = array<i64: 2, 32, 128>}, {pipeline_mode = #tpu.pipeline_mode<synchronous>, transform_indices = @transform_13, window_bounds = array<i64: 2, 1, 128>}, {pipeline_mode = #tpu.pipeline_mode<synchronous>, transform_indices = @transform_14, window_bounds = array<i64: 2, 128, 32>}, {pipeline_mode = #tpu.pipeline_mode<synchronous>, transform_indices = @transform_15, window_bounds = array<i64: 2, 1, 32>}, {pipeline_mode = #tpu.pipeline_mode<synchronous>, transform_indices = @transform_16, window_bounds = array<i64: 1, 32>}, {pipeline_mode = #tpu.pipeline_mode<synchronous>, transform_indices = @transform_17, window_bounds = array<i64: 1, 32>}, {pipeline_mode = #tpu.pipeline_mode<synchronous>, transform_indices = @transform_18, window_bounds = array<i64: 16, 32, 16>}, {pipeline_mode = #tpu.pipeline_mode<synchronous>, transform_indices = @transform_19, window_bounds = array<i64: 1, 16>}, {transform_indices = @transform_20, window_bounds = array<i64: 1, 1, 16>}]} {
    %c0 = arith.constant 0 : index
    %c0_0 = arith.constant 0 : index
    %c0_1 = arith.constant 0 : index
    %0 = vector.load %arg1[%c0, %c0_0, %c0_1] : memref<1x16x2xf32, #tpu.memory_space<vmem>>, vector<1x16x2xf32>
    %1 = vector.shape_cast %0 : vector<1x16x2xf32> to vector<16x2xf32>
    %2 = vector.extract_strided_slice %1 {offsets = [0, 0], sizes = [16, 1], strides = [1, 1]} : vector<16x2xf32> to vector<16x1xf32>
    %c0_2 = arith.constant 0 : index
    %c0_3 = arith.constant 0 : index
    %3 = vector.load %arg2[%c0_2, %c0_3] : memref<2x32xf32, #tpu.memory_space<vmem>>, vector<1x32xf32>
    %4 = vector.broadcast %2 : vector<16x1xf32> to vector<16x32xf32>
    %5 = vector.broadcast %3 : vector<1x32xf32> to vector<16x32xf32>
    %6 = arith.mulf %4, %5 : vector<16x32xf32>
    %7 = vector.extract_strided_slice %1 {offsets = [0, 1], sizes = [16, 1], strides = [1, 1]} : vector<16x2xf32> to vector<16x1xf32>
    %c1 = arith.constant 1 : index
    %c0_4 = arith.constant 0 : index
    %8 = vector.load %arg2[%c1, %c0_4] : memref<2x32xf32, #tpu.memory_space<vmem>>, vector<1x32xf32>
    %9 = vector.broadcast %7 : vector<16x1xf32> to vector<16x32xf32>
    %10 = vector.broadcast %8 : vector<1x32xf32> to vector<16x32xf32>
    %11 = arith.mulf %9, %10 : vector<16x32xf32>
    %12 = arith.addf %6, %11 : vector<16x32xf32>
    %c0_5 = arith.constant 0 : index
    %c0_6 = arith.constant 0 : index
    %13 = vector.load %arg3[%c0_5, %c0_6] : memref<1x32xf32, #tpu.memory_space<vmem>>, vector<1x32xf32>
    %14 = vector.broadcast %13 : vector<1x32xf32> to vector<16x32xf32>
    %15 = arith.addf %12, %14 : vector<16x32xf32>
    %c0_7 = arith.constant 0 : index
    %c0_8 = arith.constant 0 : index
    %16 = vector.load %arg4[%c0_7, %c0_8] : memref<16x32xf32, #tpu.memory_space<vmem>>, vector<16x32xf32>
    %17 = arith.addf %15, %16 : vector<16x32xf32>
    %c0_9 = arith.constant 0 : index
    %c0_10 = arith.constant 0 : index
    %c0_11 = arith.constant 0 : index
    %18 = vector.load %arg5[%c0_9, %c0_10, %c0_11] : memref<2x1x32xf32, #tpu.memory_space<vmem>>, vector<1x1x32xf32>
    %19 = vector.shape_cast %18 : vector<1x1x32xf32> to vector<1x32xf32>
    %c0_12 = arith.constant 0 : index
    %c0_13 = arith.constant 0 : index
    %c0_14 = arith.constant 0 : index
    %20 = vector.load %arg6[%c0_12, %c0_13, %c0_14] : memref<2x1x32xf32, #tpu.memory_space<vmem>>, vector<1x1x32xf32>
    %21 = vector.shape_cast %20 : vector<1x1x32xf32> to vector<1x32xf32>
    %cst = arith.constant dense<0.000000e+00> : vector<16xf32>
    %22 = vector.multi_reduction <add>, %17, %cst [1] : vector<16x32xf32> to vector<16xf32>
    %23 = vector.shape_cast %22 : vector<16xf32> to vector<16x1xf32>
    %cst_15 = arith.constant 3.200000e+01 : f32
    %24 = vector.broadcast %cst_15 : f32 to vector<16x1xf32>
    %25 = arith.divf %23, %24 : vector<16x1xf32>
    %26 = vector.broadcast %25 : vector<16x1xf32> to vector<16x32xf32>
    %27 = arith.subf %17, %26 : vector<16x32xf32>
    %28 = arith.mulf %27, %27 : vector<16x32xf32>
    %cst_16 = arith.constant dense<0.000000e+00> : vector<16xf32>
    %29 = vector.multi_reduction <add>, %28, %cst_16 [1] : vector<16x32xf32> to vector<16xf32>
    %30 = vector.shape_cast %29 : vector<16xf32> to vector<16x1xf32>
    %cst_17 = arith.constant 3.200000e+01 : f32
    %31 = vector.broadcast %cst_17 : f32 to vector<16x1xf32>
    %32 = arith.divf %30, %31 : vector<16x1xf32>
    %cst_18 = arith.constant 9.99999974E-6 : f32
    %33 = vector.broadcast %cst_18 : f32 to vector<16x1xf32>
    %34 = arith.addf %32, %33 : vector<16x1xf32>
    %35 = math.rsqrt %34 : vector<16x1xf32>
    %36 = vector.broadcast %35 : vector<16x1xf32> to vector<16x32xf32>
    %37 = arith.mulf %27, %36 : vector<16x32xf32>
    %38 = vector.broadcast %19 : vector<1x32xf32> to vector<16x32xf32>
    %39 = arith.mulf %37, %38 : vector<16x32xf32>
    %40 = vector.broadcast %21 : vector<1x32xf32> to vector<16x32xf32>
    %41 = arith.addf %39, %40 : vector<16x32xf32>
    %c0_19 = arith.constant 0 : index
    %c0_20 = arith.constant 0 : index
    %c0_21 = arith.constant 0 : index
    %42 = vector.load %arg7[%c0_19, %c0_20, %c0_21] : memref<2x32x96xf32, #tpu.memory_space<vmem>>, vector<1x32x96xf32>
    %43 = vector.shape_cast %42 : vector<1x32x96xf32> to vector<32x96xf32>
    %cst_22 = arith.constant dense<0.000000e+00> : vector<16x96xf32>
    %44 = tpu.matmul %41, %43, %cst_22 {dimension_numbers = #tpu.dot_dimension_numbers<[1], [0], [0], [1], [0, 0, 1, 1], [], []>} : vector<16x32xf32>, vector<32x96xf32>, vector<16x96xf32> -> vector<16x96xf32>
    %c0_23 = arith.constant 0 : index
    %c0_24 = arith.constant 0 : index
    %c0_25 = arith.constant 0 : index
    %45 = vector.load %arg8[%c0_23, %c0_24, %c0_25] : memref<2x1x96xf32, #tpu.memory_space<vmem>>, vector<1x1x96xf32>
    %46 = vector.shape_cast %45 : vector<1x1x96xf32> to vector<1x96xf32>
    %47 = vector.broadcast %46 : vector<1x96xf32> to vector<16x96xf32>
    %48 = arith.addf %44, %47 : vector<16x96xf32>
    %c0_26 = arith.constant 0 : index
    %c0_27 = arith.constant 0 : index
    %c0_28 = arith.constant 0 : index
    %49 = vector.load %arg10[%c0_26, %c0_27, %c0_28] : memref<2x1x32xf32, #tpu.memory_space<vmem>>, vector<1x1x32xf32>
    %50 = vector.shape_cast %49 : vector<1x1x32xf32> to vector<1x32xf32>
    %51 = vector.extract_strided_slice %48 {offsets = [0, 0], sizes = [16, 16], strides = [1, 1]} : vector<16x96xf32> to vector<16x16xf32>
    %52 = vector.extract_strided_slice %48 {offsets = [0, 32], sizes = [16, 16], strides = [1, 1]} : vector<16x96xf32> to vector<16x16xf32>
    %53 = vector.extract_strided_slice %48 {offsets = [0, 64], sizes = [16, 16], strides = [1, 1]} : vector<16x96xf32> to vector<16x16xf32>
    %cst_29 = arith.constant dense<0.000000e+00> : vector<16x16xf32>
    %54 = tpu.matmul %51, %52, %cst_29 {dimension_numbers = #tpu.dot_dimension_numbers<[1], [1], [0], [0], [0, 0, 1, 0], [], []>} : vector<16x16xf32>, vector<16x16xf32>, vector<16x16xf32> -> vector<16x16xf32>
    %cst_30 = arith.constant dense<0xFF800000> : vector<16xf32>
    %55 = vector.multi_reduction <maximumf>, %54, %cst_30 [1] : vector<16x16xf32> to vector<16xf32>
    %56 = vector.shape_cast %55 : vector<16xf32> to vector<16x1xf32>
    %57 = vector.broadcast %56 : vector<16x1xf32> to vector<16x16xf32>
    %58 = arith.subf %54, %57 : vector<16x16xf32>
    %59 = math.exp %58 : vector<16x16xf32>
    %cst_31 = arith.constant dense<0.000000e+00> : vector<16xf32>
    %60 = vector.multi_reduction <add>, %59, %cst_31 [1] : vector<16x16xf32> to vector<16xf32>
    %61 = vector.shape_cast %60 : vector<16xf32> to vector<16x1xf32>
    %62 = tpu.reciprocal %61 {approx = true} : vector<16x1xf32> -> vector<16x1xf32>
    %63 = vector.broadcast %62 : vector<16x1xf32> to vector<16x16xf32>
    %64 = arith.mulf %59, %63 : vector<16x16xf32>
    %cst_32 = arith.constant dense<0.000000e+00> : vector<16x16xf32>
    %65 = tpu.matmul %64, %53, %cst_32 {dimension_numbers = #tpu.dot_dimension_numbers<[1], [0], [0], [1], [0, 0, 1, 1], [], []>} : vector<16x16xf32>, vector<16x16xf32>, vector<16x16xf32> -> vector<16x16xf32>
    %c0_33 = arith.constant 0 : index
    %c0_34 = arith.constant 0 : index
    %c0_35 = arith.constant 0 : index
    %66 = vector.load %arg9[%c0_33, %c0_34, %c0_35] : memref<2x32x32xf32, #tpu.memory_space<vmem>>, vector<1x32x32xf32>
    %67 = vector.shape_cast %66 : vector<1x32x32xf32> to vector<32x32xf32>
    %68 = vector.extract_strided_slice %67 {offsets = [0, 0], sizes = [16, 32], strides = [1, 1]} : vector<32x32xf32> to vector<16x32xf32>
    %cst_36 = arith.constant dense<0.000000e+00> : vector<16x32xf32>
    %69 = tpu.matmul %65, %68, %cst_36 {dimension_numbers = #tpu.dot_dimension_numbers<[1], [0], [0], [1], [0, 0, 1, 1], [], []>} : vector<16x16xf32>, vector<16x32xf32>, vector<16x32xf32> -> vector<16x32xf32>
    %70 = vector.broadcast %50 : vector<1x32xf32> to vector<16x32xf32>
    %71 = arith.addf %70, %69 : vector<16x32xf32>
    %72 = vector.extract_strided_slice %48 {offsets = [0, 16], sizes = [16, 16], strides = [1, 1]} : vector<16x96xf32> to vector<16x16xf32>
    %73 = vector.extract_strided_slice %48 {offsets = [0, 48], sizes = [16, 16], strides = [1, 1]} : vector<16x96xf32> to vector<16x16xf32>
    %74 = vector.extract_strided_slice %48 {offsets = [0, 80], sizes = [16, 16], strides = [1, 1]} : vector<16x96xf32> to vector<16x16xf32>
    %cst_37 = arith.constant dense<0.000000e+00> : vector<16x16xf32>
    %75 = tpu.matmul %72, %73, %cst_37 {dimension_numbers = #tpu.dot_dimension_numbers<[1], [1], [0], [0], [0, 0, 1, 0], [], []>} : vector<16x16xf32>, vector<16x16xf32>, vector<16x16xf32> -> vector<16x16xf32>
    %cst_38 = arith.constant dense<0xFF800000> : vector<16xf32>
    %76 = vector.multi_reduction <maximumf>, %75, %cst_38 [1] : vector<16x16xf32> to vector<16xf32>
    %77 = vector.shape_cast %76 : vector<16xf32> to vector<16x1xf32>
    %78 = vector.broadcast %77 : vector<16x1xf32> to vector<16x16xf32>
    %79 = arith.subf %75, %78 : vector<16x16xf32>
    %80 = math.exp %79 : vector<16x16xf32>
    %cst_39 = arith.constant dense<0.000000e+00> : vector<16xf32>
    %81 = vector.multi_reduction <add>, %80, %cst_39 [1] : vector<16x16xf32> to vector<16xf32>
    %82 = vector.shape_cast %81 : vector<16xf32> to vector<16x1xf32>
    %83 = tpu.reciprocal %82 {approx = true} : vector<16x1xf32> -> vector<16x1xf32>
    %84 = vector.broadcast %83 : vector<16x1xf32> to vector<16x16xf32>
    %85 = arith.mulf %80, %84 : vector<16x16xf32>
    %cst_40 = arith.constant dense<0.000000e+00> : vector<16x16xf32>
    %86 = tpu.matmul %85, %74, %cst_40 {dimension_numbers = #tpu.dot_dimension_numbers<[1], [0], [0], [1], [0, 0, 1, 1], [], []>} : vector<16x16xf32>, vector<16x16xf32>, vector<16x16xf32> -> vector<16x16xf32>
    %c0_41 = arith.constant 0 : index
    %c0_42 = arith.constant 0 : index
    %c0_43 = arith.constant 0 : index
    %87 = vector.load %arg9[%c0_41, %c0_42, %c0_43] : memref<2x32x32xf32, #tpu.memory_space<vmem>>, vector<1x32x32xf32>
    %88 = vector.shape_cast %87 : vector<1x32x32xf32> to vector<32x32xf32>
    %89 = vector.extract_strided_slice %88 {offsets = [16, 0], sizes = [16, 32], strides = [1, 1]} : vector<32x32xf32> to vector<16x32xf32>
    %cst_44 = arith.constant dense<0.000000e+00> : vector<16x32xf32>
    %90 = tpu.matmul %86, %89, %cst_44 {dimension_numbers = #tpu.dot_dimension_numbers<[1], [0], [0], [1], [0, 0, 1, 1], [], []>} : vector<16x16xf32>, vector<16x32xf32>, vector<16x32xf32> -> vector<16x32xf32>
    %91 = arith.addf %71, %90 : vector<16x32xf32>
    %92 = arith.addf %17, %91 : vector<16x32xf32>
    %c0_45 = arith.constant 0 : index
    %c0_46 = arith.constant 0 : index
    %c0_47 = arith.constant 0 : index
    %93 = vector.load %arg11[%c0_45, %c0_46, %c0_47] : memref<2x1x32xf32, #tpu.memory_space<vmem>>, vector<1x1x32xf32>
    %94 = vector.shape_cast %93 : vector<1x1x32xf32> to vector<1x32xf32>
    %c0_48 = arith.constant 0 : index
    %c0_49 = arith.constant 0 : index
    %c0_50 = arith.constant 0 : index
    %95 = vector.load %arg12[%c0_48, %c0_49, %c0_50] : memref<2x1x32xf32, #tpu.memory_space<vmem>>, vector<1x1x32xf32>
    %96 = vector.shape_cast %95 : vector<1x1x32xf32> to vector<1x32xf32>
    %cst_51 = arith.constant dense<0.000000e+00> : vector<16xf32>
    %97 = vector.multi_reduction <add>, %92, %cst_51 [1] : vector<16x32xf32> to vector<16xf32>
    %98 = vector.shape_cast %97 : vector<16xf32> to vector<16x1xf32>
    %cst_52 = arith.constant 3.200000e+01 : f32
    %99 = vector.broadcast %cst_52 : f32 to vector<16x1xf32>
    %100 = arith.divf %98, %99 : vector<16x1xf32>
    %101 = vector.broadcast %100 : vector<16x1xf32> to vector<16x32xf32>
    %102 = arith.subf %92, %101 : vector<16x32xf32>
    %103 = arith.mulf %102, %102 : vector<16x32xf32>
    %cst_53 = arith.constant dense<0.000000e+00> : vector<16xf32>
    %104 = vector.multi_reduction <add>, %103, %cst_53 [1] : vector<16x32xf32> to vector<16xf32>
    %105 = vector.shape_cast %104 : vector<16xf32> to vector<16x1xf32>
    %cst_54 = arith.constant 3.200000e+01 : f32
    %106 = vector.broadcast %cst_54 : f32 to vector<16x1xf32>
    %107 = arith.divf %105, %106 : vector<16x1xf32>
    %cst_55 = arith.constant 9.99999974E-6 : f32
    %108 = vector.broadcast %cst_55 : f32 to vector<16x1xf32>
    %109 = arith.addf %107, %108 : vector<16x1xf32>
    %110 = math.rsqrt %109 : vector<16x1xf32>
    %111 = vector.broadcast %110 : vector<16x1xf32> to vector<16x32xf32>
    %112 = arith.mulf %102, %111 : vector<16x32xf32>
    %113 = vector.broadcast %94 : vector<1x32xf32> to vector<16x32xf32>
    %114 = arith.mulf %112, %113 : vector<16x32xf32>
    %115 = vector.broadcast %96 : vector<1x32xf32> to vector<16x32xf32>
    %116 = arith.addf %114, %115 : vector<16x32xf32>
    %c0_56 = arith.constant 0 : index
    %c0_57 = arith.constant 0 : index
    %c0_58 = arith.constant 0 : index
    %117 = vector.load %arg13[%c0_56, %c0_57, %c0_58] : memref<2x32x128xf32, #tpu.memory_space<vmem>>, vector<1x32x128xf32>
    %118 = vector.shape_cast %117 : vector<1x32x128xf32> to vector<32x128xf32>
    %cst_59 = arith.constant dense<0.000000e+00> : vector<16x128xf32>
    %119 = tpu.matmul %116, %118, %cst_59 {dimension_numbers = #tpu.dot_dimension_numbers<[1], [0], [0], [1], [0, 0, 1, 1], [], []>} : vector<16x32xf32>, vector<32x128xf32>, vector<16x128xf32> -> vector<16x128xf32>
    %c0_60 = arith.constant 0 : index
    %c0_61 = arith.constant 0 : index
    %c0_62 = arith.constant 0 : index
    %120 = vector.load %arg14[%c0_60, %c0_61, %c0_62] : memref<2x1x128xf32, #tpu.memory_space<vmem>>, vector<1x1x128xf32>
    %121 = vector.shape_cast %120 : vector<1x1x128xf32> to vector<1x128xf32>
    %122 = vector.broadcast %121 : vector<1x128xf32> to vector<16x128xf32>
    %123 = arith.addf %119, %122 : vector<16x128xf32>
    %124 = arith.mulf %123, %123 : vector<16x128xf32>
    %125 = arith.mulf %123, %124 : vector<16x128xf32>
    %cst_63 = arith.constant 4.471500e-02 : f32
    %126 = vector.broadcast %cst_63 : f32 to vector<16x128xf32>
    %127 = arith.mulf %126, %125 : vector<16x128xf32>
    %128 = arith.addf %123, %127 : vector<16x128xf32>
    %cst_64 = arith.constant 0.797884583 : f32
    %129 = vector.broadcast %cst_64 : f32 to vector<16x128xf32>
    %130 = arith.mulf %129, %128 : vector<16x128xf32>
    %131 = math.tanh %130 : vector<16x128xf32>
    %cst_65 = arith.constant 1.000000e+00 : f32
    %132 = vector.broadcast %cst_65 : f32 to vector<16x128xf32>
    %133 = arith.addf %132, %131 : vector<16x128xf32>
    %cst_66 = arith.constant 5.000000e-01 : f32
    %134 = vector.broadcast %cst_66 : f32 to vector<16x128xf32>
    %135 = arith.mulf %134, %133 : vector<16x128xf32>
    %136 = arith.mulf %123, %135 : vector<16x128xf32>
    %c0_67 = arith.constant 0 : index
    %c0_68 = arith.constant 0 : index
    %c0_69 = arith.constant 0 : index
    %137 = vector.load %arg15[%c0_67, %c0_68, %c0_69] : memref<2x128x32xf32, #tpu.memory_space<vmem>>, vector<1x128x32xf32>
    %138 = vector.shape_cast %137 : vector<1x128x32xf32> to vector<128x32xf32>
    %cst_70 = arith.constant dense<0.000000e+00> : vector<16x32xf32>
    %139 = tpu.matmul %136, %138, %cst_70 {dimension_numbers = #tpu.dot_dimension_numbers<[1], [0], [0], [1], [0, 0, 1, 1], [], []>} : vector<16x128xf32>, vector<128x32xf32>, vector<16x32xf32> -> vector<16x32xf32>
    %140 = arith.addf %92, %139 : vector<16x32xf32>
    %c0_71 = arith.constant 0 : index
    %c0_72 = arith.constant 0 : index
    %c0_73 = arith.constant 0 : index
    %141 = vector.load %arg16[%c0_71, %c0_72, %c0_73] : memref<2x1x32xf32, #tpu.memory_space<vmem>>, vector<1x1x32xf32>
    %142 = vector.shape_cast %141 : vector<1x1x32xf32> to vector<1x32xf32>
    %143 = vector.broadcast %142 : vector<1x32xf32> to vector<16x32xf32>
    %144 = arith.addf %140, %143 : vector<16x32xf32>
    %c1_74 = arith.constant 1 : index
    %c0_75 = arith.constant 0 : index
    %c0_76 = arith.constant 0 : index
    %145 = vector.load %arg5[%c1_74, %c0_75, %c0_76] : memref<2x1x32xf32, #tpu.memory_space<vmem>>, vector<1x1x32xf32>
    %146 = vector.shape_cast %145 : vector<1x1x32xf32> to vector<1x32xf32>
    %c1_77 = arith.constant 1 : index
    %c0_78 = arith.constant 0 : index
    %c0_79 = arith.constant 0 : index
    %147 = vector.load %arg6[%c1_77, %c0_78, %c0_79] : memref<2x1x32xf32, #tpu.memory_space<vmem>>, vector<1x1x32xf32>
    %148 = vector.shape_cast %147 : vector<1x1x32xf32> to vector<1x32xf32>
    %cst_80 = arith.constant dense<0.000000e+00> : vector<16xf32>
    %149 = vector.multi_reduction <add>, %144, %cst_80 [1] : vector<16x32xf32> to vector<16xf32>
    %150 = vector.shape_cast %149 : vector<16xf32> to vector<16x1xf32>
    %cst_81 = arith.constant 3.200000e+01 : f32
    %151 = vector.broadcast %cst_81 : f32 to vector<16x1xf32>
    %152 = arith.divf %150, %151 : vector<16x1xf32>
    %153 = vector.broadcast %152 : vector<16x1xf32> to vector<16x32xf32>
    %154 = arith.subf %144, %153 : vector<16x32xf32>
    %155 = arith.mulf %154, %154 : vector<16x32xf32>
    %cst_82 = arith.constant dense<0.000000e+00> : vector<16xf32>
    %156 = vector.multi_reduction <add>, %155, %cst_82 [1] : vector<16x32xf32> to vector<16xf32>
    %157 = vector.shape_cast %156 : vector<16xf32> to vector<16x1xf32>
    %cst_83 = arith.constant 3.200000e+01 : f32
    %158 = vector.broadcast %cst_83 : f32 to vector<16x1xf32>
    %159 = arith.divf %157, %158 : vector<16x1xf32>
    %cst_84 = arith.constant 9.99999974E-6 : f32
    %160 = vector.broadcast %cst_84 : f32 to vector<16x1xf32>
    %161 = arith.addf %159, %160 : vector<16x1xf32>
    %162 = math.rsqrt %161 : vector<16x1xf32>
    %163 = vector.broadcast %162 : vector<16x1xf32> to vector<16x32xf32>
    %164 = arith.mulf %154, %163 : vector<16x32xf32>
    %165 = vector.broadcast %146 : vector<1x32xf32> to vector<16x32xf32>
    %166 = arith.mulf %164, %165 : vector<16x32xf32>
    %167 = vector.broadcast %148 : vector<1x32xf32> to vector<16x32xf32>
    %168 = arith.addf %166, %167 : vector<16x32xf32>
    %c1_85 = arith.constant 1 : index
    %c0_86 = arith.constant 0 : index
    %c0_87 = arith.constant 0 : index
    %169 = vector.load %arg7[%c1_85, %c0_86, %c0_87] : memref<2x32x96xf32, #tpu.memory_space<vmem>>, vector<1x32x96xf32>
    %170 = vector.shape_cast %169 : vector<1x32x96xf32> to vector<32x96xf32>
    %cst_88 = arith.constant dense<0.000000e+00> : vector<16x96xf32>
    %171 = tpu.matmul %168, %170, %cst_88 {dimension_numbers = #tpu.dot_dimension_numbers<[1], [0], [0], [1], [0, 0, 1, 1], [], []>} : vector<16x32xf32>, vector<32x96xf32>, vector<16x96xf32> -> vector<16x96xf32>
    %c1_89 = arith.constant 1 : index
    %c0_90 = arith.constant 0 : index
    %c0_91 = arith.constant 0 : index
    %172 = vector.load %arg8[%c1_89, %c0_90, %c0_91] : memref<2x1x96xf32, #tpu.memory_space<vmem>>, vector<1x1x96xf32>
    %173 = vector.shape_cast %172 : vector<1x1x96xf32> to vector<1x96xf32>
    %174 = vector.broadcast %173 : vector<1x96xf32> to vector<16x96xf32>
    %175 = arith.addf %171, %174 : vector<16x96xf32>
    %c1_92 = arith.constant 1 : index
    %c0_93 = arith.constant 0 : index
    %c0_94 = arith.constant 0 : index
    %176 = vector.load %arg10[%c1_92, %c0_93, %c0_94] : memref<2x1x32xf32, #tpu.memory_space<vmem>>, vector<1x1x32xf32>
    %177 = vector.shape_cast %176 : vector<1x1x32xf32> to vector<1x32xf32>
    %178 = vector.extract_strided_slice %175 {offsets = [0, 0], sizes = [16, 16], strides = [1, 1]} : vector<16x96xf32> to vector<16x16xf32>
    %179 = vector.extract_strided_slice %175 {offsets = [0, 32], sizes = [16, 16], strides = [1, 1]} : vector<16x96xf32> to vector<16x16xf32>
    %180 = vector.extract_strided_slice %175 {offsets = [0, 64], sizes = [16, 16], strides = [1, 1]} : vector<16x96xf32> to vector<16x16xf32>
    %cst_95 = arith.constant dense<0.000000e+00> : vector<16x16xf32>
    %181 = tpu.matmul %178, %179, %cst_95 {dimension_numbers = #tpu.dot_dimension_numbers<[1], [1], [0], [0], [0, 0, 1, 0], [], []>} : vector<16x16xf32>, vector<16x16xf32>, vector<16x16xf32> -> vector<16x16xf32>
    %cst_96 = arith.constant dense<0xFF800000> : vector<16xf32>
    %182 = vector.multi_reduction <maximumf>, %181, %cst_96 [1] : vector<16x16xf32> to vector<16xf32>
    %183 = vector.shape_cast %182 : vector<16xf32> to vector<16x1xf32>
    %184 = vector.broadcast %183 : vector<16x1xf32> to vector<16x16xf32>
    %185 = arith.subf %181, %184 : vector<16x16xf32>
    %186 = math.exp %185 : vector<16x16xf32>
    %cst_97 = arith.constant dense<0.000000e+00> : vector<16xf32>
    %187 = vector.multi_reduction <add>, %186, %cst_97 [1] : vector<16x16xf32> to vector<16xf32>
    %188 = vector.shape_cast %187 : vector<16xf32> to vector<16x1xf32>
    %189 = tpu.reciprocal %188 {approx = true} : vector<16x1xf32> -> vector<16x1xf32>
    %190 = vector.broadcast %189 : vector<16x1xf32> to vector<16x16xf32>
    %191 = arith.mulf %186, %190 : vector<16x16xf32>
    %cst_98 = arith.constant dense<0.000000e+00> : vector<16x16xf32>
    %192 = tpu.matmul %191, %180, %cst_98 {dimension_numbers = #tpu.dot_dimension_numbers<[1], [0], [0], [1], [0, 0, 1, 1], [], []>} : vector<16x16xf32>, vector<16x16xf32>, vector<16x16xf32> -> vector<16x16xf32>
    %c1_99 = arith.constant 1 : index
    %c0_100 = arith.constant 0 : index
    %c0_101 = arith.constant 0 : index
    %193 = vector.load %arg9[%c1_99, %c0_100, %c0_101] : memref<2x32x32xf32, #tpu.memory_space<vmem>>, vector<1x32x32xf32>
    %194 = vector.shape_cast %193 : vector<1x32x32xf32> to vector<32x32xf32>
    %195 = vector.extract_strided_slice %194 {offsets = [0, 0], sizes = [16, 32], strides = [1, 1]} : vector<32x32xf32> to vector<16x32xf32>
    %cst_102 = arith.constant dense<0.000000e+00> : vector<16x32xf32>
    %196 = tpu.matmul %192, %195, %cst_102 {dimension_numbers = #tpu.dot_dimension_numbers<[1], [0], [0], [1], [0, 0, 1, 1], [], []>} : vector<16x16xf32>, vector<16x32xf32>, vector<16x32xf32> -> vector<16x32xf32>
    %197 = vector.broadcast %177 : vector<1x32xf32> to vector<16x32xf32>
    %198 = arith.addf %197, %196 : vector<16x32xf32>
    %199 = vector.extract_strided_slice %175 {offsets = [0, 16], sizes = [16, 16], strides = [1, 1]} : vector<16x96xf32> to vector<16x16xf32>
    %200 = vector.extract_strided_slice %175 {offsets = [0, 48], sizes = [16, 16], strides = [1, 1]} : vector<16x96xf32> to vector<16x16xf32>
    %201 = vector.extract_strided_slice %175 {offsets = [0, 80], sizes = [16, 16], strides = [1, 1]} : vector<16x96xf32> to vector<16x16xf32>
    %cst_103 = arith.constant dense<0.000000e+00> : vector<16x16xf32>
    %202 = tpu.matmul %199, %200, %cst_103 {dimension_numbers = #tpu.dot_dimension_numbers<[1], [1], [0], [0], [0, 0, 1, 0], [], []>} : vector<16x16xf32>, vector<16x16xf32>, vector<16x16xf32> -> vector<16x16xf32>
    %cst_104 = arith.constant dense<0xFF800000> : vector<16xf32>
    %203 = vector.multi_reduction <maximumf>, %202, %cst_104 [1] : vector<16x16xf32> to vector<16xf32>
    %204 = vector.shape_cast %203 : vector<16xf32> to vector<16x1xf32>
    %205 = vector.broadcast %204 : vector<16x1xf32> to vector<16x16xf32>
    %206 = arith.subf %202, %205 : vector<16x16xf32>
    %207 = math.exp %206 : vector<16x16xf32>
    %cst_105 = arith.constant dense<0.000000e+00> : vector<16xf32>
    %208 = vector.multi_reduction <add>, %207, %cst_105 [1] : vector<16x16xf32> to vector<16xf32>
    %209 = vector.shape_cast %208 : vector<16xf32> to vector<16x1xf32>
    %210 = tpu.reciprocal %209 {approx = true} : vector<16x1xf32> -> vector<16x1xf32>
    %211 = vector.broadcast %210 : vector<16x1xf32> to vector<16x16xf32>
    %212 = arith.mulf %207, %211 : vector<16x16xf32>
    %cst_106 = arith.constant dense<0.000000e+00> : vector<16x16xf32>
    %213 = tpu.matmul %212, %201, %cst_106 {dimension_numbers = #tpu.dot_dimension_numbers<[1], [0], [0], [1], [0, 0, 1, 1], [], []>} : vector<16x16xf32>, vector<16x16xf32>, vector<16x16xf32> -> vector<16x16xf32>
    %c1_107 = arith.constant 1 : index
    %c0_108 = arith.constant 0 : index
    %c0_109 = arith.constant 0 : index
    %214 = vector.load %arg9[%c1_107, %c0_108, %c0_109] : memref<2x32x32xf32, #tpu.memory_space<vmem>>, vector<1x32x32xf32>
    %215 = vector.shape_cast %214 : vector<1x32x32xf32> to vector<32x32xf32>
    %216 = vector.extract_strided_slice %215 {offsets = [16, 0], sizes = [16, 32], strides = [1, 1]} : vector<32x32xf32> to vector<16x32xf32>
    %cst_110 = arith.constant dense<0.000000e+00> : vector<16x32xf32>
    %217 = tpu.matmul %213, %216, %cst_110 {dimension_numbers = #tpu.dot_dimension_numbers<[1], [0], [0], [1], [0, 0, 1, 1], [], []>} : vector<16x16xf32>, vector<16x32xf32>, vector<16x32xf32> -> vector<16x32xf32>
    %218 = arith.addf %198, %217 : vector<16x32xf32>
    %219 = arith.addf %144, %218 : vector<16x32xf32>
    %c1_111 = arith.constant 1 : index
    %c0_112 = arith.constant 0 : index
    %c0_113 = arith.constant 0 : index
    %220 = vector.load %arg11[%c1_111, %c0_112, %c0_113] : memref<2x1x32xf32, #tpu.memory_space<vmem>>, vector<1x1x32xf32>
    %221 = vector.shape_cast %220 : vector<1x1x32xf32> to vector<1x32xf32>
    %c1_114 = arith.constant 1 : index
    %c0_115 = arith.constant 0 : index
    %c0_116 = arith.constant 0 : index
    %222 = vector.load %arg12[%c1_114, %c0_115, %c0_116] : memref<2x1x32xf32, #tpu.memory_space<vmem>>, vector<1x1x32xf32>
    %223 = vector.shape_cast %222 : vector<1x1x32xf32> to vector<1x32xf32>
    %cst_117 = arith.constant dense<0.000000e+00> : vector<16xf32>
    %224 = vector.multi_reduction <add>, %219, %cst_117 [1] : vector<16x32xf32> to vector<16xf32>
    %225 = vector.shape_cast %224 : vector<16xf32> to vector<16x1xf32>
    %cst_118 = arith.constant 3.200000e+01 : f32
    %226 = vector.broadcast %cst_118 : f32 to vector<16x1xf32>
    %227 = arith.divf %225, %226 : vector<16x1xf32>
    %228 = vector.broadcast %227 : vector<16x1xf32> to vector<16x32xf32>
    %229 = arith.subf %219, %228 : vector<16x32xf32>
    %230 = arith.mulf %229, %229 : vector<16x32xf32>
    %cst_119 = arith.constant dense<0.000000e+00> : vector<16xf32>
    %231 = vector.multi_reduction <add>, %230, %cst_119 [1] : vector<16x32xf32> to vector<16xf32>
    %232 = vector.shape_cast %231 : vector<16xf32> to vector<16x1xf32>
    %cst_120 = arith.constant 3.200000e+01 : f32
    %233 = vector.broadcast %cst_120 : f32 to vector<16x1xf32>
    %234 = arith.divf %232, %233 : vector<16x1xf32>
    %cst_121 = arith.constant 9.99999974E-6 : f32
    %235 = vector.broadcast %cst_121 : f32 to vector<16x1xf32>
    %236 = arith.addf %234, %235 : vector<16x1xf32>
    %237 = math.rsqrt %236 : vector<16x1xf32>
    %238 = vector.broadcast %237 : vector<16x1xf32> to vector<16x32xf32>
    %239 = arith.mulf %229, %238 : vector<16x32xf32>
    %240 = vector.broadcast %221 : vector<1x32xf32> to vector<16x32xf32>
    %241 = arith.mulf %239, %240 : vector<16x32xf32>
    %242 = vector.broadcast %223 : vector<1x32xf32> to vector<16x32xf32>
    %243 = arith.addf %241, %242 : vector<16x32xf32>
    %c1_122 = arith.constant 1 : index
    %c0_123 = arith.constant 0 : index
    %c0_124 = arith.constant 0 : index
    %244 = vector.load %arg13[%c1_122, %c0_123, %c0_124] : memref<2x32x128xf32, #tpu.memory_space<vmem>>, vector<1x32x128xf32>
    %245 = vector.shape_cast %244 : vector<1x32x128xf32> to vector<32x128xf32>
    %cst_125 = arith.constant dense<0.000000e+00> : vector<16x128xf32>
    %246 = tpu.matmul %243, %245, %cst_125 {dimension_numbers = #tpu.dot_dimension_numbers<[1], [0], [0], [1], [0, 0, 1, 1], [], []>} : vector<16x32xf32>, vector<32x128xf32>, vector<16x128xf32> -> vector<16x128xf32>
    %c1_126 = arith.constant 1 : index
    %c0_127 = arith.constant 0 : index
    %c0_128 = arith.constant 0 : index
    %247 = vector.load %arg14[%c1_126, %c0_127, %c0_128] : memref<2x1x128xf32, #tpu.memory_space<vmem>>, vector<1x1x128xf32>
    %248 = vector.shape_cast %247 : vector<1x1x128xf32> to vector<1x128xf32>
    %249 = vector.broadcast %248 : vector<1x128xf32> to vector<16x128xf32>
    %250 = arith.addf %246, %249 : vector<16x128xf32>
    %251 = arith.mulf %250, %250 : vector<16x128xf32>
    %252 = arith.mulf %250, %251 : vector<16x128xf32>
    %cst_129 = arith.constant 4.471500e-02 : f32
    %253 = vector.broadcast %cst_129 : f32 to vector<16x128xf32>
    %254 = arith.mulf %253, %252 : vector<16x128xf32>
    %255 = arith.addf %250, %254 : vector<16x128xf32>
    %cst_130 = arith.constant 0.797884583 : f32
    %256 = vector.broadcast %cst_130 : f32 to vector<16x128xf32>
    %257 = arith.mulf %256, %255 : vector<16x128xf32>
    %258 = math.tanh %257 : vector<16x128xf32>
    %cst_131 = arith.constant 1.000000e+00 : f32
    %259 = vector.broadcast %cst_131 : f32 to vector<16x128xf32>
    %260 = arith.addf %259, %258 : vector<16x128xf32>
    %cst_132 = arith.constant 5.000000e-01 : f32
    %261 = vector.broadcast %cst_132 : f32 to vector<16x128xf32>
    %262 = arith.mulf %261, %260 : vector<16x128xf32>
    %263 = arith.mulf %250, %262 : vector<16x128xf32>
    %c1_133 = arith.constant 1 : index
    %c0_134 = arith.constant 0 : index
    %c0_135 = arith.constant 0 : index
    %264 = vector.load %arg15[%c1_133, %c0_134, %c0_135] : memref<2x128x32xf32, #tpu.memory_space<vmem>>, vector<1x128x32xf32>
    %265 = vector.shape_cast %264 : vector<1x128x32xf32> to vector<128x32xf32>
    %cst_136 = arith.constant dense<0.000000e+00> : vector<16x32xf32>
    %266 = tpu.matmul %263, %265, %cst_136 {dimension_numbers = #tpu.dot_dimension_numbers<[1], [0], [0], [1], [0, 0, 1, 1], [], []>} : vector<16x128xf32>, vector<128x32xf32>, vector<16x32xf32> -> vector<16x32xf32>
    %267 = arith.addf %219, %266 : vector<16x32xf32>
    %c1_137 = arith.constant 1 : index
    %c0_138 = arith.constant 0 : index
    %c0_139 = arith.constant 0 : index
    %268 = vector.load %arg16[%c1_137, %c0_138, %c0_139] : memref<2x1x32xf32, #tpu.memory_space<vmem>>, vector<1x1x32xf32>
    %269 = vector.shape_cast %268 : vector<1x1x32xf32> to vector<1x32xf32>
    %270 = vector.broadcast %269 : vector<1x32xf32> to vector<16x32xf32>
    %271 = arith.addf %267, %270 : vector<16x32xf32>
    %c0_140 = arith.constant 0 : index
    %c0_141 = arith.constant 0 : index
    %272 = vector.load %arg17[%c0_140, %c0_141] : memref<1x32xf32, #tpu.memory_space<vmem>>, vector<1x32xf32>
    %c0_142 = arith.constant 0 : index
    %c0_143 = arith.constant 0 : index
    %273 = vector.load %arg18[%c0_142, %c0_143] : memref<1x32xf32, #tpu.memory_space<vmem>>, vector<1x32xf32>
    %cst_144 = arith.constant dense<0.000000e+00> : vector<16xf32>
    %274 = vector.multi_reduction <add>, %271, %cst_144 [1] : vector<16x32xf32> to vector<16xf32>
    %275 = vector.shape_cast %274 : vector<16xf32> to vector<16x1xf32>
    %cst_145 = arith.constant 3.200000e+01 : f32
    %276 = vector.broadcast %cst_145 : f32 to vector<16x1xf32>
    %277 = arith.divf %275, %276 : vector<16x1xf32>
    %278 = vector.broadcast %277 : vector<16x1xf32> to vector<16x32xf32>
    %279 = arith.subf %271, %278 : vector<16x32xf32>
    %280 = arith.mulf %279, %279 : vector<16x32xf32>
    %cst_146 = arith.constant dense<0.000000e+00> : vector<16xf32>
    %281 = vector.multi_reduction <add>, %280, %cst_146 [1] : vector<16x32xf32> to vector<16xf32>
    %282 = vector.shape_cast %281 : vector<16xf32> to vector<16x1xf32>
    %cst_147 = arith.constant 3.200000e+01 : f32
    %283 = vector.broadcast %cst_147 : f32 to vector<16x1xf32>
    %284 = arith.divf %282, %283 : vector<16x1xf32>
    %cst_148 = arith.constant 9.99999974E-6 : f32
    %285 = vector.broadcast %cst_148 : f32 to vector<16x1xf32>
    %286 = arith.addf %284, %285 : vector<16x1xf32>
    %287 = math.rsqrt %286 : vector<16x1xf32>
    %288 = vector.broadcast %287 : vector<16x1xf32> to vector<16x32xf32>
    %289 = arith.mulf %279, %288 : vector<16x32xf32>
    %290 = vector.broadcast %272 : vector<1x32xf32> to vector<16x32xf32>
    %291 = arith.mulf %289, %290 : vector<16x32xf32>
    %292 = vector.broadcast %273 : vector<1x32xf32> to vector<16x32xf32>
    %293 = arith.addf %291, %292 : vector<16x32xf32>
    %c0_149 = arith.constant 0 : index
    %c0_150 = arith.constant 0 : index
    %294 = vector.load %arg20[%c0_149, %c0_150] : memref<1x16xf32, #tpu.memory_space<vmem>>, vector<1x16xf32>
    %295 = vector.extract_strided_slice %293 {offsets = [0, 0], sizes = [1, 32], strides = [1, 1]} : vector<16x32xf32> to vector<1x32xf32>
    %c0_151 = arith.constant 0 : index
    %c0_152 = arith.constant 0 : index
    %c0_153 = arith.constant 0 : index
    %296 = vector.load %arg19[%c0_151, %c0_152, %c0_153] : memref<16x32x16xf32, #tpu.memory_space<vmem>>, vector<1x32x16xf32>
    %297 = vector.shape_cast %296 : vector<1x32x16xf32> to vector<32x16xf32>
    %cst_154 = arith.constant dense<0.000000e+00> : vector<1x16xf32>
    %298 = tpu.matmul %295, %297, %cst_154 {dimension_numbers = #tpu.dot_dimension_numbers<[1], [0], [0], [1], [0, 0, 1, 1], [], []>} : vector<1x32xf32>, vector<32x16xf32>, vector<1x16xf32> -> vector<1x16xf32>
    %299 = arith.addf %294, %298 : vector<1x16xf32>
    %300 = vector.extract_strided_slice %293 {offsets = [1, 0], sizes = [1, 32], strides = [1, 1]} : vector<16x32xf32> to vector<1x32xf32>
    %c1_155 = arith.constant 1 : index
    %c0_156 = arith.constant 0 : index
    %c0_157 = arith.constant 0 : index
    %301 = vector.load %arg19[%c1_155, %c0_156, %c0_157] : memref<16x32x16xf32, #tpu.memory_space<vmem>>, vector<1x32x16xf32>
    %302 = vector.shape_cast %301 : vector<1x32x16xf32> to vector<32x16xf32>
    %cst_158 = arith.constant dense<0.000000e+00> : vector<1x16xf32>
    %303 = tpu.matmul %300, %302, %cst_158 {dimension_numbers = #tpu.dot_dimension_numbers<[1], [0], [0], [1], [0, 0, 1, 1], [], []>} : vector<1x32xf32>, vector<32x16xf32>, vector<1x16xf32> -> vector<1x16xf32>
    %304 = arith.addf %299, %303 : vector<1x16xf32>
    %305 = vector.extract_strided_slice %293 {offsets = [2, 0], sizes = [1, 32], strides = [1, 1]} : vector<16x32xf32> to vector<1x32xf32>
    %c2 = arith.constant 2 : index
    %c0_159 = arith.constant 0 : index
    %c0_160 = arith.constant 0 : index
    %306 = vector.load %arg19[%c2, %c0_159, %c0_160] : memref<16x32x16xf32, #tpu.memory_space<vmem>>, vector<1x32x16xf32>
    %307 = vector.shape_cast %306 : vector<1x32x16xf32> to vector<32x16xf32>
    %cst_161 = arith.constant dense<0.000000e+00> : vector<1x16xf32>
    %308 = tpu.matmul %305, %307, %cst_161 {dimension_numbers = #tpu.dot_dimension_numbers<[1], [0], [0], [1], [0, 0, 1, 1], [], []>} : vector<1x32xf32>, vector<32x16xf32>, vector<1x16xf32> -> vector<1x16xf32>
    %309 = arith.addf %304, %308 : vector<1x16xf32>
    %310 = vector.extract_strided_slice %293 {offsets = [3, 0], sizes = [1, 32], strides = [1, 1]} : vector<16x32xf32> to vector<1x32xf32>
    %c3 = arith.constant 3 : index
    %c0_162 = arith.constant 0 : index
    %c0_163 = arith.constant 0 : index
    %311 = vector.load %arg19[%c3, %c0_162, %c0_163] : memref<16x32x16xf32, #tpu.memory_space<vmem>>, vector<1x32x16xf32>
    %312 = vector.shape_cast %311 : vector<1x32x16xf32> to vector<32x16xf32>
    %cst_164 = arith.constant dense<0.000000e+00> : vector<1x16xf32>
    %313 = tpu.matmul %310, %312, %cst_164 {dimension_numbers = #tpu.dot_dimension_numbers<[1], [0], [0], [1], [0, 0, 1, 1], [], []>} : vector<1x32xf32>, vector<32x16xf32>, vector<1x16xf32> -> vector<1x16xf32>
    %314 = arith.addf %309, %313 : vector<1x16xf32>
    %315 = vector.extract_strided_slice %293 {offsets = [4, 0], sizes = [1, 32], strides = [1, 1]} : vector<16x32xf32> to vector<1x32xf32>
    %c4 = arith.constant 4 : index
    %c0_165 = arith.constant 0 : index
    %c0_166 = arith.constant 0 : index
    %316 = vector.load %arg19[%c4, %c0_165, %c0_166] : memref<16x32x16xf32, #tpu.memory_space<vmem>>, vector<1x32x16xf32>
    %317 = vector.shape_cast %316 : vector<1x32x16xf32> to vector<32x16xf32>
    %cst_167 = arith.constant dense<0.000000e+00> : vector<1x16xf32>
    %318 = tpu.matmul %315, %317, %cst_167 {dimension_numbers = #tpu.dot_dimension_numbers<[1], [0], [0], [1], [0, 0, 1, 1], [], []>} : vector<1x32xf32>, vector<32x16xf32>, vector<1x16xf32> -> vector<1x16xf32>
    %319 = arith.addf %314, %318 : vector<1x16xf32>
    %320 = vector.extract_strided_slice %293 {offsets = [5, 0], sizes = [1, 32], strides = [1, 1]} : vector<16x32xf32> to vector<1x32xf32>
    %c5 = arith.constant 5 : index
    %c0_168 = arith.constant 0 : index
    %c0_169 = arith.constant 0 : index
    %321 = vector.load %arg19[%c5, %c0_168, %c0_169] : memref<16x32x16xf32, #tpu.memory_space<vmem>>, vector<1x32x16xf32>
    %322 = vector.shape_cast %321 : vector<1x32x16xf32> to vector<32x16xf32>
    %cst_170 = arith.constant dense<0.000000e+00> : vector<1x16xf32>
    %323 = tpu.matmul %320, %322, %cst_170 {dimension_numbers = #tpu.dot_dimension_numbers<[1], [0], [0], [1], [0, 0, 1, 1], [], []>} : vector<1x32xf32>, vector<32x16xf32>, vector<1x16xf32> -> vector<1x16xf32>
    %324 = arith.addf %319, %323 : vector<1x16xf32>
    %325 = vector.extract_strided_slice %293 {offsets = [6, 0], sizes = [1, 32], strides = [1, 1]} : vector<16x32xf32> to vector<1x32xf32>
    %c6 = arith.constant 6 : index
    %c0_171 = arith.constant 0 : index
    %c0_172 = arith.constant 0 : index
    %326 = vector.load %arg19[%c6, %c0_171, %c0_172] : memref<16x32x16xf32, #tpu.memory_space<vmem>>, vector<1x32x16xf32>
    %327 = vector.shape_cast %326 : vector<1x32x16xf32> to vector<32x16xf32>
    %cst_173 = arith.constant dense<0.000000e+00> : vector<1x16xf32>
    %328 = tpu.matmul %325, %327, %cst_173 {dimension_numbers = #tpu.dot_dimension_numbers<[1], [0], [0], [1], [0, 0, 1, 1], [], []>} : vector<1x32xf32>, vector<32x16xf32>, vector<1x16xf32> -> vector<1x16xf32>
    %329 = arith.addf %324, %328 : vector<1x16xf32>
    %330 = vector.extract_strided_slice %293 {offsets = [7, 0], sizes = [1, 32], strides = [1, 1]} : vector<16x32xf32> to vector<1x32xf32>
    %c7 = arith.constant 7 : index
    %c0_174 = arith.constant 0 : index
    %c0_175 = arith.constant 0 : index
    %331 = vector.load %arg19[%c7, %c0_174, %c0_175] : memref<16x32x16xf32, #tpu.memory_space<vmem>>, vector<1x32x16xf32>
    %332 = vector.shape_cast %331 : vector<1x32x16xf32> to vector<32x16xf32>
    %cst_176 = arith.constant dense<0.000000e+00> : vector<1x16xf32>
    %333 = tpu.matmul %330, %332, %cst_176 {dimension_numbers = #tpu.dot_dimension_numbers<[1], [0], [0], [1], [0, 0, 1, 1], [], []>} : vector<1x32xf32>, vector<32x16xf32>, vector<1x16xf32> -> vector<1x16xf32>
    %334 = arith.addf %329, %333 : vector<1x16xf32>
    %335 = vector.extract_strided_slice %293 {offsets = [8, 0], sizes = [1, 32], strides = [1, 1]} : vector<16x32xf32> to vector<1x32xf32>
    %c8 = arith.constant 8 : index
    %c0_177 = arith.constant 0 : index
    %c0_178 = arith.constant 0 : index
    %336 = vector.load %arg19[%c8, %c0_177, %c0_178] : memref<16x32x16xf32, #tpu.memory_space<vmem>>, vector<1x32x16xf32>
    %337 = vector.shape_cast %336 : vector<1x32x16xf32> to vector<32x16xf32>
    %cst_179 = arith.constant dense<0.000000e+00> : vector<1x16xf32>
    %338 = tpu.matmul %335, %337, %cst_179 {dimension_numbers = #tpu.dot_dimension_numbers<[1], [0], [0], [1], [0, 0, 1, 1], [], []>} : vector<1x32xf32>, vector<32x16xf32>, vector<1x16xf32> -> vector<1x16xf32>
    %339 = arith.addf %334, %338 : vector<1x16xf32>
    %340 = vector.extract_strided_slice %293 {offsets = [9, 0], sizes = [1, 32], strides = [1, 1]} : vector<16x32xf32> to vector<1x32xf32>
    %c9 = arith.constant 9 : index
    %c0_180 = arith.constant 0 : index
    %c0_181 = arith.constant 0 : index
    %341 = vector.load %arg19[%c9, %c0_180, %c0_181] : memref<16x32x16xf32, #tpu.memory_space<vmem>>, vector<1x32x16xf32>
    %342 = vector.shape_cast %341 : vector<1x32x16xf32> to vector<32x16xf32>
    %cst_182 = arith.constant dense<0.000000e+00> : vector<1x16xf32>
    %343 = tpu.matmul %340, %342, %cst_182 {dimension_numbers = #tpu.dot_dimension_numbers<[1], [0], [0], [1], [0, 0, 1, 1], [], []>} : vector<1x32xf32>, vector<32x16xf32>, vector<1x16xf32> -> vector<1x16xf32>
    %344 = arith.addf %339, %343 : vector<1x16xf32>
    %345 = vector.extract_strided_slice %293 {offsets = [10, 0], sizes = [1, 32], strides = [1, 1]} : vector<16x32xf32> to vector<1x32xf32>
    %c10 = arith.constant 10 : index
    %c0_183 = arith.constant 0 : index
    %c0_184 = arith.constant 0 : index
    %346 = vector.load %arg19[%c10, %c0_183, %c0_184] : memref<16x32x16xf32, #tpu.memory_space<vmem>>, vector<1x32x16xf32>
    %347 = vector.shape_cast %346 : vector<1x32x16xf32> to vector<32x16xf32>
    %cst_185 = arith.constant dense<0.000000e+00> : vector<1x16xf32>
    %348 = tpu.matmul %345, %347, %cst_185 {dimension_numbers = #tpu.dot_dimension_numbers<[1], [0], [0], [1], [0, 0, 1, 1], [], []>} : vector<1x32xf32>, vector<32x16xf32>, vector<1x16xf32> -> vector<1x16xf32>
    %349 = arith.addf %344, %348 : vector<1x16xf32>
    %350 = vector.extract_strided_slice %293 {offsets = [11, 0], sizes = [1, 32], strides = [1, 1]} : vector<16x32xf32> to vector<1x32xf32>
    %c11 = arith.constant 11 : index
    %c0_186 = arith.constant 0 : index
    %c0_187 = arith.constant 0 : index
    %351 = vector.load %arg19[%c11, %c0_186, %c0_187] : memref<16x32x16xf32, #tpu.memory_space<vmem>>, vector<1x32x16xf32>
    %352 = vector.shape_cast %351 : vector<1x32x16xf32> to vector<32x16xf32>
    %cst_188 = arith.constant dense<0.000000e+00> : vector<1x16xf32>
    %353 = tpu.matmul %350, %352, %cst_188 {dimension_numbers = #tpu.dot_dimension_numbers<[1], [0], [0], [1], [0, 0, 1, 1], [], []>} : vector<1x32xf32>, vector<32x16xf32>, vector<1x16xf32> -> vector<1x16xf32>
    %354 = arith.addf %349, %353 : vector<1x16xf32>
    %355 = vector.extract_strided_slice %293 {offsets = [12, 0], sizes = [1, 32], strides = [1, 1]} : vector<16x32xf32> to vector<1x32xf32>
    %c12 = arith.constant 12 : index
    %c0_189 = arith.constant 0 : index
    %c0_190 = arith.constant 0 : index
    %356 = vector.load %arg19[%c12, %c0_189, %c0_190] : memref<16x32x16xf32, #tpu.memory_space<vmem>>, vector<1x32x16xf32>
    %357 = vector.shape_cast %356 : vector<1x32x16xf32> to vector<32x16xf32>
    %cst_191 = arith.constant dense<0.000000e+00> : vector<1x16xf32>
    %358 = tpu.matmul %355, %357, %cst_191 {dimension_numbers = #tpu.dot_dimension_numbers<[1], [0], [0], [1], [0, 0, 1, 1], [], []>} : vector<1x32xf32>, vector<32x16xf32>, vector<1x16xf32> -> vector<1x16xf32>
    %359 = arith.addf %354, %358 : vector<1x16xf32>
    %360 = vector.extract_strided_slice %293 {offsets = [13, 0], sizes = [1, 32], strides = [1, 1]} : vector<16x32xf32> to vector<1x32xf32>
    %c13 = arith.constant 13 : index
    %c0_192 = arith.constant 0 : index
    %c0_193 = arith.constant 0 : index
    %361 = vector.load %arg19[%c13, %c0_192, %c0_193] : memref<16x32x16xf32, #tpu.memory_space<vmem>>, vector<1x32x16xf32>
    %362 = vector.shape_cast %361 : vector<1x32x16xf32> to vector<32x16xf32>
    %cst_194 = arith.constant dense<0.000000e+00> : vector<1x16xf32>
    %363 = tpu.matmul %360, %362, %cst_194 {dimension_numbers = #tpu.dot_dimension_numbers<[1], [0], [0], [1], [0, 0, 1, 1], [], []>} : vector<1x32xf32>, vector<32x16xf32>, vector<1x16xf32> -> vector<1x16xf32>
    %364 = arith.addf %359, %363 : vector<1x16xf32>
    %365 = vector.extract_strided_slice %293 {offsets = [14, 0], sizes = [1, 32], strides = [1, 1]} : vector<16x32xf32> to vector<1x32xf32>
    %c14 = arith.constant 14 : index
    %c0_195 = arith.constant 0 : index
    %c0_196 = arith.constant 0 : index
    %366 = vector.load %arg19[%c14, %c0_195, %c0_196] : memref<16x32x16xf32, #tpu.memory_space<vmem>>, vector<1x32x16xf32>
    %367 = vector.shape_cast %366 : vector<1x32x16xf32> to vector<32x16xf32>
    %cst_197 = arith.constant dense<0.000000e+00> : vector<1x16xf32>
    %368 = tpu.matmul %365, %367, %cst_197 {dimension_numbers = #tpu.dot_dimension_numbers<[1], [0], [0], [1], [0, 0, 1, 1], [], []>} : vector<1x32xf32>, vector<32x16xf32>, vector<1x16xf32> -> vector<1x16xf32>
    %369 = arith.addf %364, %368 : vector<1x16xf32>
    %370 = vector.extract_strided_slice %293 {offsets = [15, 0], sizes = [1, 32], strides = [1, 1]} : vector<16x32xf32> to vector<1x32xf32>
    %c15 = arith.constant 15 : index
    %c0_198 = arith.constant 0 : index
    %c0_199 = arith.constant 0 : index
    %371 = vector.load %arg19[%c15, %c0_198, %c0_199] : memref<16x32x16xf32, #tpu.memory_space<vmem>>, vector<1x32x16xf32>
    %372 = vector.shape_cast %371 : vector<1x32x16xf32> to vector<32x16xf32>
    %cst_200 = arith.constant dense<0.000000e+00> : vector<1x16xf32>
    %373 = tpu.matmul %370, %372, %cst_200 {dimension_numbers = #tpu.dot_dimension_numbers<[1], [0], [0], [1], [0, 0, 1, 1], [], []>} : vector<1x32xf32>, vector<32x16xf32>, vector<1x16xf32> -> vector<1x16xf32>
    %374 = arith.addf %369, %373 : vector<1x16xf32>
    %c0_201 = arith.constant 0 : index
    %c0_202 = arith.constant 0 : index
    %c0_203 = arith.constant 0 : index
    %375 = vector.load %arg21[%c0_201, %c0_202, %c0_203] : memref<1x1x16xf32, #tpu.memory_space<vmem>>, vector<1x1x16xf32>
    %376 = vector.shape_cast %375 : vector<1x1x16xf32> to vector<1x16xf32>
    %377 = vector.shape_cast %374 : vector<1x16xf32> to vector<1x1x16xf32>
    tpu.vector_store %arg21[%c0_201, %c0_202, %c0_203], %377 {strides = array<i32>} : memref<1x1x16xf32, #tpu.memory_space<vmem>>, vector<1x1x16xf32>,
    return
  }
  func.func @transform_0(%arg0: i32) -> (i32, i32, i32) {
    %c0_i32 = arith.constant 0 : i32
    %c0_i32_0 = arith.constant 0 : i32
    %c0_i32_1 = arith.constant 0 : i32
    return %arg0, %c0_i32, %c0_i32_0 : i32, i32, i32
  }
  func.func @transform_1(%arg0: i32) -> (i32, i32) {
    %c0_i32 = arith.constant 0 : i32
    %c0_i32_0 = arith.constant 0 : i32
    %c0_i32_1 = arith.constant 0 : i32
    return %c0_i32, %c0_i32_0 : i32, i32
  }
  func.func @transform_2(%arg0: i32) -> (i32, i32) {
    %c0_i32 = arith.constant 0 : i32
    %c0_i32_0 = arith.constant 0 : i32
    %c0_i32_1 = arith.constant 0 : i32
    return %c0_i32, %c0_i32_0 : i32, i32
  }
  func.func @transform_3(%arg0: i32) -> (i32, i32) {
    %c0_i32 = arith.constant 0 : i32
    %c0_i32_0 = arith.constant 0 : i32
    %c0_i32_1 = arith.constant 0 : i32
    return %c0_i32, %c0_i32_0 : i32, i32
  }
  func.func @transform_4(%arg0: i32) -> (i32, i32, i32) {
    %c0_i32 = arith.constant 0 : i32
    %c0_i32_0 = arith.constant 0 : i32
    %c0_i32_1 = arith.constant 0 : i32
    %c0_i32_2 = arith.constant 0 : i32
    return %c0_i32, %c0_i32_0, %c0_i32_1 : i32, i32, i32
  }
  func.func @transform_5(%arg0: i32) -> (i32, i32, i32) {
    %c0_i32 = arith.constant 0 : i32
    %c0_i32_0 = arith.constant 0 : i32
    %c0_i32_1 = arith.constant 0 : i32
    %c0_i32_2 = arith.constant 0 : i32
    return %c0_i32, %c0_i32_0, %c0_i32_1 : i32, i32, i32
  }
  func.func @transform_6(%arg0: i32) -> (i32, i32, i32) {
    %c0_i32 = arith.constant 0 : i32
    %c0_i32_0 = arith.constant 0 : i32
    %c0_i32_1 = arith.constant 0 : i32
    %c0_i32_2 = arith.constant 0 : i32
    return %c0_i32, %c0_i32_0, %c0_i32_1 : i32, i32, i32
  }
  func.func @transform_7(%arg0: i32) -> (i32, i32, i32) {
    %c0_i32 = arith.constant 0 : i32
    %c0_i32_0 = arith.constant 0 : i32
    %c0_i32_1 = arith.constant 0 : i32
    %c0_i32_2 = arith.constant 0 : i32
    return %c0_i32, %c0_i32_0, %c0_i32_1 : i32, i32, i32
  }
  func.func @transform_8(%arg0: i32) -> (i32, i32, i32) {
    %c0_i32 = arith.constant 0 : i32
    %c0_i32_0 = arith.constant 0 : i32
    %c0_i32_1 = arith.constant 0 : i32
    %c0_i32_2 = arith.constant 0 : i32
    return %c0_i32, %c0_i32_0, %c0_i32_1 : i32, i32, i32
  }
  func.func @transform_9(%arg0: i32) -> (i32, i32, i32) {
    %c0_i32 = arith.constant 0 : i32
    %c0_i32_0 = arith.constant 0 : i32
    %c0_i32_1 = arith.constant 0 : i32
    %c0_i32_2 = arith.constant 0 : i32
    return %c0_i32, %c0_i32_0, %c0_i32_1 : i32, i32, i32
  }
  func.func @transform_10(%arg0: i32) -> (i32, i32, i32) {
    %c0_i32 = arith.constant 0 : i32
    %c0_i32_0 = arith.constant 0 : i32
    %c0_i32_1 = arith.constant 0 : i32
    %c0_i32_2 = arith.constant 0 : i32
    return %c0_i32, %c0_i32_0, %c0_i32_1 : i32, i32, i32
  }
  func.func @transform_11(%arg0: i32) -> (i32, i32, i32) {
    %c0_i32 = arith.constant 0 : i32
    %c0_i32_0 = arith.constant 0 : i32
    %c0_i32_1 = arith.constant 0 : i32
    %c0_i32_2 = arith.constant 0 : i32
    return %c0_i32, %c0_i32_0, %c0_i32_1 : i32, i32, i32
  }
  func.func @transform_12(%arg0: i32) -> (i32, i32, i32) {
    %c0_i32 = arith.constant 0 : i32
    %c0_i32_0 = arith.constant 0 : i32
    %c0_i32_1 = arith.constant 0 : i32
    %c0_i32_2 = arith.constant 0 : i32
    return %c0_i32, %c0_i32_0, %c0_i32_1 : i32, i32, i32
  }
  func.func @transform_13(%arg0: i32) -> (i32, i32, i32) {
    %c0_i32 = arith.constant 0 : i32
    %c0_i32_0 = arith.constant 0 : i32
    %c0_i32_1 = arith.constant 0 : i32
    %c0_i32_2 = arith.constant 0 : i32
    return %c0_i32, %c0_i32_0, %c0_i32_1 : i32, i32, i32
  }
  func.func @transform_14(%arg0: i32) -> (i32, i32, i32) {
    %c0_i32 = arith.constant 0 : i32
    %c0_i32_0 = arith.constant 0 : i32
    %c0_i32_1 = arith.constant 0 : i32
    %c0_i32_2 = arith.constant 0 : i32
    return %c0_i32, %c0_i32_0, %c0_i32_1 : i32, i32, i32
  }
  func.func @transform_15(%arg0: i32) -> (i32, i32, i32) {
    %c0_i32 = arith.constant 0 : i32
    %c0_i32_0 = arith.constant 0 : i32
    %c0_i32_1 = arith.constant 0 : i32
    %c0_i32_2 = arith.constant 0 : i32
    return %c0_i32, %c0_i32_0, %c0_i32_1 : i32, i32, i32
  }
  func.func @transform_16(%arg0: i32) -> (i32, i32) {
    %c0_i32 = arith.constant 0 : i32
    %c0_i32_0 = arith.constant 0 : i32
    %c0_i32_1 = arith.constant 0 : i32
    return %c0_i32, %c0_i32_0 : i32, i32
  }
  func.func @transform_17(%arg0: i32) -> (i32, i32) {
    %c0_i32 = arith.constant 0 : i32
    %c0_i32_0 = arith.constant 0 : i32
    %c0_i32_1 = arith.constant 0 : i32
    return %c0_i32, %c0_i32_0 : i32, i32
  }
  func.func @transform_18(%arg0: i32) -> (i32, i32, i32) {
    %c0_i32 = arith.constant 0 : i32
    %c0_i32_0 = arith.constant 0 : i32
    %c0_i32_1 = arith.constant 0 : i32
    %c0_i32_2 = arith.constant 0 : i32
    return %c0_i32, %c0_i32_0, %c0_i32_1 : i32, i32, i32
  }
  func.func @transform_19(%arg0: i32) -> (i32, i32) {
    %c0_i32 = arith.constant 0 : i32
    %c0_i32_0 = arith.constant 0 : i32
    %c0_i32_1 = arith.constant 0 : i32
    return %c0_i32, %c0_i32_0 : i32, i32
  }
  func.func @transform_20(%arg0: i32) -> (i32, i32, i32) {
    %c0_i32 = arith.constant 0 : i32
    %c0_i32_0 = arith.constant 0 : i32
    %c0_i32_1 = arith.constant 0 : i32
    return %arg0, %c0_i32, %c0_i32_0 : i32, i32, i32
  }
}

module attributes {stable_mosaic.version = 11 : i64} {
  func.func @_model_kernel(%arg0: i32, %arg1: memref<1x8x2xf32, #tpu.memory_space<vmem>>, %arg2: memref<2x32xf32, #tpu.memory_space<vmem>>, %arg3: memref<1x32xf32, #tpu.memory_space<vmem>>, %arg4: memref<8x32xf32, #tpu.memory_space<vmem>>, %arg5: memref<2x1x32xf32, #tpu.memory_space<vmem>>, %arg6: memref<2x1x32xf32, #tpu.memory_space<vmem>>, %arg7: memref<2x32x96xf32, #tpu.memory_space<vmem>>, %arg8: memref<2x1x96xf32, #tpu.memory_space<vmem>>, %arg9: memref<2x32x32xf32, #tpu.memory_space<vmem>>, %arg10: memref<2x1x32xf32, #tpu.memory_space<vmem>>, %arg11: memref<2x1x32xf32, #tpu.memory_space<vmem>>, %arg12: memref<2x1x32xf32, #tpu.memory_space<vmem>>, %arg13: memref<2x32x128xf32, #tpu.memory_space<vmem>>, %arg14: memref<2x1x128xf32, #tpu.memory_space<vmem>>, %arg15: memref<2x128x32xf32, #tpu.memory_space<vmem>>, %arg16: memref<2x1x32xf32, #tpu.memory_space<vmem>>, %arg17: memref<1x32xf32, #tpu.memory_space<vmem>>, %arg18: memref<1x32xf32, #tpu.memory_space<vmem>>, %arg19: memref<8x32x16xf32, #tpu.memory_space<vmem>>, %arg20: memref<1x16xf32, #tpu.memory_space<vmem>>, %arg21: memref<1x1x16xf32, #tpu.memory_space<vmem>>) attributes {dimension_semantics = [#tpu.dimension_semantics<parallel>], iteration_bounds = array<i64: 2>, scalar_prefetch = 0 : i64, scratch_operands = 0 : i64, tpu.core_type = #tpu.core_type<tc>, window_params = [{transform_indices = @transform_0, window_bounds = array<i64: 1, 8, 2>}, {pipeline_mode = #tpu.pipeline_mode<synchronous>, transform_indices = @transform_1, window_bounds = array<i64: 2, 32>}, {pipeline_mode = #tpu.pipeline_mode<synchronous>, transform_indices = @transform_2, window_bounds = array<i64: 1, 32>}, {pipeline_mode = #tpu.pipeline_mode<synchronous>, transform_indices = @transform_3, window_bounds = array<i64: 8, 32>}, {pipeline_mode = #tpu.pipeline_mode<synchronous>, transform_indices = @transform_4, window_bounds = array<i64: 2, 1, 32>}, {pipeline_mode = #tpu.pipeline_mode<synchronous>, transform_indices = @transform_5, window_bounds = array<i64: 2, 1, 32>}, {pipeline_mode = #tpu.pipeline_mode<synchronous>, transform_indices = @transform_6, window_bounds = array<i64: 2, 32, 96>}, {pipeline_mode = #tpu.pipeline_mode<synchronous>, transform_indices = @transform_7, window_bounds = array<i64: 2, 1, 96>}, {pipeline_mode = #tpu.pipeline_mode<synchronous>, transform_indices = @transform_8, window_bounds = array<i64: 2, 32, 32>}, {pipeline_mode = #tpu.pipeline_mode<synchronous>, transform_indices = @transform_9, window_bounds = array<i64: 2, 1, 32>}, {pipeline_mode = #tpu.pipeline_mode<synchronous>, transform_indices = @transform_10, window_bounds = array<i64: 2, 1, 32>}, {pipeline_mode = #tpu.pipeline_mode<synchronous>, transform_indices = @transform_11, window_bounds = array<i64: 2, 1, 32>}, {pipeline_mode = #tpu.pipeline_mode<synchronous>, transform_indices = @transform_12, window_bounds = array<i64: 2, 32, 128>}, {pipeline_mode = #tpu.pipeline_mode<synchronous>, transform_indices = @transform_13, window_bounds = array<i64: 2, 1, 128>}, {pipeline_mode = #tpu.pipeline_mode<synchronous>, transform_indices = @transform_14, window_bounds = array<i64: 2, 128, 32>}, {pipeline_mode = #tpu.pipeline_mode<synchronous>, transform_indices = @transform_15, window_bounds = array<i64: 2, 1, 32>}, {pipeline_mode = #tpu.pipeline_mode<synchronous>, transform_indices = @transform_16, window_bounds = array<i64: 1, 32>}, {pipeline_mode = #tpu.pipeline_mode<synchronous>, transform_indices = @transform_17, window_bounds = array<i64: 1, 32>}, {pipeline_mode = #tpu.pipeline_mode<synchronous>, transform_indices = @transform_18, window_bounds = array<i64: 8, 32, 16>}, {pipeline_mode = #tpu.pipeline_mode<synchronous>, transform_indices = @transform_19, window_bounds = array<i64: 1, 16>}, {transform_indices = @transform_20, window_bounds = array<i64: 1, 1, 16>}]} {
    %c0 = arith.constant 0 : index
    %c0_0 = arith.constant 0 : index
    %c0_1 = arith.constant 0 : index
    %0 = vector.load %arg1[%c0, %c0_0, %c0_1] : memref<1x8x2xf32, #tpu.memory_space<vmem>>, vector<1x8x2xf32>
    %1 = vector.shape_cast %0 : vector<1x8x2xf32> to vector<8x2xf32>
    %2 = vector.extract_strided_slice %1 {offsets = [0, 0], sizes = [8, 1], strides = [1, 1]} : vector<8x2xf32> to vector<8x1xf32>
    %c0_2 = arith.constant 0 : index
    %c0_3 = arith.constant 0 : index
    %3 = vector.load %arg2[%c0_2, %c0_3] : memref<2x32xf32, #tpu.memory_space<vmem>>, vector<1x32xf32>
    %4 = vector.broadcast %2 : vector<8x1xf32> to vector<8x32xf32>
    %5 = vector.broadcast %3 : vector<1x32xf32> to vector<8x32xf32>
    %6 = arith.mulf %4, %5 : vector<8x32xf32>
    %7 = vector.extract_strided_slice %1 {offsets = [0, 1], sizes = [8, 1], strides = [1, 1]} : vector<8x2xf32> to vector<8x1xf32>
    %c1 = arith.constant 1 : index
    %c0_4 = arith.constant 0 : index
    %8 = vector.load %arg2[%c1, %c0_4] : memref<2x32xf32, #tpu.memory_space<vmem>>, vector<1x32xf32>
    %9 = vector.broadcast %7 : vector<8x1xf32> to vector<8x32xf32>
    %10 = vector.broadcast %8 : vector<1x32xf32> to vector<8x32xf32>
    %11 = arith.mulf %9, %10 : vector<8x32xf32>
    %12 = arith.addf %6, %11 : vector<8x32xf32>
    %c0_5 = arith.constant 0 : index
    %c0_6 = arith.constant 0 : index
    %13 = vector.load %arg3[%c0_5, %c0_6] : memref<1x32xf32, #tpu.memory_space<vmem>>, vector<1x32xf32>
    %14 = vector.broadcast %13 : vector<1x32xf32> to vector<8x32xf32>
    %15 = arith.addf %12, %14 : vector<8x32xf32>
    %c0_7 = arith.constant 0 : index
    %c0_8 = arith.constant 0 : index
    %16 = vector.load %arg4[%c0_7, %c0_8] : memref<8x32xf32, #tpu.memory_space<vmem>>, vector<8x32xf32>
    %17 = arith.addf %15, %16 : vector<8x32xf32>
    %c0_9 = arith.constant 0 : index
    %c0_10 = arith.constant 0 : index
    %c0_11 = arith.constant 0 : index
    %18 = vector.load %arg5[%c0_9, %c0_10, %c0_11] : memref<2x1x32xf32, #tpu.memory_space<vmem>>, vector<1x1x32xf32>
    %19 = vector.shape_cast %18 : vector<1x1x32xf32> to vector<1x32xf32>
    %c0_12 = arith.constant 0 : index
    %c0_13 = arith.constant 0 : index
    %c0_14 = arith.constant 0 : index
    %20 = vector.load %arg6[%c0_12, %c0_13, %c0_14] : memref<2x1x32xf32, #tpu.memory_space<vmem>>, vector<1x1x32xf32>
    %21 = vector.shape_cast %20 : vector<1x1x32xf32> to vector<1x32xf32>
    %cst = arith.constant dense<0.000000e+00> : vector<8xf32>
    %22 = vector.multi_reduction <add>, %17, %cst [1] : vector<8x32xf32> to vector<8xf32>
    %23 = vector.shape_cast %22 : vector<8xf32> to vector<8x1xf32>
    %cst_15 = arith.constant 3.200000e+01 : f32
    %24 = vector.broadcast %cst_15 : f32 to vector<8x1xf32>
    %25 = arith.divf %23, %24 : vector<8x1xf32>
    %26 = vector.broadcast %25 : vector<8x1xf32> to vector<8x32xf32>
    %27 = arith.subf %17, %26 : vector<8x32xf32>
    %28 = arith.mulf %27, %27 : vector<8x32xf32>
    %cst_16 = arith.constant dense<0.000000e+00> : vector<8xf32>
    %29 = vector.multi_reduction <add>, %28, %cst_16 [1] : vector<8x32xf32> to vector<8xf32>
    %30 = vector.shape_cast %29 : vector<8xf32> to vector<8x1xf32>
    %cst_17 = arith.constant 3.200000e+01 : f32
    %31 = vector.broadcast %cst_17 : f32 to vector<8x1xf32>
    %32 = arith.divf %30, %31 : vector<8x1xf32>
    %cst_18 = arith.constant 9.99999974E-6 : f32
    %33 = vector.broadcast %cst_18 : f32 to vector<8x1xf32>
    %34 = arith.addf %32, %33 : vector<8x1xf32>
    %35 = math.rsqrt %34 : vector<8x1xf32>
    %36 = vector.broadcast %35 : vector<8x1xf32> to vector<8x32xf32>
    %37 = arith.mulf %27, %36 : vector<8x32xf32>
    %38 = vector.broadcast %19 : vector<1x32xf32> to vector<8x32xf32>
    %39 = arith.mulf %37, %38 : vector<8x32xf32>
    %40 = vector.broadcast %21 : vector<1x32xf32> to vector<8x32xf32>
    %41 = arith.addf %39, %40 : vector<8x32xf32>
    %c0_19 = arith.constant 0 : index
    %c0_20 = arith.constant 0 : index
    %c0_21 = arith.constant 0 : index
    %42 = vector.load %arg7[%c0_19, %c0_20, %c0_21] : memref<2x32x96xf32, #tpu.memory_space<vmem>>, vector<1x32x96xf32>
    %43 = vector.shape_cast %42 : vector<1x32x96xf32> to vector<32x96xf32>
    %cst_22 = arith.constant dense<0.000000e+00> : vector<8x96xf32>
    %44 = tpu.matmul %41, %43, %cst_22 {dimension_numbers = #tpu.dot_dimension_numbers<[1], [0], [0], [1], [0, 0, 1, 1], [], []>} : vector<8x32xf32>, vector<32x96xf32>, vector<8x96xf32> -> vector<8x96xf32>
    %c0_23 = arith.constant 0 : index
    %c0_24 = arith.constant 0 : index
    %c0_25 = arith.constant 0 : index
    %45 = vector.load %arg8[%c0_23, %c0_24, %c0_25] : memref<2x1x96xf32, #tpu.memory_space<vmem>>, vector<1x1x96xf32>
    %46 = vector.shape_cast %45 : vector<1x1x96xf32> to vector<1x96xf32>
    %47 = vector.broadcast %46 : vector<1x96xf32> to vector<8x96xf32>
    %48 = arith.addf %44, %47 : vector<8x96xf32>
    %c0_26 = arith.constant 0 : index
    %c0_27 = arith.constant 0 : index
    %c0_28 = arith.constant 0 : index
    %49 = vector.load %arg10[%c0_26, %c0_27, %c0_28] : memref<2x1x32xf32, #tpu.memory_space<vmem>>, vector<1x1x32xf32>
    %50 = vector.shape_cast %49 : vector<1x1x32xf32> to vector<1x32xf32>
    %51 = vector.extract_strided_slice %48 {offsets = [0, 0], sizes = [8, 16], strides = [1, 1]} : vector<8x96xf32> to vector<8x16xf32>
    %52 = vector.extract_strided_slice %48 {offsets = [0, 32], sizes = [8, 16], strides = [1, 1]} : vector<8x96xf32> to vector<8x16xf32>
    %53 = vector.extract_strided_slice %48 {offsets = [0, 64], sizes = [8, 16], strides = [1, 1]} : vector<8x96xf32> to vector<8x16xf32>
    %cst_29 = arith.constant dense<0.000000e+00> : vector<8x8xf32>
    %54 = tpu.matmul %51, %52, %cst_29 {dimension_numbers = #tpu.dot_dimension_numbers<[1], [1], [0], [0], [0, 0, 1, 0], [], []>} : vector<8x16xf32>, vector<8x16xf32>, vector<8x8xf32> -> vector<8x8xf32>
    %cst_30 = arith.constant dense<0xFF800000> : vector<8xf32>
    %55 = vector.multi_reduction <maximumf>, %54, %cst_30 [1] : vector<8x8xf32> to vector<8xf32>
    %56 = vector.shape_cast %55 : vector<8xf32> to vector<8x1xf32>
    %57 = vector.broadcast %56 : vector<8x1xf32> to vector<8x8xf32>
    %58 = arith.subf %54, %57 : vector<8x8xf32>
    %59 = math.exp %58 : vector<8x8xf32>
    %cst_31 = arith.constant dense<0.000000e+00> : vector<8xf32>
    %60 = vector.multi_reduction <add>, %59, %cst_31 [1] : vector<8x8xf32> to vector<8xf32>
    %61 = vector.shape_cast %60 : vector<8xf32> to vector<8x1xf32>
    %62 = tpu.reciprocal %61 {approx = true} : vector<8x1xf32> -> vector<8x1xf32>
    %63 = vector.broadcast %62 : vector<8x1xf32> to vector<8x8xf32>
    %64 = arith.mulf %59, %63 : vector<8x8xf32>
    %cst_32 = arith.constant dense<0.000000e+00> : vector<8x16xf32>
    %65 = tpu.matmul %64, %53, %cst_32 {dimension_numbers = #tpu.dot_dimension_numbers<[1], [0], [0], [1], [0, 0, 1, 1], [], []>} : vector<8x8xf32>, vector<8x16xf32>, vector<8x16xf32> -> vector<8x16xf32>
    %c0_33 = arith.constant 0 : index
    %c0_34 = arith.constant 0 : index
    %c0_35 = arith.constant 0 : index
    %66 = vector.load %arg9[%c0_33, %c0_34, %c0_35] : memref<2x32x32xf32, #tpu.memory_space<vmem>>, vector<1x32x32xf32>
    %67 = vector.shape_cast %66 : vector<1x32x32xf32> to vector<32x32xf32>
    %68 = vector.extract_strided_slice %67 {offsets = [0, 0], sizes = [16, 32], strides = [1, 1]} : vector<32x32xf32> to vector<16x32xf32>
    %cst_36 = arith.constant dense<0.000000e+00> : vector<8x32xf32>
    %69 = tpu.matmul %65, %68, %cst_36 {dimension_numbers = #tpu.dot_dimension_numbers<[1], [0], [0], [1], [0, 0, 1, 1], [], []>} : vector<8x16xf32>, vector<16x32xf32>, vector<8x32xf32> -> vector<8x32xf32>
    %70 = vector.broadcast %50 : vector<1x32xf32> to vector<8x32xf32>
    %71 = arith.addf %70, %69 : vector<8x32xf32>
    %72 = vector.extract_strided_slice %48 {offsets = [0, 16], sizes = [8, 16], strides = [1, 1]} : vector<8x96xf32> to vector<8x16xf32>
    %73 = vector.extract_strided_slice %48 {offsets = [0, 48], sizes = [8, 16], strides = [1, 1]} : vector<8x96xf32> to vector<8x16xf32>
    %74 = vector.extract_strided_slice %48 {offsets = [0, 80], sizes = [8, 16], strides = [1, 1]} : vector<8x96xf32> to vector<8x16xf32>
    %cst_37 = arith.constant dense<0.000000e+00> : vector<8x8xf32>
    %75 = tpu.matmul %72, %73, %cst_37 {dimension_numbers = #tpu.dot_dimension_numbers<[1], [1], [0], [0], [0, 0, 1, 0], [], []>} : vector<8x16xf32>, vector<8x16xf32>, vector<8x8xf32> -> vector<8x8xf32>
    %cst_38 = arith.constant dense<0xFF800000> : vector<8xf32>
    %76 = vector.multi_reduction <maximumf>, %75, %cst_38 [1] : vector<8x8xf32> to vector<8xf32>
    %77 = vector.shape_cast %76 : vector<8xf32> to vector<8x1xf32>
    %78 = vector.broadcast %77 : vector<8x1xf32> to vector<8x8xf32>
    %79 = arith.subf %75, %78 : vector<8x8xf32>
    %80 = math.exp %79 : vector<8x8xf32>
    %cst_39 = arith.constant dense<0.000000e+00> : vector<8xf32>
    %81 = vector.multi_reduction <add>, %80, %cst_39 [1] : vector<8x8xf32> to vector<8xf32>
    %82 = vector.shape_cast %81 : vector<8xf32> to vector<8x1xf32>
    %83 = tpu.reciprocal %82 {approx = true} : vector<8x1xf32> -> vector<8x1xf32>
    %84 = vector.broadcast %83 : vector<8x1xf32> to vector<8x8xf32>
    %85 = arith.mulf %80, %84 : vector<8x8xf32>
    %cst_40 = arith.constant dense<0.000000e+00> : vector<8x16xf32>
    %86 = tpu.matmul %85, %74, %cst_40 {dimension_numbers = #tpu.dot_dimension_numbers<[1], [0], [0], [1], [0, 0, 1, 1], [], []>} : vector<8x8xf32>, vector<8x16xf32>, vector<8x16xf32> -> vector<8x16xf32>
    %c0_41 = arith.constant 0 : index
    %c0_42 = arith.constant 0 : index
    %c0_43 = arith.constant 0 : index
    %87 = vector.load %arg9[%c0_41, %c0_42, %c0_43] : memref<2x32x32xf32, #tpu.memory_space<vmem>>, vector<1x32x32xf32>
    %88 = vector.shape_cast %87 : vector<1x32x32xf32> to vector<32x32xf32>
    %89 = vector.extract_strided_slice %88 {offsets = [16, 0], sizes = [16, 32], strides = [1, 1]} : vector<32x32xf32> to vector<16x32xf32>
    %cst_44 = arith.constant dense<0.000000e+00> : vector<8x32xf32>
    %90 = tpu.matmul %86, %89, %cst_44 {dimension_numbers = #tpu.dot_dimension_numbers<[1], [0], [0], [1], [0, 0, 1, 1], [], []>} : vector<8x16xf32>, vector<16x32xf32>, vector<8x32xf32> -> vector<8x32xf32>
    %91 = arith.addf %71, %90 : vector<8x32xf32>
    %92 = arith.addf %17, %91 : vector<8x32xf32>
    %c0_45 = arith.constant 0 : index
    %c0_46 = arith.constant 0 : index
    %c0_47 = arith.constant 0 : index
    %93 = vector.load %arg11[%c0_45, %c0_46, %c0_47] : memref<2x1x32xf32, #tpu.memory_space<vmem>>, vector<1x1x32xf32>
    %94 = vector.shape_cast %93 : vector<1x1x32xf32> to vector<1x32xf32>
    %c0_48 = arith.constant 0 : index
    %c0_49 = arith.constant 0 : index
    %c0_50 = arith.constant 0 : index
    %95 = vector.load %arg12[%c0_48, %c0_49, %c0_50] : memref<2x1x32xf32, #tpu.memory_space<vmem>>, vector<1x1x32xf32>
    %96 = vector.shape_cast %95 : vector<1x1x32xf32> to vector<1x32xf32>
    %cst_51 = arith.constant dense<0.000000e+00> : vector<8xf32>
    %97 = vector.multi_reduction <add>, %92, %cst_51 [1] : vector<8x32xf32> to vector<8xf32>
    %98 = vector.shape_cast %97 : vector<8xf32> to vector<8x1xf32>
    %cst_52 = arith.constant 3.200000e+01 : f32
    %99 = vector.broadcast %cst_52 : f32 to vector<8x1xf32>
    %100 = arith.divf %98, %99 : vector<8x1xf32>
    %101 = vector.broadcast %100 : vector<8x1xf32> to vector<8x32xf32>
    %102 = arith.subf %92, %101 : vector<8x32xf32>
    %103 = arith.mulf %102, %102 : vector<8x32xf32>
    %cst_53 = arith.constant dense<0.000000e+00> : vector<8xf32>
    %104 = vector.multi_reduction <add>, %103, %cst_53 [1] : vector<8x32xf32> to vector<8xf32>
    %105 = vector.shape_cast %104 : vector<8xf32> to vector<8x1xf32>
    %cst_54 = arith.constant 3.200000e+01 : f32
    %106 = vector.broadcast %cst_54 : f32 to vector<8x1xf32>
    %107 = arith.divf %105, %106 : vector<8x1xf32>
    %cst_55 = arith.constant 9.99999974E-6 : f32
    %108 = vector.broadcast %cst_55 : f32 to vector<8x1xf32>
    %109 = arith.addf %107, %108 : vector<8x1xf32>
    %110 = math.rsqrt %109 : vector<8x1xf32>
    %111 = vector.broadcast %110 : vector<8x1xf32> to vector<8x32xf32>
    %112 = arith.mulf %102, %111 : vector<8x32xf32>
    %113 = vector.broadcast %94 : vector<1x32xf32> to vector<8x32xf32>
    %114 = arith.mulf %112, %113 : vector<8x32xf32>
    %115 = vector.broadcast %96 : vector<1x32xf32> to vector<8x32xf32>
    %116 = arith.addf %114, %115 : vector<8x32xf32>
    %c0_56 = arith.constant 0 : index
    %c0_57 = arith.constant 0 : index
    %c0_58 = arith.constant 0 : index
    %117 = vector.load %arg13[%c0_56, %c0_57, %c0_58] : memref<2x32x128xf32, #tpu.memory_space<vmem>>, vector<1x32x128xf32>
    %118 = vector.shape_cast %117 : vector<1x32x128xf32> to vector<32x128xf32>
    %cst_59 = arith.constant dense<0.000000e+00> : vector<8x128xf32>
    %119 = tpu.matmul %116, %118, %cst_59 {dimension_numbers = #tpu.dot_dimension_numbers<[1], [0], [0], [1], [0, 0, 1, 1], [], []>} : vector<8x32xf32>, vector<32x128xf32>, vector<8x128xf32> -> vector<8x128xf32>
    %c0_60 = arith.constant 0 : index
    %c0_61 = arith.constant 0 : index
    %c0_62 = arith.constant 0 : index
    %120 = vector.load %arg14[%c0_60, %c0_61, %c0_62] : memref<2x1x128xf32, #tpu.memory_space<vmem>>, vector<1x1x128xf32>
    %121 = vector.shape_cast %120 : vector<1x1x128xf32> to vector<1x128xf32>
    %122 = vector.broadcast %121 : vector<1x128xf32> to vector<8x128xf32>
    %123 = arith.addf %119, %122 : vector<8x128xf32>
    %124 = arith.mulf %123, %123 : vector<8x128xf32>
    %125 = arith.mulf %123, %124 : vector<8x128xf32>
    %cst_63 = arith.constant 4.471500e-02 : f32
    %126 = vector.broadcast %cst_63 : f32 to vector<8x128xf32>
    %127 = arith.mulf %126, %125 : vector<8x128xf32>
    %128 = arith.addf %123, %127 : vector<8x128xf32>
    %cst_64 = arith.constant 0.797884583 : f32
    %129 = vector.broadcast %cst_64 : f32 to vector<8x128xf32>
    %130 = arith.mulf %129, %128 : vector<8x128xf32>
    %131 = math.tanh %130 : vector<8x128xf32>
    %cst_65 = arith.constant 1.000000e+00 : f32
    %132 = vector.broadcast %cst_65 : f32 to vector<8x128xf32>
    %133 = arith.addf %132, %131 : vector<8x128xf32>
    %cst_66 = arith.constant 5.000000e-01 : f32
    %134 = vector.broadcast %cst_66 : f32 to vector<8x128xf32>
    %135 = arith.mulf %134, %133 : vector<8x128xf32>
    %136 = arith.mulf %123, %135 : vector<8x128xf32>
    %c0_67 = arith.constant 0 : index
    %c0_68 = arith.constant 0 : index
    %c0_69 = arith.constant 0 : index
    %137 = vector.load %arg15[%c0_67, %c0_68, %c0_69] : memref<2x128x32xf32, #tpu.memory_space<vmem>>, vector<1x128x32xf32>
    %138 = vector.shape_cast %137 : vector<1x128x32xf32> to vector<128x32xf32>
    %cst_70 = arith.constant dense<0.000000e+00> : vector<8x32xf32>
    %139 = tpu.matmul %136, %138, %cst_70 {dimension_numbers = #tpu.dot_dimension_numbers<[1], [0], [0], [1], [0, 0, 1, 1], [], []>} : vector<8x128xf32>, vector<128x32xf32>, vector<8x32xf32> -> vector<8x32xf32>
    %140 = arith.addf %92, %139 : vector<8x32xf32>
    %c0_71 = arith.constant 0 : index
    %c0_72 = arith.constant 0 : index
    %c0_73 = arith.constant 0 : index
    %141 = vector.load %arg16[%c0_71, %c0_72, %c0_73] : memref<2x1x32xf32, #tpu.memory_space<vmem>>, vector<1x1x32xf32>
    %142 = vector.shape_cast %141 : vector<1x1x32xf32> to vector<1x32xf32>
    %143 = vector.broadcast %142 : vector<1x32xf32> to vector<8x32xf32>
    %144 = arith.addf %140, %143 : vector<8x32xf32>
    %c1_74 = arith.constant 1 : index
    %c0_75 = arith.constant 0 : index
    %c0_76 = arith.constant 0 : index
    %145 = vector.load %arg5[%c1_74, %c0_75, %c0_76] : memref<2x1x32xf32, #tpu.memory_space<vmem>>, vector<1x1x32xf32>
    %146 = vector.shape_cast %145 : vector<1x1x32xf32> to vector<1x32xf32>
    %c1_77 = arith.constant 1 : index
    %c0_78 = arith.constant 0 : index
    %c0_79 = arith.constant 0 : index
    %147 = vector.load %arg6[%c1_77, %c0_78, %c0_79] : memref<2x1x32xf32, #tpu.memory_space<vmem>>, vector<1x1x32xf32>
    %148 = vector.shape_cast %147 : vector<1x1x32xf32> to vector<1x32xf32>
    %cst_80 = arith.constant dense<0.000000e+00> : vector<8xf32>
    %149 = vector.multi_reduction <add>, %144, %cst_80 [1] : vector<8x32xf32> to vector<8xf32>
    %150 = vector.shape_cast %149 : vector<8xf32> to vector<8x1xf32>
    %cst_81 = arith.constant 3.200000e+01 : f32
    %151 = vector.broadcast %cst_81 : f32 to vector<8x1xf32>
    %152 = arith.divf %150, %151 : vector<8x1xf32>
    %153 = vector.broadcast %152 : vector<8x1xf32> to vector<8x32xf32>
    %154 = arith.subf %144, %153 : vector<8x32xf32>
    %155 = arith.mulf %154, %154 : vector<8x32xf32>
    %cst_82 = arith.constant dense<0.000000e+00> : vector<8xf32>
    %156 = vector.multi_reduction <add>, %155, %cst_82 [1] : vector<8x32xf32> to vector<8xf32>
    %157 = vector.shape_cast %156 : vector<8xf32> to vector<8x1xf32>
    %cst_83 = arith.constant 3.200000e+01 : f32
    %158 = vector.broadcast %cst_83 : f32 to vector<8x1xf32>
    %159 = arith.divf %157, %158 : vector<8x1xf32>
    %cst_84 = arith.constant 9.99999974E-6 : f32
    %160 = vector.broadcast %cst_84 : f32 to vector<8x1xf32>
    %161 = arith.addf %159, %160 : vector<8x1xf32>
    %162 = math.rsqrt %161 : vector<8x1xf32>
    %163 = vector.broadcast %162 : vector<8x1xf32> to vector<8x32xf32>
    %164 = arith.mulf %154, %163 : vector<8x32xf32>
    %165 = vector.broadcast %146 : vector<1x32xf32> to vector<8x32xf32>
    %166 = arith.mulf %164, %165 : vector<8x32xf32>
    %167 = vector.broadcast %148 : vector<1x32xf32> to vector<8x32xf32>
    %168 = arith.addf %166, %167 : vector<8x32xf32>
    %c1_85 = arith.constant 1 : index
    %c0_86 = arith.constant 0 : index
    %c0_87 = arith.constant 0 : index
    %169 = vector.load %arg7[%c1_85, %c0_86, %c0_87] : memref<2x32x96xf32, #tpu.memory_space<vmem>>, vector<1x32x96xf32>
    %170 = vector.shape_cast %169 : vector<1x32x96xf32> to vector<32x96xf32>
    %cst_88 = arith.constant dense<0.000000e+00> : vector<8x96xf32>
    %171 = tpu.matmul %168, %170, %cst_88 {dimension_numbers = #tpu.dot_dimension_numbers<[1], [0], [0], [1], [0, 0, 1, 1], [], []>} : vector<8x32xf32>, vector<32x96xf32>, vector<8x96xf32> -> vector<8x96xf32>
    %c1_89 = arith.constant 1 : index
    %c0_90 = arith.constant 0 : index
    %c0_91 = arith.constant 0 : index
    %172 = vector.load %arg8[%c1_89, %c0_90, %c0_91] : memref<2x1x96xf32, #tpu.memory_space<vmem>>, vector<1x1x96xf32>
    %173 = vector.shape_cast %172 : vector<1x1x96xf32> to vector<1x96xf32>
    %174 = vector.broadcast %173 : vector<1x96xf32> to vector<8x96xf32>
    %175 = arith.addf %171, %174 : vector<8x96xf32>
    %c1_92 = arith.constant 1 : index
    %c0_93 = arith.constant 0 : index
    %c0_94 = arith.constant 0 : index
    %176 = vector.load %arg10[%c1_92, %c0_93, %c0_94] : memref<2x1x32xf32, #tpu.memory_space<vmem>>, vector<1x1x32xf32>
    %177 = vector.shape_cast %176 : vector<1x1x32xf32> to vector<1x32xf32>
    %178 = vector.extract_strided_slice %175 {offsets = [0, 0], sizes = [8, 16], strides = [1, 1]} : vector<8x96xf32> to vector<8x16xf32>
    %179 = vector.extract_strided_slice %175 {offsets = [0, 32], sizes = [8, 16], strides = [1, 1]} : vector<8x96xf32> to vector<8x16xf32>
    %180 = vector.extract_strided_slice %175 {offsets = [0, 64], sizes = [8, 16], strides = [1, 1]} : vector<8x96xf32> to vector<8x16xf32>
    %cst_95 = arith.constant dense<0.000000e+00> : vector<8x8xf32>
    %181 = tpu.matmul %178, %179, %cst_95 {dimension_numbers = #tpu.dot_dimension_numbers<[1], [1], [0], [0], [0, 0, 1, 0], [], []>} : vector<8x16xf32>, vector<8x16xf32>, vector<8x8xf32> -> vector<8x8xf32>
    %cst_96 = arith.constant dense<0xFF800000> : vector<8xf32>
    %182 = vector.multi_reduction <maximumf>, %181, %cst_96 [1] : vector<8x8xf32> to vector<8xf32>
    %183 = vector.shape_cast %182 : vector<8xf32> to vector<8x1xf32>
    %184 = vector.broadcast %183 : vector<8x1xf32> to vector<8x8xf32>
    %185 = arith.subf %181, %184 : vector<8x8xf32>
    %186 = math.exp %185 : vector<8x8xf32>
    %cst_97 = arith.constant dense<0.000000e+00> : vector<8xf32>
    %187 = vector.multi_reduction <add>, %186, %cst_97 [1] : vector<8x8xf32> to vector<8xf32>
    %188 = vector.shape_cast %187 : vector<8xf32> to vector<8x1xf32>
    %189 = tpu.reciprocal %188 {approx = true} : vector<8x1xf32> -> vector<8x1xf32>
    %190 = vector.broadcast %189 : vector<8x1xf32> to vector<8x8xf32>
    %191 = arith.mulf %186, %190 : vector<8x8xf32>
    %cst_98 = arith.constant dense<0.000000e+00> : vector<8x16xf32>
    %192 = tpu.matmul %191, %180, %cst_98 {dimension_numbers = #tpu.dot_dimension_numbers<[1], [0], [0], [1], [0, 0, 1, 1], [], []>} : vector<8x8xf32>, vector<8x16xf32>, vector<8x16xf32> -> vector<8x16xf32>
    %c1_99 = arith.constant 1 : index
    %c0_100 = arith.constant 0 : index
    %c0_101 = arith.constant 0 : index
    %193 = vector.load %arg9[%c1_99, %c0_100, %c0_101] : memref<2x32x32xf32, #tpu.memory_space<vmem>>, vector<1x32x32xf32>
    %194 = vector.shape_cast %193 : vector<1x32x32xf32> to vector<32x32xf32>
    %195 = vector.extract_strided_slice %194 {offsets = [0, 0], sizes = [16, 32], strides = [1, 1]} : vector<32x32xf32> to vector<16x32xf32>
    %cst_102 = arith.constant dense<0.000000e+00> : vector<8x32xf32>
    %196 = tpu.matmul %192, %195, %cst_102 {dimension_numbers = #tpu.dot_dimension_numbers<[1], [0], [0], [1], [0, 0, 1, 1], [], []>} : vector<8x16xf32>, vector<16x32xf32>, vector<8x32xf32> -> vector<8x32xf32>
    %197 = vector.broadcast %177 : vector<1x32xf32> to vector<8x32xf32>
    %198 = arith.addf %197, %196 : vector<8x32xf32>
    %199 = vector.extract_strided_slice %175 {offsets = [0, 16], sizes = [8, 16], strides = [1, 1]} : vector<8x96xf32> to vector<8x16xf32>
    %200 = vector.extract_strided_slice %175 {offsets = [0, 48], sizes = [8, 16], strides = [1, 1]} : vector<8x96xf32> to vector<8x16xf32>
    %201 = vector.extract_strided_slice %175 {offsets = [0, 80], sizes = [8, 16], strides = [1, 1]} : vector<8x96xf32> to vector<8x16xf32>
    %cst_103 = arith.constant dense<0.000000e+00> : vector<8x8xf32>
    %202 = tpu.matmul %199, %200, %cst_103 {dimension_numbers = #tpu.dot_dimension_numbers<[1], [1], [0], [0], [0, 0, 1, 0], [], []>} : vector<8x16xf32>, vector<8x16xf32>, vector<8x8xf32> -> vector<8x8xf32>
    %cst_104 = arith.constant dense<0xFF800000> : vector<8xf32>
    %203 = vector.multi_reduction <maximumf>, %202, %cst_104 [1] : vector<8x8xf32> to vector<8xf32>
    %204 = vector.shape_cast %203 : vector<8xf32> to vector<8x1xf32>
    %205 = vector.broadcast %204 : vector<8x1xf32> to vector<8x8xf32>
    %206 = arith.subf %202, %205 : vector<8x8xf32>
    %207 = math.exp %206 : vector<8x8xf32>
    %cst_105 = arith.constant dense<0.000000e+00> : vector<8xf32>
    %208 = vector.multi_reduction <add>, %207, %cst_105 [1] : vector<8x8xf32> to vector<8xf32>
    %209 = vector.shape_cast %208 : vector<8xf32> to vector<8x1xf32>
    %210 = tpu.reciprocal %209 {approx = true} : vector<8x1xf32> -> vector<8x1xf32>
    %211 = vector.broadcast %210 : vector<8x1xf32> to vector<8x8xf32>
    %212 = arith.mulf %207, %211 : vector<8x8xf32>
    %cst_106 = arith.constant dense<0.000000e+00> : vector<8x16xf32>
    %213 = tpu.matmul %212, %201, %cst_106 {dimension_numbers = #tpu.dot_dimension_numbers<[1], [0], [0], [1], [0, 0, 1, 1], [], []>} : vector<8x8xf32>, vector<8x16xf32>, vector<8x16xf32> -> vector<8x16xf32>
    %c1_107 = arith.constant 1 : index
    %c0_108 = arith.constant 0 : index
    %c0_109 = arith.constant 0 : index
    %214 = vector.load %arg9[%c1_107, %c0_108, %c0_109] : memref<2x32x32xf32, #tpu.memory_space<vmem>>, vector<1x32x32xf32>
    %215 = vector.shape_cast %214 : vector<1x32x32xf32> to vector<32x32xf32>
    %216 = vector.extract_strided_slice %215 {offsets = [16, 0], sizes = [16, 32], strides = [1, 1]} : vector<32x32xf32> to vector<16x32xf32>
    %cst_110 = arith.constant dense<0.000000e+00> : vector<8x32xf32>
    %217 = tpu.matmul %213, %216, %cst_110 {dimension_numbers = #tpu.dot_dimension_numbers<[1], [0], [0], [1], [0, 0, 1, 1], [], []>} : vector<8x16xf32>, vector<16x32xf32>, vector<8x32xf32> -> vector<8x32xf32>
    %218 = arith.addf %198, %217 : vector<8x32xf32>
    %219 = arith.addf %144, %218 : vector<8x32xf32>
    %c1_111 = arith.constant 1 : index
    %c0_112 = arith.constant 0 : index
    %c0_113 = arith.constant 0 : index
    %220 = vector.load %arg11[%c1_111, %c0_112, %c0_113] : memref<2x1x32xf32, #tpu.memory_space<vmem>>, vector<1x1x32xf32>
    %221 = vector.shape_cast %220 : vector<1x1x32xf32> to vector<1x32xf32>
    %c1_114 = arith.constant 1 : index
    %c0_115 = arith.constant 0 : index
    %c0_116 = arith.constant 0 : index
    %222 = vector.load %arg12[%c1_114, %c0_115, %c0_116] : memref<2x1x32xf32, #tpu.memory_space<vmem>>, vector<1x1x32xf32>
    %223 = vector.shape_cast %222 : vector<1x1x32xf32> to vector<1x32xf32>
    %cst_117 = arith.constant dense<0.000000e+00> : vector<8xf32>
    %224 = vector.multi_reduction <add>, %219, %cst_117 [1] : vector<8x32xf32> to vector<8xf32>
    %225 = vector.shape_cast %224 : vector<8xf32> to vector<8x1xf32>
    %cst_118 = arith.constant 3.200000e+01 : f32
    %226 = vector.broadcast %cst_118 : f32 to vector<8x1xf32>
    %227 = arith.divf %225, %226 : vector<8x1xf32>
    %228 = vector.broadcast %227 : vector<8x1xf32> to vector<8x32xf32>
    %229 = arith.subf %219, %228 : vector<8x32xf32>
    %230 = arith.mulf %229, %229 : vector<8x32xf32>
    %cst_119 = arith.constant dense<0.000000e+00> : vector<8xf32>
    %231 = vector.multi_reduction <add>, %230, %cst_119 [1] : vector<8x32xf32> to vector<8xf32>
    %232 = vector.shape_cast %231 : vector<8xf32> to vector<8x1xf32>
    %cst_120 = arith.constant 3.200000e+01 : f32
    %233 = vector.broadcast %cst_120 : f32 to vector<8x1xf32>
    %234 = arith.divf %232, %233 : vector<8x1xf32>
    %cst_121 = arith.constant 9.99999974E-6 : f32
    %235 = vector.broadcast %cst_121 : f32 to vector<8x1xf32>
    %236 = arith.addf %234, %235 : vector<8x1xf32>
    %237 = math.rsqrt %236 : vector<8x1xf32>
    %238 = vector.broadcast %237 : vector<8x1xf32> to vector<8x32xf32>
    %239 = arith.mulf %229, %238 : vector<8x32xf32>
    %240 = vector.broadcast %221 : vector<1x32xf32> to vector<8x32xf32>
    %241 = arith.mulf %239, %240 : vector<8x32xf32>
    %242 = vector.broadcast %223 : vector<1x32xf32> to vector<8x32xf32>
    %243 = arith.addf %241, %242 : vector<8x32xf32>
    %c1_122 = arith.constant 1 : index
    %c0_123 = arith.constant 0 : index
    %c0_124 = arith.constant 0 : index
    %244 = vector.load %arg13[%c1_122, %c0_123, %c0_124] : memref<2x32x128xf32, #tpu.memory_space<vmem>>, vector<1x32x128xf32>
    %245 = vector.shape_cast %244 : vector<1x32x128xf32> to vector<32x128xf32>
    %cst_125 = arith.constant dense<0.000000e+00> : vector<8x128xf32>
    %246 = tpu.matmul %243, %245, %cst_125 {dimension_numbers = #tpu.dot_dimension_numbers<[1], [0], [0], [1], [0, 0, 1, 1], [], []>} : vector<8x32xf32>, vector<32x128xf32>, vector<8x128xf32> -> vector<8x128xf32>
    %c1_126 = arith.constant 1 : index
    %c0_127 = arith.constant 0 : index
    %c0_128 = arith.constant 0 : index
    %247 = vector.load %arg14[%c1_126, %c0_127, %c0_128] : memref<2x1x128xf32, #tpu.memory_space<vmem>>, vector<1x1x128xf32>
    %248 = vector.shape_cast %247 : vector<1x1x128xf32> to vector<1x128xf32>
    %249 = vector.broadcast %248 : vector<1x128xf32> to vector<8x128xf32>
    %250 = arith.addf %246, %249 : vector<8x128xf32>
    %251 = arith.mulf %250, %250 : vector<8x128xf32>
    %252 = arith.mulf %250, %251 : vector<8x128xf32>
    %cst_129 = arith.constant 4.471500e-02 : f32
    %253 = vector.broadcast %cst_129 : f32 to vector<8x128xf32>
    %254 = arith.mulf %253, %252 : vector<8x128xf32>
    %255 = arith.addf %250, %254 : vector<8x128xf32>
    %cst_130 = arith.constant 0.797884583 : f32
    %256 = vector.broadcast %cst_130 : f32 to vector<8x128xf32>
    %257 = arith.mulf %256, %255 : vector<8x128xf32>
    %258 = math.tanh %257 : vector<8x128xf32>
    %cst_131 = arith.constant 1.000000e+00 : f32
    %259 = vector.broadcast %cst_131 : f32 to vector<8x128xf32>
    %260 = arith.addf %259, %258 : vector<8x128xf32>
    %cst_132 = arith.constant 5.000000e-01 : f32
    %261 = vector.broadcast %cst_132 : f32 to vector<8x128xf32>
    %262 = arith.mulf %261, %260 : vector<8x128xf32>
    %263 = arith.mulf %250, %262 : vector<8x128xf32>
    %c1_133 = arith.constant 1 : index
    %c0_134 = arith.constant 0 : index
    %c0_135 = arith.constant 0 : index
    %264 = vector.load %arg15[%c1_133, %c0_134, %c0_135] : memref<2x128x32xf32, #tpu.memory_space<vmem>>, vector<1x128x32xf32>
    %265 = vector.shape_cast %264 : vector<1x128x32xf32> to vector<128x32xf32>
    %cst_136 = arith.constant dense<0.000000e+00> : vector<8x32xf32>
    %266 = tpu.matmul %263, %265, %cst_136 {dimension_numbers = #tpu.dot_dimension_numbers<[1], [0], [0], [1], [0, 0, 1, 1], [], []>} : vector<8x128xf32>, vector<128x32xf32>, vector<8x32xf32> -> vector<8x32xf32>
    %267 = arith.addf %219, %266 : vector<8x32xf32>
    %c1_137 = arith.constant 1 : index
    %c0_138 = arith.constant 0 : index
    %c0_139 = arith.constant 0 : index
    %268 = vector.load %arg16[%c1_137, %c0_138, %c0_139] : memref<2x1x32xf32, #tpu.memory_space<vmem>>, vector<1x1x32xf32>
    %269 = vector.shape_cast %268 : vector<1x1x32xf32> to vector<1x32xf32>
    %270 = vector.broadcast %269 : vector<1x32xf32> to vector<8x32xf32>
    %271 = arith.addf %267, %270 : vector<8x32xf32>
    %c0_140 = arith.constant 0 : index
    %c0_141 = arith.constant 0 : index
    %272 = vector.load %arg17[%c0_140, %c0_141] : memref<1x32xf32, #tpu.memory_space<vmem>>, vector<1x32xf32>
    %c0_142 = arith.constant 0 : index
    %c0_143 = arith.constant 0 : index
    %273 = vector.load %arg18[%c0_142, %c0_143] : memref<1x32xf32, #tpu.memory_space<vmem>>, vector<1x32xf32>
    %cst_144 = arith.constant dense<0.000000e+00> : vector<8xf32>
    %274 = vector.multi_reduction <add>, %271, %cst_144 [1] : vector<8x32xf32> to vector<8xf32>
    %275 = vector.shape_cast %274 : vector<8xf32> to vector<8x1xf32>
    %cst_145 = arith.constant 3.200000e+01 : f32
    %276 = vector.broadcast %cst_145 : f32 to vector<8x1xf32>
    %277 = arith.divf %275, %276 : vector<8x1xf32>
    %278 = vector.broadcast %277 : vector<8x1xf32> to vector<8x32xf32>
    %279 = arith.subf %271, %278 : vector<8x32xf32>
    %280 = arith.mulf %279, %279 : vector<8x32xf32>
    %cst_146 = arith.constant dense<0.000000e+00> : vector<8xf32>
    %281 = vector.multi_reduction <add>, %280, %cst_146 [1] : vector<8x32xf32> to vector<8xf32>
    %282 = vector.shape_cast %281 : vector<8xf32> to vector<8x1xf32>
    %cst_147 = arith.constant 3.200000e+01 : f32
    %283 = vector.broadcast %cst_147 : f32 to vector<8x1xf32>
    %284 = arith.divf %282, %283 : vector<8x1xf32>
    %cst_148 = arith.constant 9.99999974E-6 : f32
    %285 = vector.broadcast %cst_148 : f32 to vector<8x1xf32>
    %286 = arith.addf %284, %285 : vector<8x1xf32>
    %287 = math.rsqrt %286 : vector<8x1xf32>
    %288 = vector.broadcast %287 : vector<8x1xf32> to vector<8x32xf32>
    %289 = arith.mulf %279, %288 : vector<8x32xf32>
    %290 = vector.broadcast %272 : vector<1x32xf32> to vector<8x32xf32>
    %291 = arith.mulf %289, %290 : vector<8x32xf32>
    %292 = vector.broadcast %273 : vector<1x32xf32> to vector<8x32xf32>
    %293 = arith.addf %291, %292 : vector<8x32xf32>
    %c0_149 = arith.constant 0 : index
    %c0_150 = arith.constant 0 : index
    %294 = vector.load %arg20[%c0_149, %c0_150] : memref<1x16xf32, #tpu.memory_space<vmem>>, vector<1x16xf32>
    %295 = vector.extract_strided_slice %293 {offsets = [0, 0], sizes = [1, 32], strides = [1, 1]} : vector<8x32xf32> to vector<1x32xf32>
    %c0_151 = arith.constant 0 : index
    %c0_152 = arith.constant 0 : index
    %c0_153 = arith.constant 0 : index
    %296 = vector.load %arg19[%c0_151, %c0_152, %c0_153] : memref<8x32x16xf32, #tpu.memory_space<vmem>>, vector<1x32x16xf32>
    %297 = vector.shape_cast %296 : vector<1x32x16xf32> to vector<32x16xf32>
    %cst_154 = arith.constant dense<0.000000e+00> : vector<1x16xf32>
    %298 = tpu.matmul %295, %297, %cst_154 {dimension_numbers = #tpu.dot_dimension_numbers<[1], [0], [0], [1], [0, 0, 1, 1], [], []>} : vector<1x32xf32>, vector<32x16xf32>, vector<1x16xf32> -> vector<1x16xf32>
    %299 = arith.addf %294, %298 : vector<1x16xf32>
    %300 = vector.extract_strided_slice %293 {offsets = [1, 0], sizes = [1, 32], strides = [1, 1]} : vector<8x32xf32> to vector<1x32xf32>
    %c1_155 = arith.constant 1 : index
    %c0_156 = arith.constant 0 : index
    %c0_157 = arith.constant 0 : index
    %301 = vector.load %arg19[%c1_155, %c0_156, %c0_157] : memref<8x32x16xf32, #tpu.memory_space<vmem>>, vector<1x32x16xf32>
    %302 = vector.shape_cast %301 : vector<1x32x16xf32> to vector<32x16xf32>
    %cst_158 = arith.constant dense<0.000000e+00> : vector<1x16xf32>
    %303 = tpu.matmul %300, %302, %cst_158 {dimension_numbers = #tpu.dot_dimension_numbers<[1], [0], [0], [1], [0, 0, 1, 1], [], []>} : vector<1x32xf32>, vector<32x16xf32>, vector<1x16xf32> -> vector<1x16xf32>
    %304 = arith.addf %299, %303 : vector<1x16xf32>
    %305 = vector.extract_strided_slice %293 {offsets = [2, 0], sizes = [1, 32], strides = [1, 1]} : vector<8x32xf32> to vector<1x32xf32>
    %c2 = arith.constant 2 : index
    %c0_159 = arith.constant 0 : index
    %c0_160 = arith.constant 0 : index
    %306 = vector.load %arg19[%c2, %c0_159, %c0_160] : memref<8x32x16xf32, #tpu.memory_space<vmem>>, vector<1x32x16xf32>
    %307 = vector.shape_cast %306 : vector<1x32x16xf32> to vector<32x16xf32>
    %cst_161 = arith.constant dense<0.000000e+00> : vector<1x16xf32>
    %308 = tpu.matmul %305, %307, %cst_161 {dimension_numbers = #tpu.dot_dimension_numbers<[1], [0], [0], [1], [0, 0, 1, 1], [], []>} : vector<1x32xf32>, vector<32x16xf32>, vector<1x16xf32> -> vector<1x16xf32>
    %309 = arith.addf %304, %308 : vector<1x16xf32>
    %310 = vector.extract_strided_slice %293 {offsets = [3, 0], sizes = [1, 32], strides = [1, 1]} : vector<8x32xf32> to vector<1x32xf32>
    %c3 = arith.constant 3 : index
    %c0_162 = arith.constant 0 : index
    %c0_163 = arith.constant 0 : index
    %311 = vector.load %arg19[%c3, %c0_162, %c0_163] : memref<8x32x16xf32, #tpu.memory_space<vmem>>, vector<1x32x16xf32>
    %312 = vector.shape_cast %311 : vector<1x32x16xf32> to vector<32x16xf32>
    %cst_164 = arith.constant dense<0.000000e+00> : vector<1x16xf32>
    %313 = tpu.matmul %310, %312, %cst_164 {dimension_numbers = #tpu.dot_dimension_numbers<[1], [0], [0], [1], [0, 0, 1, 1], [], []>} : vector<1x32xf32>, vector<32x16xf32>, vector<1x16xf32> -> vector<1x16xf32>
    %314 = arith.addf %309, %313 : vector<1x16xf32>
    %315 = vector.extract_strided_slice %293 {offsets = [4, 0], sizes = [1, 32], strides = [1, 1]} : vector<8x32xf32> to vector<1x32xf32>
    %c4 = arith.constant 4 : index
    %c0_165 = arith.constant 0 : index
    %c0_166 = arith.constant 0 : index
    %316 = vector.load %arg19[%c4, %c0_165, %c0_166] : memref<8x32x16xf32, #tpu.memory_space<vmem>>, vector<1x32x16xf32>
    %317 = vector.shape_cast %316 : vector<1x32x16xf32> to vector<32x16xf32>
    %cst_167 = arith.constant dense<0.000000e+00> : vector<1x16xf32>
    %318 = tpu.matmul %315, %317, %cst_167 {dimension_numbers = #tpu.dot_dimension_numbers<[1], [0], [0], [1], [0, 0, 1, 1], [], []>} : vector<1x32xf32>, vector<32x16xf32>, vector<1x16xf32> -> vector<1x16xf32>
    %319 = arith.addf %314, %318 : vector<1x16xf32>
    %320 = vector.extract_strided_slice %293 {offsets = [5, 0], sizes = [1, 32], strides = [1, 1]} : vector<8x32xf32> to vector<1x32xf32>
    %c5 = arith.constant 5 : index
    %c0_168 = arith.constant 0 : index
    %c0_169 = arith.constant 0 : index
    %321 = vector.load %arg19[%c5, %c0_168, %c0_169] : memref<8x32x16xf32, #tpu.memory_space<vmem>>, vector<1x32x16xf32>
    %322 = vector.shape_cast %321 : vector<1x32x16xf32> to vector<32x16xf32>
    %cst_170 = arith.constant dense<0.000000e+00> : vector<1x16xf32>
    %323 = tpu.matmul %320, %322, %cst_170 {dimension_numbers = #tpu.dot_dimension_numbers<[1], [0], [0], [1], [0, 0, 1, 1], [], []>} : vector<1x32xf32>, vector<32x16xf32>, vector<1x16xf32> -> vector<1x16xf32>
    %324 = arith.addf %319, %323 : vector<1x16xf32>
    %325 = vector.extract_strided_slice %293 {offsets = [6, 0], sizes = [1, 32], strides = [1, 1]} : vector<8x32xf32> to vector<1x32xf32>
    %c6 = arith.constant 6 : index
    %c0_171 = arith.constant 0 : index
    %c0_172 = arith.constant 0 : index
    %326 = vector.load %arg19[%c6, %c0_171, %c0_172] : memref<8x32x16xf32, #tpu.memory_space<vmem>>, vector<1x32x16xf32>
    %327 = vector.shape_cast %326 : vector<1x32x16xf32> to vector<32x16xf32>
    %cst_173 = arith.constant dense<0.000000e+00> : vector<1x16xf32>
    %328 = tpu.matmul %325, %327, %cst_173 {dimension_numbers = #tpu.dot_dimension_numbers<[1], [0], [0], [1], [0, 0, 1, 1], [], []>} : vector<1x32xf32>, vector<32x16xf32>, vector<1x16xf32> -> vector<1x16xf32>
    %329 = arith.addf %324, %328 : vector<1x16xf32>
    %330 = vector.extract_strided_slice %293 {offsets = [7, 0], sizes = [1, 32], strides = [1, 1]} : vector<8x32xf32> to vector<1x32xf32>
    %c7 = arith.constant 7 : index
    %c0_174 = arith.constant 0 : index
    %c0_175 = arith.constant 0 : index
    %331 = vector.load %arg19[%c7, %c0_174, %c0_175] : memref<8x32x16xf32, #tpu.memory_space<vmem>>, vector<1x32x16xf32>
    %332 = vector.shape_cast %331 : vector<1x32x16xf32> to vector<32x16xf32>
    %cst_176 = arith.constant dense<0.000000e+00> : vector<1x16xf32>
    %333 = tpu.matmul %330, %332, %cst_176 {dimension_numbers = #tpu.dot_dimension_numbers<[1], [0], [0], [1], [0, 0, 1, 1], [], []>} : vector<1x32xf32>, vector<32x16xf32>, vector<1x16xf32> -> vector<1x16xf32>
    %334 = arith.addf %329, %333 : vector<1x16xf32>
    %c0_177 = arith.constant 0 : index
    %c0_178 = arith.constant 0 : index
    %c0_179 = arith.constant 0 : index
    %335 = vector.load %arg21[%c0_177, %c0_178, %c0_179] : memref<1x1x16xf32, #tpu.memory_space<vmem>>, vector<1x1x16xf32>
    %336 = vector.shape_cast %335 : vector<1x1x16xf32> to vector<1x16xf32>
    %337 = vector.shape_cast %334 : vector<1x16xf32> to vector<1x1x16xf32>
    tpu.vector_store %arg21[%c0_177, %c0_178, %c0_179], %337 {strides = array<i32>} : memref<1x1x16xf32, #tpu.memory_space<vmem>>, vector<1x1x16xf32>,
    return
  }
  func.func @transform_0(%arg0: i32) -> (i32, i32, i32) {
    %c0_i32 = arith.constant 0 : i32
    %c0_i32_0 = arith.constant 0 : i32
    %c0_i32_1 = arith.constant 0 : i32
    return %arg0, %c0_i32, %c0_i32_0 : i32, i32, i32
  }
  func.func @transform_1(%arg0: i32) -> (i32, i32) {
    %c0_i32 = arith.constant 0 : i32
    %c0_i32_0 = arith.constant 0 : i32
    %c0_i32_1 = arith.constant 0 : i32
    return %c0_i32, %c0_i32_0 : i32, i32
  }
  func.func @transform_2(%arg0: i32) -> (i32, i32) {
    %c0_i32 = arith.constant 0 : i32
    %c0_i32_0 = arith.constant 0 : i32
    %c0_i32_1 = arith.constant 0 : i32
    return %c0_i32, %c0_i32_0 : i32, i32
  }
  func.func @transform_3(%arg0: i32) -> (i32, i32) {
    %c0_i32 = arith.constant 0 : i32
    %c0_i32_0 = arith.constant 0 : i32
    %c0_i32_1 = arith.constant 0 : i32
    return %c0_i32, %c0_i32_0 : i32, i32
  }
  func.func @transform_4(%arg0: i32) -> (i32, i32, i32) {
    %c0_i32 = arith.constant 0 : i32
    %c0_i32_0 = arith.constant 0 : i32
    %c0_i32_1 = arith.constant 0 : i32
    %c0_i32_2 = arith.constant 0 : i32
    return %c0_i32, %c0_i32_0, %c0_i32_1 : i32, i32, i32
  }
  func.func @transform_5(%arg0: i32) -> (i32, i32, i32) {
    %c0_i32 = arith.constant 0 : i32
    %c0_i32_0 = arith.constant 0 : i32
    %c0_i32_1 = arith.constant 0 : i32
    %c0_i32_2 = arith.constant 0 : i32
    return %c0_i32, %c0_i32_0, %c0_i32_1 : i32, i32, i32
  }
  func.func @transform_6(%arg0: i32) -> (i32, i32, i32) {
    %c0_i32 = arith.constant 0 : i32
    %c0_i32_0 = arith.constant 0 : i32
    %c0_i32_1 = arith.constant 0 : i32
    %c0_i32_2 = arith.constant 0 : i32
    return %c0_i32, %c0_i32_0, %c0_i32_1 : i32, i32, i32
  }
  func.func @transform_7(%arg0: i32) -> (i32, i32, i32) {
    %c0_i32 = arith.constant 0 : i32
    %c0_i32_0 = arith.constant 0 : i32
    %c0_i32_1 = arith.constant 0 : i32
    %c0_i32_2 = arith.constant 0 : i32
    return %c0_i32, %c0_i32_0, %c0_i32_1 : i32, i32, i32
  }
  func.func @transform_8(%arg0: i32) -> (i32, i32, i32) {
    %c0_i32 = arith.constant 0 : i32
    %c0_i32_0 = arith.constant 0 : i32
    %c0_i32_1 = arith.constant 0 : i32
    %c0_i32_2 = arith.constant 0 : i32
    return %c0_i32, %c0_i32_0, %c0_i32_1 : i32, i32, i32
  }
  func.func @transform_9(%arg0: i32) -> (i32, i32, i32) {
    %c0_i32 = arith.constant 0 : i32
    %c0_i32_0 = arith.constant 0 : i32
    %c0_i32_1 = arith.constant 0 : i32
    %c0_i32_2 = arith.constant 0 : i32
    return %c0_i32, %c0_i32_0, %c0_i32_1 : i32, i32, i32
  }
  func.func @transform_10(%arg0: i32) -> (i32, i32, i32) {
    %c0_i32 = arith.constant 0 : i32
    %c0_i32_0 = arith.constant 0 : i32
    %c0_i32_1 = arith.constant 0 : i32
    %c0_i32_2 = arith.constant 0 : i32
    return %c0_i32, %c0_i32_0, %c0_i32_1 : i32, i32, i32
  }
  func.func @transform_11(%arg0: i32) -> (i32, i32, i32) {
    %c0_i32 = arith.constant 0 : i32
    %c0_i32_0 = arith.constant 0 : i32
    %c0_i32_1 = arith.constant 0 : i32
    %c0_i32_2 = arith.constant 0 : i32
    return %c0_i32, %c0_i32_0, %c0_i32_1 : i32, i32, i32
  }
  func.func @transform_12(%arg0: i32) -> (i32, i32, i32) {
    %c0_i32 = arith.constant 0 : i32
    %c0_i32_0 = arith.constant 0 : i32
    %c0_i32_1 = arith.constant 0 : i32
    %c0_i32_2 = arith.constant 0 : i32
    return %c0_i32, %c0_i32_0, %c0_i32_1 : i32, i32, i32
  }
  func.func @transform_13(%arg0: i32) -> (i32, i32, i32) {
    %c0_i32 = arith.constant 0 : i32
    %c0_i32_0 = arith.constant 0 : i32
    %c0_i32_1 = arith.constant 0 : i32
    %c0_i32_2 = arith.constant 0 : i32
    return %c0_i32, %c0_i32_0, %c0_i32_1 : i32, i32, i32
  }
  func.func @transform_14(%arg0: i32) -> (i32, i32, i32) {
    %c0_i32 = arith.constant 0 : i32
    %c0_i32_0 = arith.constant 0 : i32
    %c0_i32_1 = arith.constant 0 : i32
    %c0_i32_2 = arith.constant 0 : i32
    return %c0_i32, %c0_i32_0, %c0_i32_1 : i32, i32, i32
  }
  func.func @transform_15(%arg0: i32) -> (i32, i32, i32) {
    %c0_i32 = arith.constant 0 : i32
    %c0_i32_0 = arith.constant 0 : i32
    %c0_i32_1 = arith.constant 0 : i32
    %c0_i32_2 = arith.constant 0 : i32
    return %c0_i32, %c0_i32_0, %c0_i32_1 : i32, i32, i32
  }
  func.func @transform_16(%arg0: i32) -> (i32, i32) {
    %c0_i32 = arith.constant 0 : i32
    %c0_i32_0 = arith.constant 0 : i32
    %c0_i32_1 = arith.constant 0 : i32
    return %c0_i32, %c0_i32_0 : i32, i32
  }
  func.func @transform_17(%arg0: i32) -> (i32, i32) {
    %c0_i32 = arith.constant 0 : i32
    %c0_i32_0 = arith.constant 0 : i32
    %c0_i32_1 = arith.constant 0 : i32
    return %c0_i32, %c0_i32_0 : i32, i32
  }
  func.func @transform_18(%arg0: i32) -> (i32, i32, i32) {
    %c0_i32 = arith.constant 0 : i32
    %c0_i32_0 = arith.constant 0 : i32
    %c0_i32_1 = arith.constant 0 : i32
    %c0_i32_2 = arith.constant 0 : i32
    return %c0_i32, %c0_i32_0, %c0_i32_1 : i32, i32, i32
  }
  func.func @transform_19(%arg0: i32) -> (i32, i32) {
    %c0_i32 = arith.constant 0 : i32
    %c0_i32_0 = arith.constant 0 : i32
    %c0_i32_1 = arith.constant 0 : i32
    return %c0_i32, %c0_i32_0 : i32, i32
  }
  func.func @transform_20(%arg0: i32) -> (i32, i32, i32) {
    %c0_i32 = arith.constant 0 : i32
    %c0_i32_0 = arith.constant 0 : i32
    %c0_i32_1 = arith.constant 0 : i32
    return %arg0, %c0_i32, %c0_i32_0 : i32, i32, i32
  }
}

</mosaic_0001>

<bundles_post_ra>
// kernel: crypto_forward.2
= control target key start
LH: loop header
LB: loop body
LE: loop exit
PB: predicated region body
PF: predicated region fallthrough
CT: control target
= control target key end

     0   :  { %s5703_s0 = inlined_call_operand.vmem [shape: f32[2,16,2], index: 0, kind: input, shape index: {}]   ;;  %s5704_s1 = inlined_call_operand.vmem [shape: f32[2,32], index: 1, kind: input, shape index: {}]   ;;  %s5705_s2 = inlined_call_operand.vmem [shape: f32[1,32], index: 2, kind: input, shape index: {}]   ;;  %s5706_s3 = inlined_call_operand.vmem [shape: f32[16,32], index: 3, kind: input, shape index: {}]   ;;  %s5707_s4 = inlined_call_operand.vmem [shape: f32[2,1,32], index: 4, kind: input, shape index: {}]   ;;  %s5708_s5 = inlined_call_operand.vmem [shape: f32[2,1,32], index: 5, kind: input, shape index: {}]   ;;  %s5709_s6 = inlined_call_operand.vmem [shape: f32[2,32,96], index: 6, kind: input, shape index: {}]   ;;  %s5710_s7 = inlined_call_operand.vmem [shape: f32[2,1,96], index: 7, kind: input, shape index: {}]   ;;  %s5711_s8 = inlined_call_operand.vmem [shape: f32[2,32,32], index: 8, kind: input, shape index: {}]   ;;  %s5712_s9 = inlined_call_operand.vmem [shape: f32[2,1,32], index: 9, kind: input, shape index: {}]   ;;  %s5713_s10 = inlined_call_operand.vmem [shape: f32[2,1,32], index: 10, kind: input, shape index: {}]   ;;  %s5714_s11 = inlined_call_operand.vmem [shape: f32[2,1,32], index: 11, kind: input, shape index: {}]   ;;  %s5715_s12 = inlined_call_operand.vmem [shape: f32[2,32,128], index: 12, kind: input, shape index: {}]   ;;  %s5716_s13 = inlined_call_operand.vmem [shape: f32[2,1,128], index: 13, kind: input, shape index: {}]   ;;  %s5717_s14 = inlined_call_operand.vmem [shape: f32[2,128,32], index: 14, kind: input, shape index: {}]   ;;  %s5718_s15 = inlined_call_operand.vmem [shape: f32[2,1,32], index: 15, kind: input, shape index: {}]   ;;  %s5719_s16 = inlined_call_operand.vmem [shape: f32[1,32], index: 16, kind: input, shape index: {}]   ;;  %s5720_s17 = inlined_call_operand.vmem [shape: f32[1,32], index: 17, kind: input, shape index: {}]   ;;  %s5721_s18 = inlined_call_operand.vmem [shape: f32[16,32,16], index: 18, kind: input, shape index: {}]   ;;  %s5722_s19 = inlined_call_operand.vmem [shape: f32[1,16], index: 19, kind: input, shape index: {}]   ;;  %s5723_s20 = inlined_call_operand.vmem [shape: f32[2,1,16], index: 20, kind: output, shape index: {}]  }
   0x1   :  { %5733 = sst [smem:[#allocation2_spill]] %s5703_s0 }
   0x2   :  { %5734 = sst [smem:[#allocation3_spill]] %s5704_s1  ;;  %s4933_s1 = smov 0  }
   0x3   :  { %5735 = sst [smem:[#allocation4_spill]] %s5705_s2 }
   0x4   :  { %5736 = sst [smem:[#allocation5_spill]] %s5706_s3 }
   0x5   :  { %5737 = sst [smem:[#allocation6_spill]] %s5707_s4 }
   0x6 LB: > { %s3985_s22 = sadd.s32 4294967295, %s4817_s1   ;;  %p3989_p0 = scmp.ge.s32.totalorder %s4817_s1, 1  ;;  %s4817_s1 = sphi %s4933_s1, %s30_s1  }
   0x7   : > { %p562_p1 = scmp.lt.s32.totalorder %s4817_s1, 3 }
   0x9   : > { %p563_p2 = pnand %p3989_p0, %p562_p1 }
   0xa   : > { %p618_p3 = scmp.lt.s32.totalorder (!%p563_p2), %s3985_s22, 1  ;;  %s5738_s25 = sld [smem:[#allocation2_spill]] (!%p563_p2) }
   0xb   : > { %566 = sbr.rel (%p563_p2) target bundleno = 6196 (0x1834), region = 100  ;;  %s5739_s28 = sld [smem:[#allocation3_spill]] (!%p563_p2) }
   0xc   : > { %s5740_s21 = sld [smem:[#allocation4_spill]] (!%p563_p2)  ;;  %s4821_s30 = smov (!%p563_p2), 96  }
   0xd   : > { %s5741_s2 = sld [smem:[#allocation5_spill]] (!%p563_p2)  ;;  %s5731_s0 = smov (!%p563_p2), 80  }
   0xe   : > { %s5727_s4 = smov (!%p563_p2), 48   ;;  %s5744_s26 = smov (!%p563_p2), 112  }
  0x10   : > { %v4819_v0 = vmov 0   ;;  %s5747_s22 = smov (!%p618_p3, %s3985_s22), 1  ;;  %v4820_v3 = vmov 1   ;;  %vm677_vm0 = vcmask 261120   ;;  %v724_v35 = vld [vmem:[%s5709_s6 + $0x18] sm:$0xff]  ;;  %v723_v36 = vld [vmem:[%s5709_s6 + $0x10] sm:$0xff] }
  0x11   : > { %4749 = vset.pattern.permute.xlu1 %v4819_v0  ;;  %4747 = vset.pattern.permute.xlu0 %v4819_v0  ;;  %s4167_s23 = sshll.u32 %s5747_s22, 4  ;;  %v3992_v6 = vld [vmem:[%s5739_s28] ss:$0 sm:$0xff]  ;;  %v3993_v7 = vld [vmem:[%s5739_s28 + $0x1] ss:$0 sm:$0xff]  ;;  %v722_v37 = vld [vmem:[%s5709_s6 + $0x8] sm:$0xff] }
  0x12   : > { %s622_s3 = scalar_lea.vmem %s5738_s25, %s4167_s23  ;;  %v3994_v14 = vld [vmem:[%s5740_s21] ss:$0 sm:$0xff]  ;;  %4356 = vmatprep.subr.mxu0 %v724_v35  ;;  %vm820_vm1 = vcmask 130048   ;;  %s5729_s21 = smov 112   ;;  %vm4827_vm2 = vmmov 0   ;;  %vm3936_vm3 = vcmask 122880  }
  0x13   : > { %v627_v1 = vld [vmem:[%s622_s3 + $0x8] sm:$0xff]  ;;  %v626_v2 = vld [vmem:[%s622_s3] sm:$0xff]  ;;  %4357 = vmatpush3.msra.mxu0 %v724_v35  ;;  %s5742_s3 = sld [smem:[#allocation6_spill]]  ;;  %s4824_s23 = smov 64  }
  0x14   : > { %636 = vperm.xlu1 %4749, %v627_v1   ;;  %631 = vperm.xlu0 %4747, %v626_v2   ;;  %v672_v17 = vld [vmem:[%s5741_s2 + $0x8] sm:$0xff]  ;;  %v671_v18 = vld [vmem:[%s5741_s2] sm:$0xff] }
  0x15   : > { %4358 = vmatprep.subr.mxu0 %v723_v36  ;;  %v721_v38 = vld [vmem:[%s5709_s6] sm:$0xff] }
  0x16   : > { %4359 = vmatpush3.msra.mxu0 %v723_v36  ;;  %v3996_v49 = vld [vmem:[%s5708_s5] ss:$0 sm:$0xff] }
  0x17   : > { %4360 = vmatprep.subr.mxu0 %v722_v37  ;;  %v3997_v55 = vld [vmem:[%s5710_s7] ss:$0 sm:$0xff] }
  0x18   : > { %4750 = vset.pattern.permute.xlu1 %v4820_v3  ;;  %4748 = vset.pattern.permute.xlu0 %v4820_v3 }
  0x19   : > { %651 = vperm.xlu1 %4750, %v627_v1   ;;  %647 = vperm.xlu0 %4748, %v626_v2   ;;  %v3995_v46 = vld [vmem:[%s5742_s3] ss:$0 sm:$0xff] }
  0x1a   : > { %4361 = vmatpush3.msra.mxu0 %v722_v37 }
  0x1b   : > { %4362 = vmatprep.subr.mxu0 %v721_v38 }
  0x1c   : > { %4363 = vmatpush3.msra.mxu0 %v721_v38 }
  0x8f   : > { %v632_v4 = vpop.permute.xlu0 %631  ;;  %v637_v5 = vpop.permute.xlu1 %636 }
  0x90   : > { %v643_v10 = vmul.f32 %v3992_v6, %v632_v4  ;;  %v644_v11 = vmul.f32 %v3992_v6, %v637_v5 }
  0x94   : > { %v652_v8 = vpop.permute.xlu1 %651  ;;  %v648_v9 = vpop.permute.xlu0 %647 }
  0x95   : > { %v659_v12 = vmul.f32 %v3993_v7, %v652_v8  ;;  %v658_v13 = vmul.f32 %v3993_v7, %v648_v9 }
  0x97   : > { %v661_v15 = vadd.f32 %v659_v12, %v644_v11  ;;  %v660_v16 = vadd.f32 %v658_v13, %v643_v10 }
  0x99   : > { %v670_v19 = vadd.f32 %v3994_v14, %v661_v15  ;;  %v669_v20 = vadd.f32 %v3994_v14, %v660_v16 }
  0x9b   : > { %v4962_v21 = vadd.f32 %v672_v17, %v670_v19  ;;  %v4964_v22 = vadd.f32 %v671_v18, %v669_v20 }
  0x9d   : > { %v681_v23 = vsel %vm677_vm0, %v4962_v21, 0.0  ;;  %v678_v24 = vsel %vm677_vm0, %v4964_v22, 0.0 }
  0x9e   : > { %682 = vadd.xlane.f32.xlu0 %v681_v23  ;;  %679 = vadd.xlane.f32.xlu1 %v678_v24 }
 0x127   : > { %v680_v25 = vpop.xlane.xlu1 %679  ;;  %v683_v26 = vpop.xlane.xlu0 %682 }
 0x128   : > { %v685_v27 = vmul.f32 0.03125, %v680_v25  ;;  %v686_v28 = vmul.f32 0.03125, %v683_v26 }
 0x12a   : > { %v687_v29 = vsub.f32 %v4964_v22, %v685_v27  ;;  %v688_v30 = vsub.f32 %v4962_v21, %v686_v28 }
 0x12c   : > { %v689_v31 = vmul.f32 %v687_v29, %v687_v29  ;;  %v690_v32 = vmul.f32 %v688_v30, %v688_v30 }
 0x12e   : > { %v691_v33 = vsel %vm677_vm0, %v689_v31, 0.0  ;;  %v694_v34 = vsel %vm677_vm0, %v690_v32, 0.0 }
 0x12f   : > { %692 = vadd.xlane.f32.xlu0 %v691_v33  ;;  %695 = vadd.xlane.f32.xlu1 %v694_v34 }
 0x1b8   : > { %v696_v39 = vpop.xlane.xlu1 %695  ;;  %v693_v40 = vpop.xlane.xlu0 %692 }
 0x1b9   : > { %v698_v41 = vmul.f32 0.03125, %v696_v39  ;;  %v697_v42 = vmul.f32 0.03125, %v693_v40  ;;  %v1014_v40 = vld [vmem:[%s5711_s8 + $0x8] sm:$0xff] }
 0x1bb   : > { %v700_v43 = vadd.f32 1e-05, %v698_v41  ;;  %v699_v44 = vadd.f32 1e-05, %v697_v42  ;;  %v1013_v41 = vld [vmem:[%s5711_s8] sm:$0xff] }
 0x1bd   : > { %4751 = vrsqrt.f32 %v700_v43 }
 0x1be   : > { %4753 = vrsqrt.f32 %v699_v44 }
 0x1ca   : > { %v4752_v45 = vpop.eup %4751 }
 0x1cb   : > { %v4754_v47 = vpop.eup %4753  ;;  %v704_v48 = vmul.f32 %v4752_v45, %v688_v30 }
 0x1cc   : > { %v703_v50 = vmul.f32 %v4754_v47, %v687_v29 }
 0x1cd   : > { %v712_v51 = vmul.f32 %v3995_v46, %v704_v48 }
 0x1ce   : > { %v711_v52 = vmul.f32 %v3995_v46, %v703_v50 }
 0x1cf   : > { %v720_v53 = vadd.f32 %v3996_v49, %v712_v51 }
 0x1d0   : > { %v719_v54 = vadd.f32 %v3996_v49, %v711_v52  ;;  %v1016_v52 = vld [vmem:[%s5711_s8 + $0x18] sm:$0xff] }
 0x1d2   : > { %4364 = vmatprep.mubr.msk.f32.mxu0 %vm677_vm0, %v719_v54 }
 0x1d3   : > { %4365 = vmatmul.mubr.msk.f32.vlgmr.msra.gmra.mxu0 %vm677_vm0, %v720_v53  ;;  %v1015_v53 = vld [vmem:[%s5711_s8 + $0x10] sm:$0xff] }
 0x293   : > { %v4366_v56 = vpop.f32.mrf.mxu0 }
 0x294   : > { %v4997_v57 = vadd.f32 %v4366_v56, %v3997_v55 }
 0x295   : > { %v804_v58 = vpop.f32.mrf.mxu0 }
 0x296   : > { %v4999_v59 = vadd.f32 %v3997_v55, %v804_v58  ;;  %818 = vrot.lane.b32.xlu0 %v4997_v57, %s4821_s30  ;;  %v4008_v58 = vld [vmem:[%s5712_s9] ss:$0 sm:$0xff] }
 0x298   : > { %816 = vrot.lane.b32.xlu1 %v4999_v59, %s4821_s30  ;;  %4371 = vmatprep.mubr.msk.f32.mxu1 %vm820_vm1, %v4999_v59 }
 0x29a   : > { %1110 = vrot.lane.b32.xlu0 %v4999_v59, %s5731_s0 }
 0x29c   : > { %1112 = vrot.lane.b32.xlu1 %v4997_v57, %s5731_s0  ;;  %s5745_s0 = smov 48  }
 0x29e   : > { %1108 = vrot.lane.b32.xlu0 %v4997_v57, %s5729_s21 }
 0x2a0   : > { %1106 = vrot.lane.b32.xlu1 %v4999_v59, %s5729_s21  ;;  %s625_s21 = scalar_lea.vmem %s5723_s20, %s5747_s22 }
 0x308   : > { %v819_v60 = vpop.permute.xlu0 %818 }
 0x309   : > { %4367 = vmatprep.subr.msk.mxu1 %vm820_vm1, %v819_v60 }
 0x30a   : > { %4368 = vmatpush3.xpose.msk.msra.mxu1 %vm820_vm1, %v819_v60  ;;  %v817_v61 = vpop.permute.xlu1 %816 }
 0x30b   : > { %4369 = vmatprep.subr.msk.mxu1 %vm820_vm1, %v817_v61 }
 0x30c   : > { %v1111_v63 = vpop.permute.xlu0 %1110 }
 0x30e   : > { %4370 = vmatpush3.xpose.msk.msra.mxu1 %vm820_vm1, %v817_v61  ;;  %v1113_v62 = vpop.permute.xlu1 %1112 }
 0x30f   : > { %4388 = vmatprep.subr.msk.mxu0 %vm820_vm1, %v1113_v62 }
 0x310   : > { %4389 = vmatpush3.xpose.msk.msra.mxu0 %vm820_vm1, %v1113_v62  ;;  %v1109_v1 = vpop.permute.xlu0 %1108 }
 0x311   : > { %4372 = vmatmul.mubr.msk.f32.vlgmr.msra.gmra.mxu1 %vm820_vm1, %v4997_v57  ;;  %4390 = vmatprep.subr.msk.mxu0 %vm820_vm1, %v1111_v63 }
 0x312   : > { %v1107_v0 = vpop.permute.xlu1 %1106 }
 0x313   : > { %4392 = vmatprep.mubr.msk.f32.mxu0 %vm820_vm1, %v1107_v0 }
 0x314   : > { %4391 = vmatpush3.xpose.msk.msra.mxu0 %vm820_vm1, %v1111_v63 }
 0x317   : > { %4393 = vmatmul.mubr.msk.f32.vlgmr.msra.gmra.mxu0 %vm820_vm1, %v1109_v1 }
 0x3d1   : > { %v4373_v2 = vpop.f32.mrf.mxu1 }
 0x3d2   : > { %v907_v3 = vsel %vm820_vm1, %v4373_v2, -inf }
 0x3d3   : > { %908 = vmax.xlane.f32.xlu0 %v907_v3  ;;  %v895_v4 = vpop.f32.mrf.mxu1 }
 0x3d4   : > { %v904_v5 = vsel %vm820_vm1, %v895_v4, -inf }
 0x3d5   : > { %905 = vmax.xlane.f32.xlu1 %v904_v5 }
 0x3d7   : > { %v4394_v16 = vpop.f32.mrf.mxu0 }
 0x3d8   : > { %v1200_v19 = vsel %vm820_vm1, %v4394_v16, -inf }
 0x3d9   : > { %v1188_v17 = vpop.f32.mrf.mxu0 }
 0x3da   : > { %v1197_v18 = vsel %vm820_vm1, %v1188_v17, -inf }
 0x45c   : > { %v909_v6 = vpop.xlane.xlu0 %908 }
 0x45d   : > { %v911_v7 = vsub.f32 %v4373_v2, %v909_v6 }
 0x45e   : > { %v906_v8 = vpop.xlane.xlu1 %905 }
 0x45f   : > { %v914_v9 = vmul.f32 1.442695, %v911_v7  ;;  %v910_v10 = vsub.f32 %v895_v4, %v906_v8 }
 0x461   : > { %4755 = vpow2.f32 %v914_v9  ;;  %v912_v11 = vmul.f32 1.442695, %v910_v10 }
 0x463   : > { %4757 = vpow2.f32 %v912_v11 }
 0x46e   : > { %v4756_v12 = vpop.eup %4755 }
 0x46f   : > { %v919_v13 = vsel %vm820_vm1, %v4756_v12, 0.0 }
 0x470   : > { %v4758_v14 = vpop.eup %4757  ;;  %920 = vadd.xlane.f32.xlu1 %v919_v13  ;;  %v1438_v13 = vld [vmem:[%s5715_s12 + $0x18] sm:$0xff] }
 0x471   : > { %v916_v15 = vsel %vm820_vm1, %v4758_v14, 0.0  ;;  %4409 = vmatprep.subr.mxu0 %v1438_v13 }
 0x472   : > { %917 = vadd.xlane.f32.xlu0 %v916_v15  ;;  %4410 = vmatpush3.msra.mxu0 %v1438_v13  ;;  %v1436_v15 = vld [vmem:[%s5715_s12 + $0x8] sm:$0xff] }
 0x481   : > { %926 = vrot.lane.b32.xlu1 %v4999_v59, %s4824_s23 }
 0x488   : > { %928 = vrot.lane.b32.xlu0 %v4997_v57, %s4824_s23 }
 0x4a5   : > { %1198 = vmax.xlane.f32.xlu1 %v1197_v18 }
 0x4a7   : > { %1201 = vmax.xlane.f32.xlu0 %v1200_v19 }
 0x4f9   : > { %v921_v20 = vpop.xlane.xlu1 %920 }
 0x4fa   : > { %4759 = vrcp.f32 %v921_v20 }
 0x4fb   : > { %v918_v23 = vpop.xlane.xlu0 %917 }
 0x4fc   : > { %4761 = vrcp.f32 %v918_v23 }
 0x4fd   : > { %v927_v25 = vpop.permute.xlu1 %926 }
 0x4ff   : > { %v929_v24 = vpop.permute.xlu0 %928 }
 0x500   : > { %4374 = vmatprep.subr.mxu1 %v929_v24 }
 0x501   : > { %4375 = vmatpush3.msra.mxu1 %v929_v24 }
 0x502   : > { %4376 = vmatprep.subr.mxu1 %v927_v25 }
 0x503   : > { %4377 = vmatpush3.msra.mxu1 %v927_v25 }
 0x504   : > { %4381 = vmatprep.subr.mxu1 %v1014_v40 }
 0x507   : > { %v4760_v26 = vpop.eup %4759 }
 0x508   : > { %v925_v29 = vmul.f32 %v4760_v26, %v4756_v12  ;;  %v4017_v26 = vld [vmem:[%s5713_s10] ss:$0 sm:$0xff] }
 0x509   : > { %v4762_v27 = vpop.eup %4761 }
 0x50a   : > { %v924_v28 = vmul.f32 %v4762_v27, %v4758_v14  ;;  %v1437_v14 = vld [vmem:[%s5715_s12 + $0x10] sm:$0xff] }
 0x50b   : > { %4411 = vmatprep.subr.mxu0 %v1437_v14 }
 0x50c   : > { %4378 = vmatprep.mubr.msk.f32.mxu1 %vm820_vm1, %v924_v28  ;;  %4412 = vmatpush3.msra.mxu0 %v1437_v14 }
 0x50d   : > { %4379 = vmatmul.mubr.msk.f32.vlgmr.msra.gmra.mxu1 %vm820_vm1, %v925_v29  ;;  %4413 = vmatprep.subr.mxu0 %v1436_v15 }
 0x50e   : > { %4382 = vmatpush3.msra.mxu1 %v1014_v40  ;;  %4414 = vmatpush3.msra.mxu0 %v1436_v15  ;;  %v1555_v40 = vld [vmem:[%s5717_s14 + $0x50] sm:$0xff] }
 0x50f   : > { %4383 = vmatprep.subr.mxu1 %v1013_v41 }
 0x510   : > { %4384 = vmatpush3.msra.mxu1 %v1013_v41  ;;  %v1554_v41 = vld [vmem:[%s5717_s14 + $0x48] sm:$0xff] }
 0x52e   : > { %v1199_v30 = vpop.xlane.xlu1 %1198 }
 0x52f   : > { %v1203_v31 = vsub.f32 %v1188_v17, %v1199_v30 }
 0x530   : > { %v1202_v32 = vpop.xlane.xlu0 %1201 }
 0x531   : > { %v1205_v33 = vmul.f32 1.442695, %v1203_v31  ;;  %v1204_v34 = vsub.f32 %v4394_v16, %v1202_v32  ;;  %v1435_v16 = vld [vmem:[%s5715_s12] sm:$0xff] }
 0x532   : > { %4415 = vmatprep.subr.mxu0 %v1435_v16  ;;  %v4018_v31 = vld [vmem:[%s5714_s11] ss:$0 sm:$0xff] }
 0x533   : > { %4763 = vpow2.f32 %v1205_v33  ;;  %v1207_v35 = vmul.f32 1.442695, %v1204_v34  ;;  %4416 = vmatpush3.msra.mxu0 %v1435_v16 }
 0x535   : > { %4765 = vpow2.f32 %v1207_v35  ;;  %v1560_v35 = vld [vmem:[%s5717_s14 + $0x78] sm:$0xff] }
 0x540   : > { %v4764_v36 = vpop.eup %4763 }
 0x541   : > { %v1209_v37 = vsel %vm820_vm1, %v4764_v36, 0.0 }
 0x542   : > { %v4766_v38 = vpop.eup %4765  ;;  %1210 = vadd.xlane.f32.xlu0 %v1209_v37  ;;  %v1558_v37 = vld [vmem:[%s5717_s14 + $0x68] sm:$0xff] }
 0x543   : > { %v1212_v39 = vsel %vm820_vm1, %v4766_v38, 0.0 }
 0x544   : > { %1213 = vadd.xlane.f32.xlu1 %v1212_v39  ;;  %v1556_v39 = vld [vmem:[%s5717_s14 + $0x58] sm:$0xff] }
 0x555   : > { %1219 = vrot.lane.b32.xlu1 %v4999_v59, %s5727_s4 }
 0x558   : > { %1221 = vrot.lane.b32.xlu0 %v4997_v57, %s5727_s4 }
 0x5cb   : > { %v1211_v42 = vpop.xlane.xlu0 %1210 }
 0x5cc   : > { %4767 = vrcp.f32 %v1211_v42  ;;  %v1553_v42 = vld [vmem:[%s5717_s14 + $0x40] sm:$0xff] }
 0x5cd   : > { %v4380_v43 = vpop.f32.mrf.mxu1  ;;  %v1214_v44 = vpop.xlane.xlu1 %1213 }
 0x5ce   : > { %4769 = vrcp.f32 %v1214_v44  ;;  %v1551_v44 = vld [vmem:[%s5717_s14 + $0x30] sm:$0xff] }
 0x5cf   : > { %v1004_v45 = vpop.f32.mrf.mxu1  ;;  %v1222_v46 = vpop.permute.xlu0 %1221 }
 0x5d0   : > { %4385 = vmatprep.mubr.msk.f32.mxu1 %vm820_vm1, %v1004_v45  ;;  %4395 = vmatprep.subr.mxu1 %v1222_v46  ;;  %v1550_v45 = vld [vmem:[%s5717_s14 + $0x28] sm:$0xff] }
 0x5d1   : > { %4386 = vmatmul.mubr.msk.f32.vlgmr.msra.gmra.mxu1 %vm820_vm1, %v4380_v43  ;;  %v1220_v47 = vpop.permute.xlu1 %1219  ;;  %v1552_v43 = vld [vmem:[%s5717_s14 + $0x38] sm:$0xff] }
 0x5d2   : > { %4396 = vmatpush3.msra.mxu1 %v1222_v46  ;;  %v1549_v46 = vld [vmem:[%s5717_s14 + $0x20] sm:$0xff] }
 0x5d3   : > { %4397 = vmatprep.subr.mxu1 %v1220_v47 }
 0x5d4   : > { %4398 = vmatpush3.msra.mxu1 %v1220_v47  ;;  %v1548_v47 = vld [vmem:[%s5717_s14 + $0x18] sm:$0xff] }
 0x5d5   : > { %4402 = vmatprep.subr.mxu1 %v1016_v52 }
 0x5d9   : > { %v4768_v48 = vpop.eup %4767 }
 0x5da   : > { %v1217_v49 = vmul.f32 %v4768_v48, %v4764_v36  ;;  %v1559_v36 = vld [vmem:[%s5717_s14 + $0x70] sm:$0xff] }
 0x5db   : > { %v4770_v50 = vpop.eup %4769  ;;  %v1547_v48 = vld [vmem:[%s5717_s14 + $0x10] sm:$0xff] }
 0x5dc   : > { %4399 = vmatprep.mubr.msk.f32.mxu1 %vm820_vm1, %v1217_v49  ;;  %v1218_v51 = vmul.f32 %v4770_v50, %v4766_v38  ;;  %v1557_v38 = vld [vmem:[%s5717_s14 + $0x60] sm:$0xff]  ;;  %v1546_v49 = vld [vmem:[%s5717_s14 + $0x8] sm:$0xff] }
 0x5dd   : > { %v1545_v50 = vld [vmem:[%s5717_s14] sm:$0xff] }
 0x5de   : > { %4400 = vmatmul.mubr.msk.f32.vlgmr.msra.gmra.mxu1 %vm820_vm1, %v1218_v51  ;;  %v4019_v51 = vld [vmem:[%s5716_s13] ss:$0 sm:$0xff] }
 0x5df   : > { %4403 = vmatpush3.msra.mxu1 %v1016_v52 }
 0x5e0   : > { %4404 = vmatprep.subr.mxu1 %v1015_v53 }
 0x5e1   : > { %4405 = vmatpush3.msra.mxu1 %v1015_v53 }
 0x5e2   : > { %4420 = vmatprep.subr.mxu1 %v1560_v35 }
 0x691   : > { %v4387_v54 = vpop.f32.mrf.mxu1 }
 0x692   : > { %v1105_v59 = vadd.f32 %v4387_v54, %v4008_v58 }
 0x693   : > { %v1089_v55 = vpop.f32.mrf.mxu1 }
 0x694   : > { %v1104_v61 = vadd.f32 %v4008_v58, %v1089_v55 }
 0x69e   : > { %v4401_v56 = vpop.f32.mrf.mxu1 }
 0x6a0   : > { %v1297_v57 = vpop.f32.mrf.mxu1 }
 0x6a1   : > { %4406 = vmatprep.mubr.msk.f32.mxu1 %vm820_vm1, %v1297_v57 }
 0x6a2   : > { %4407 = vmatmul.mubr.msk.f32.vlgmr.msra.gmra.mxu1 %vm820_vm1, %v4401_v56 }
 0x6a3   : > { %4421 = vmatpush3.msra.mxu1 %v1560_v35 }
 0x6a4   : > { %4422 = vmatprep.subr.mxu1 %v1559_v36 }
 0x6a5   : > { %4423 = vmatpush3.msra.mxu1 %v1559_v36 }
 0x6a6   : > { %4424 = vmatprep.subr.mxu1 %v1558_v37 }
 0x6a7   : > { %4425 = vmatpush3.msra.mxu1 %v1558_v37 }
 0x6a8   : > { %4426 = vmatprep.subr.mxu1 %v1557_v38 }
 0x6a9   : > { %4427 = vmatpush3.msra.mxu1 %v1557_v38 }
 0x6aa   : > { %4428 = vmatprep.subr.mxu1 %v1556_v39 }
 0x6ab   : > { %4429 = vmatpush3.msra.mxu1 %v1556_v39 }
 0x6ac   : > { %4430 = vmatprep.subr.mxu1 %v1555_v40 }
 0x6ad   : > { %4431 = vmatpush3.msra.mxu1 %v1555_v40  ;;  %v4025_v40 = vld [vmem:[%s5742_s3 + $0x1] ss:$0 sm:$0xff] }
 0x6ae   : > { %4432 = vmatprep.subr.mxu1 %v1554_v41 }
 0x6af   : > { %4433 = vmatpush3.msra.mxu1 %v1554_v41 }
 0x6b0   : > { %4434 = vmatprep.subr.mxu1 %v1553_v42 }
 0x6b1   : > { %4435 = vmatpush3.msra.mxu1 %v1553_v42 }
 0x6b2   : > { %4436 = vmatprep.subr.mxu1 %v1552_v43 }
 0x6b3   : > { %4437 = vmatpush3.msra.mxu1 %v1552_v43 }
 0x6b4   : > { %4438 = vmatprep.subr.mxu1 %v1551_v44 }
 0x6b5   : > { %4439 = vmatpush3.msra.mxu1 %v1551_v44 }
 0x6b6   : > { %4440 = vmatprep.subr.mxu1 %v1550_v45 }
 0x6b7   : > { %4441 = vmatpush3.msra.mxu1 %v1550_v45  ;;  %v4026_v45 = vld [vmem:[%s5708_s5 + $0x1] ss:$0 sm:$0xff] }
 0x6b8   : > { %4442 = vmatprep.subr.mxu1 %v1549_v46 }
 0x6b9   : > { %4443 = vmatpush3.msra.mxu1 %v1549_v46 }
 0x6ba   : > { %4444 = vmatprep.subr.mxu1 %v1548_v47 }
 0x6bb   : > { %4445 = vmatpush3.msra.mxu1 %v1548_v47 }
 0x6bc   : > { %4446 = vmatprep.subr.mxu1 %v1547_v48 }
 0x6bd   : > { %4447 = vmatpush3.msra.mxu1 %v1547_v48 }
 0x6be   : > { %4448 = vmatprep.subr.mxu1 %v1546_v49 }
 0x6bf   : > { %4449 = vmatpush3.msra.mxu1 %v1546_v49  ;;  %v4032_v49 = vld [vmem:[%s5710_s7 + $0x1] ss:$0 sm:$0xff] }
 0x6c0   : > { %4450 = vmatprep.subr.mxu1 %v1545_v50 }
 0x6c1   : > { %4451 = vmatpush3.msra.mxu1 %v1545_v50 }
 0x762   : > { %v4408_v60 = vpop.f32.mrf.mxu1 }
 0x763   : > { %v1388_v62 = vadd.f32 %v4408_v60, %v1105_v59 }
 0x764   : > { %v1378_v63 = vpop.f32.mrf.mxu1 }
 0x765   : > { %v5067_v0 = vadd.f32 %v1388_v62, %v4962_v21  ;;  %v1387_v1 = vadd.f32 %v1378_v63, %v1104_v61 }
 0x767   : > { %v5070_v2 = vadd.f32 %v1387_v1, %v4964_v22  ;;  %v1396_v3 = vsel %vm677_vm0, %v5067_v0, 0.0 }
 0x768   : > { %1397 = vadd.xlane.f32.xlu0 %v1396_v3 }
 0x769   : > { %v1393_v4 = vsel %vm677_vm0, %v5070_v2, 0.0 }
 0x76a   : > { %1394 = vadd.xlane.f32.xlu1 %v1393_v4 }
 0x7f1   : > { %v1398_v5 = vpop.xlane.xlu0 %1397 }
 0x7f2   : > { %v1400_v6 = vmul.f32 0.03125, %v1398_v5 }
 0x7f3   : > { %v1395_v7 = vpop.xlane.xlu1 %1394 }
 0x7f4   : > { %v1402_v8 = vsub.f32 %v5067_v0, %v1400_v6  ;;  %v1399_v9 = vmul.f32 0.03125, %v1395_v7 }
 0x7f6   : > { %v1401_v21 = vsub.f32 %v5070_v2, %v1399_v9  ;;  %v1404_v10 = vmul.f32 %v1402_v8, %v1402_v8 }
 0x7f8   : > { %v1408_v22 = vsel %vm677_vm0, %v1404_v10, 0.0  ;;  %v1403_v11 = vmul.f32 %v1401_v21, %v1401_v21 }
 0x7f9   : > { %1409 = vadd.xlane.f32.xlu1 %v1408_v22 }
 0x7fa   : > { %v1405_v12 = vsel %vm677_vm0, %v1403_v11, 0.0  ;;  %v4022_v11 = vld [vmem:[%s5718_s15] ss:$0 sm:$0xff] }
 0x7fb   : > { %1406 = vadd.xlane.f32.xlu0 %v1405_v12 }
 0x882   : > { %v1410_v17 = vpop.xlane.xlu1 %1409 }
 0x883   : > { %v1412_v18 = vmul.f32 0.03125, %v1410_v17 }
 0x884   : > { %v1407_v19 = vpop.xlane.xlu0 %1406 }
 0x885   : > { %v1414_v20 = vadd.f32 1e-05, %v1412_v18  ;;  %v1411_v23 = vmul.f32 0.03125, %v1407_v19 }
 0x887   : > { %4771 = vrsqrt.f32 %v1414_v20  ;;  %v1413_v24 = vadd.f32 1e-05, %v1411_v23 }
 0x889   : > { %4773 = vrsqrt.f32 %v1413_v24 }
 0x894   : > { %v4772_v25 = vpop.eup %4771 }
 0x895   : > { %v1418_v27 = vmul.f32 %v4772_v25, %v1402_v8 }
 0x896   : > { %v4774_v28 = vpop.eup %4773 }
 0x897   : > { %v1417_v29 = vmul.f32 %v4774_v28, %v1401_v21  ;;  %v1426_v30 = vmul.f32 %v4017_v26, %v1418_v27 }
 0x899   : > { %v1425_v32 = vmul.f32 %v4017_v26, %v1417_v29  ;;  %v1434_v34 = vadd.f32 %v4018_v31, %v1426_v30  ;;  %v4030_v29 = vld [vmem:[%s5709_s6 + $0x38] sm:$0xff]  ;;  %v4029_v30 = vld [vmem:[%s5709_s6 + $0x30] sm:$0xff] }
 0x89a   : > { %4455 = vmatprep.subr.mxu0 %v4030_v29 }
 0x89b   : > { %v1433_v33 = vadd.f32 %v4018_v31, %v1425_v32  ;;  %v4028_v31 = vld [vmem:[%s5709_s6 + $0x28] sm:$0xff]  ;;  %v4027_v32 = vld [vmem:[%s5709_s6 + $0x20] sm:$0xff] }
 0x89d   : > { %4417 = vmatprep.mubr.msk.f32.mxu0 %vm677_vm0, %v1433_v33 }
 0x89e   : > { %4418 = vmatmul.mubr.msk.f32.vlgmr.msra.gmra.mxu0 %vm677_vm0, %v1434_v34 }
 0x89f   : > { %4456 = vmatpush3.msra.mxu0 %v4030_v29 }
 0x8a0   : > { %4457 = vmatprep.subr.mxu0 %v4029_v30 }
 0x8a1   : > { %4458 = vmatpush3.msra.mxu0 %v4029_v30 }
 0x8a2   : > { %4459 = vmatprep.subr.mxu0 %v4028_v31 }
 0x8a3   : > { %4460 = vmatpush3.msra.mxu0 %v4028_v31 }
 0x8a4   : > { %4461 = vmatprep.subr.mxu0 %v4027_v32 }
 0x8a5   : > { %4462 = vmatpush3.msra.mxu0 %v4027_v32 }
 0x95e   : > { %v4419_v52 = vpop.f32.mrf.mxu0 }
 0x95f   : > { %v1524_v53 = vadd.f32 %v4419_v52, %v4019_v51 }
 0x960   : > { %v1518_v54 = vpop.f32.mrf.mxu0 }
 0x961   : > { %v1528_v55 = vmul.f32 %v1524_v53, %v1524_v53  ;;  %v1519_v56 = vadd.f32 %v4019_v51, %v1518_v54 }
 0x963   : > { %v1530_v57 = vmul.f32 %v1528_v55, %v1524_v53  ;;  %v1527_v58 = vmul.f32 %v1519_v56, %v1519_v56 }
 0x965   : > { %v1532_v59 = vmul.f32 0.044715, %v1530_v57  ;;  %v1529_v60 = vmul.f32 %v1527_v58, %v1519_v56 }
 0x967   : > { %v1534_v61 = vadd.f32 %v1532_v59, %v1524_v53  ;;  %v1531_v62 = vmul.f32 0.044715, %v1529_v60 }
 0x969   : > { %v1536_v63 = vmul.f32 0.7978846, %v1534_v61  ;;  %v1533_v1 = vadd.f32 %v1531_v62, %v1519_v56 }
 0x96b   : > { %4775 = vtanh.f32 %v1536_v63  ;;  %v1535_v3 = vmul.f32 0.7978846, %v1533_v1 }
 0x96d   : > { %4777 = vtanh.f32 %v1535_v3 }
 0x978   : > { %v4776_v4 = vpop.eup %4775 }
 0x979   : > { %v1540_v5 = vadd.f32 1.0, %v4776_v4 }
 0x97a   : > { %v4778_v6 = vpop.eup %4777 }
 0x97b   : > { %v1539_v7 = vadd.f32 1.0, %v4778_v6  ;;  %v1542_v8 = vmul.f32 0.5, %v1540_v5 }
 0x97d   : > { %v1541_v9 = vmul.f32 0.5, %v1539_v7  ;;  %v1544_v10 = vmul.f32 %v1542_v8, %v1524_v53 }
 0x97f   : > { %v1543_v21 = vmul.f32 %v1541_v9, %v1519_v56 }
 0x981   : > { %4452 = vmatprep.mubr.f32.mxu1 %v1543_v21 }
 0x982   : > { %4453 = vmatmul.mubr.f32.vlgmr.msra.gmra.mxu1 %v1544_v10 }
 0xa42   : > { %v4454_v22 = vpop.f32.mrf.mxu1 }
 0xa43   : > { %v1637_v12 = vadd.f32 %v4454_v22, %v5067_v0  ;;  %v4043_v22 = vld [vmem:[%s5711_s8 + $0x28] sm:$0xff] }
 0xa44   : > { %v1627_v13 = vpop.f32.mrf.mxu1 }
 0xa45   : > { %v5155_v14 = vadd.f32 %v4022_v11, %v1637_v12  ;;  %v1636_v15 = vadd.f32 %v1627_v13, %v5070_v2 }
 0xa47   : > { %v5158_v16 = vadd.f32 %v4022_v11, %v1636_v15  ;;  %v1654_v17 = vsel %vm677_vm0, %v5155_v14, 0.0 }
 0xa48   : > { %1655 = vadd.xlane.f32.xlu1 %v1654_v17  ;;  %v4042_v17 = vld [vmem:[%s5711_s8 + $0x20] sm:$0xff] }
 0xa49   : > { %v1651_v18 = vsel %vm677_vm0, %v5158_v16, 0.0 }
 0xa4a   : > { %1652 = vadd.xlane.f32.xlu0 %v1651_v18 }
 0xad1   : > { %v1656_v19 = vpop.xlane.xlu1 %1655 }
 0xad2   : > { %v1658_v20 = vmul.f32 0.03125, %v1656_v19 }
 0xad3   : > { %v1653_v23 = vpop.xlane.xlu0 %1652 }
 0xad4   : > { %v1660_v0 = vsub.f32 %v5155_v14, %v1658_v20  ;;  %v1657_v24 = vmul.f32 0.03125, %v1653_v23 }
 0xad6   : > { %v1659_v25 = vsub.f32 %v5158_v16, %v1657_v24  ;;  %v1662_v26 = vmul.f32 %v1660_v0, %v1660_v0 }
 0xad8   : > { %v1666_v2 = vsel %vm677_vm0, %v1662_v26, 0.0  ;;  %v1661_v27 = vmul.f32 %v1659_v25, %v1659_v25 }
 0xad9   : > { %1667 = vadd.xlane.f32.xlu1 %v1666_v2 }
 0xada   : > { %v1663_v28 = vsel %vm677_vm0, %v1661_v27, 0.0 }
 0xadb   : > { %1664 = vadd.xlane.f32.xlu0 %v1663_v28 }
 0xb62   : > { %v1668_v33 = vpop.xlane.xlu1 %1667 }
 0xb63   : > { %v1670_v34 = vmul.f32 0.03125, %v1668_v33 }
 0xb64   : > { %v1665_v35 = vpop.xlane.xlu0 %1664 }
 0xb65   : > { %v1672_v36 = vadd.f32 1e-05, %v1670_v34  ;;  %v1669_v37 = vmul.f32 0.03125, %v1665_v35 }
 0xb67   : > { %4779 = vrsqrt.f32 %v1672_v36  ;;  %v1671_v38 = vadd.f32 1e-05, %v1669_v37 }
 0xb69   : > { %4781 = vrsqrt.f32 %v1671_v38 }
 0xb74   : > { %v4780_v39 = vpop.eup %4779 }
 0xb75   : > { %v1676_v41 = vmul.f32 %v4780_v39, %v1660_v0 }
 0xb76   : > { %v4782_v42 = vpop.eup %4781 }
 0xb77   : > { %v1675_v43 = vmul.f32 %v4782_v42, %v1659_v25  ;;  %v1684_v44 = vmul.f32 %v4025_v40, %v1676_v41 }
 0xb79   : > { %v1683_v46 = vmul.f32 %v4025_v40, %v1675_v43  ;;  %v1692_v48 = vadd.f32 %v4026_v45, %v1684_v44  ;;  %v4045_v44 = vld [vmem:[%s5711_s8 + $0x38] sm:$0xff] }
 0xb7b   : > { %v1691_v47 = vadd.f32 %v4026_v45, %v1683_v46 }
 0xb7d   : > { %4463 = vmatprep.mubr.msk.f32.mxu0 %vm677_vm0, %v1691_v47 }
 0xb7e   : > { %4464 = vmatmul.mubr.msk.f32.vlgmr.msra.gmra.mxu0 %vm677_vm0, %v1692_v48 }
 0xc3e   : > { %v4465_v50 = vpop.f32.mrf.mxu0 }
 0xc3f   : > { %v5191_v51 = vadd.f32 %v4465_v50, %v4032_v49 }
 0xc40   : > { %v1778_v52 = vpop.f32.mrf.mxu0 }
 0xc41   : > { %v5193_v53 = vadd.f32 %v4032_v49, %v1778_v52  ;;  %1793 = vrot.lane.b32.xlu0 %v5191_v51, %s4821_s30  ;;  %v4044_v49 = vld [vmem:[%s5711_s8 + $0x30] sm:$0xff]  ;;  %v4048_v52 = vld [vmem:[%s5712_s9 + $0x1] ss:$0 sm:$0xff] }
 0xc43   : > { %1791 = vrot.lane.b32.xlu1 %v5193_v53, %s4821_s30  ;;  %4470 = vmatprep.mubr.msk.f32.mxu0 %vm820_vm1, %v5193_v53  ;;  %s5743_s30 = smov 80  }
 0xcb3   : > { %v1794_v54 = vpop.permute.xlu0 %1793 }
 0xcb4   : > { %4466 = vmatprep.subr.msk.mxu0 %vm820_vm1, %v1794_v54 }
 0xcb5   : > { %4467 = vmatpush3.xpose.msk.msra.mxu0 %vm820_vm1, %v1794_v54  ;;  %v1792_v55 = vpop.permute.xlu1 %1791 }
 0xcb6   : > { %4468 = vmatprep.subr.msk.mxu0 %vm820_vm1, %v1792_v55 }
 0xcb9   : > { %4469 = vmatpush3.xpose.msk.msra.mxu0 %vm820_vm1, %v1792_v55 }
 0xcbc   : > { %4471 = vmatmul.mubr.msk.f32.vlgmr.msra.gmra.mxu0 %vm820_vm1, %v5191_v51 }
 0xd7c   : > { %v4472_v56 = vpop.f32.mrf.mxu0 }
 0xd7d   : > { %v1881_v57 = vsel %vm820_vm1, %v4472_v56, -inf }
 0xd7e   : > { %1882 = vmax.xlane.f32.xlu0 %v1881_v57  ;;  %v1869_v58 = vpop.f32.mrf.mxu0 }
 0xd7f   : > { %v1878_v59 = vsel %vm820_vm1, %v1869_v58, -inf }
 0xd80   : > { %1879 = vmax.xlane.f32.xlu1 %v1878_v59 }
 0xe07   : > { %v1883_v60 = vpop.xlane.xlu0 %1882 }
 0xe08   : > { %v1885_v61 = vsub.f32 %v4472_v56, %v1883_v60 }
 0xe09   : > { %v1880_v62 = vpop.xlane.xlu1 %1879 }
 0xe0a   : > { %v1888_v63 = vmul.f32 1.442695, %v1885_v61  ;;  %v1884_v1 = vsub.f32 %v1869_v58, %v1880_v62 }
 0xe0c   : > { %4783 = vpow2.f32 %v1888_v63  ;;  %v1886_v3 = vmul.f32 1.442695, %v1884_v1 }
 0xe0e   : > { %4785 = vpow2.f32 %v1886_v3 }
 0xe19   : > { %v4784_v4 = vpop.eup %4783 }
 0xe1a   : > { %v1893_v5 = vsel %vm820_vm1, %v4784_v4, 0.0 }
 0xe1b   : > { %v4786_v6 = vpop.eup %4785  ;;  %1894 = vadd.xlane.f32.xlu1 %v1893_v5 }
 0xe1c   : > { %v1890_v7 = vsel %vm820_vm1, %v4786_v6, 0.0 }
 0xe1d   : > { %1891 = vadd.xlane.f32.xlu0 %v1890_v7 }
 0xe2c   : > { %1900 = vrot.lane.b32.xlu1 %v5193_v53, %s4824_s23 }
 0xe30   : > { %2087 = vrot.lane.b32.xlu1 %v5191_v51, %s5743_s30 }
 0xe33   : > { %1902 = vrot.lane.b32.xlu0 %v5191_v51, %s4824_s23 }
 0xe34   : > { %2081 = vrot.lane.b32.xlu1 %v5193_v53, %s5744_s26 }
 0xe37   : > { %2085 = vrot.lane.b32.xlu0 %v5193_v53, %s5743_s30 }
 0xe3b   : > { %2083 = vrot.lane.b32.xlu0 %v5191_v51, %s5744_s26 }
 0xea4   : > { %v1895_v8 = vpop.xlane.xlu1 %1894 }
 0xea5   : > { %4787 = vrcp.f32 %v1895_v8 }
 0xea6   : > { %v1892_v9 = vpop.xlane.xlu0 %1891 }
 0xea7   : > { %4789 = vrcp.f32 %v1892_v9  ;;  %v4064_v9 = vld [vmem:[%s5715_s12 + $0x38] sm:$0xff] }
 0xea8   : > { %v1901_v10 = vpop.permute.xlu1 %1900 }
 0xeaa   : > { %v1903_v21 = vpop.permute.xlu0 %1902 }
 0xeab   : > { %4473 = vmatprep.subr.mxu0 %v1903_v21 }
 0xeac   : > { %4474 = vmatpush3.msra.mxu0 %v1903_v21  ;;  %v2088_v18 = vpop.permute.xlu1 %2087  ;;  %v4063_v21 = vld [vmem:[%s5715_s12 + $0x30] sm:$0xff] }
 0xead   : > { %4475 = vmatprep.subr.mxu0 %v1901_v10 }
 0xeae   : > { %4476 = vmatpush3.msra.mxu0 %v1901_v10  ;;  %v2086_v0 = vpop.permute.xlu0 %2085  ;;  %v4062_v10 = vld [vmem:[%s5715_s12 + $0x28] sm:$0xff] }
 0xeaf   : > { %4480 = vmatprep.subr.mxu0 %v4043_v22 }
 0xeb0   : > { %v2082_v23 = vpop.permute.xlu1 %2081 }
 0xeb2   : > { %v4788_v11 = vpop.eup %4787  ;;  %v2084_v24 = vpop.permute.xlu0 %2083 }
 0xeb3   : > { %v1899_v15 = vmul.f32 %v4788_v11, %v4784_v4 }
 0xeb4   : > { %v4790_v12 = vpop.eup %4789 }
 0xeb5   : > { %v1898_v13 = vmul.f32 %v4790_v12, %v4786_v6 }
 0xeb7   : > { %4477 = vmatprep.mubr.msk.f32.mxu0 %vm820_vm1, %v1898_v13 }
 0xeb8   : > { %4478 = vmatmul.mubr.msk.f32.vlgmr.msra.gmra.mxu0 %vm820_vm1, %v1899_v15 }
 0xeb9   : > { %4481 = vmatpush3.msra.mxu0 %v4043_v22  ;;  %v4061_v22 = vld [vmem:[%s5715_s12 + $0x20] sm:$0xff] }
 0xeba   : > { %4482 = vmatprep.subr.mxu0 %v4042_v17 }
 0xebb   : > { %4483 = vmatpush3.msra.mxu0 %v4042_v17 }
 0xebc   : > { %4487 = vmatprep.subr.msk.mxu0 %vm820_vm1, %v2088_v18 }
 0xf78   : > { %v4479_v19 = vpop.f32.mrf.mxu0 }
 0xf7a   : > { %v1978_v20 = vpop.f32.mrf.mxu0 }
 0xf7b   : > { %4484 = vmatprep.mubr.msk.f32.mxu0 %vm820_vm1, %v1978_v20  ;;  %v4059_v20 = vld [vmem:[%s5713_s10 + $0x1] ss:$0 sm:$0xff] }
 0xf7c   : > { %4485 = vmatmul.mubr.msk.f32.vlgmr.msra.gmra.mxu0 %vm820_vm1, %v4479_v19 }
 0xf7d   : > { %4488 = vmatpush3.xpose.msk.msra.mxu0 %vm820_vm1, %v2088_v18  ;;  %4491 = vmatprep.mubr.msk.f32.mxu0 %vm820_vm1, %v2082_v23 }
 0xf7e   : > { %4489 = vmatprep.subr.msk.mxu0 %vm820_vm1, %v2086_v0 }
 0xf81   : > { %4490 = vmatpush3.xpose.msk.msra.mxu0 %vm820_vm1, %v2086_v0 }
 0xf82   : > { %4508 = vmatprep.subr.mxu0 %v4064_v9 }
 0xf84   : > { %4492 = vmatmul.mubr.msk.f32.vlgmr.msra.gmra.mxu0 %vm820_vm1, %v2084_v24 }
 0xf85   : > { %4509 = vmatpush3.msra.mxu0 %v4064_v9 }
 0xf86   : > { %4510 = vmatprep.subr.mxu0 %v4063_v21 }
 0xf87   : > { %4511 = vmatpush3.msra.mxu0 %v4063_v21 }
 0xf88   : > { %4512 = vmatprep.subr.mxu0 %v4062_v10 }
 0xf89   : > { %4513 = vmatpush3.msra.mxu0 %v4062_v10 }
 0xf8a   : > { %4514 = vmatprep.subr.mxu0 %v4061_v22 }
 0xf8b   : > { %4515 = vmatpush3.msra.mxu0 %v4061_v22 }
0x103c   : > { %v4486_v25 = vpop.f32.mrf.mxu0 }
0x103e   : > { %v2064_v26 = vpop.f32.mrf.mxu0 }
0x103f   : > { %v2079_v55 = vadd.f32 %v4048_v52, %v2064_v26  ;;  %v4060_v26 = vld [vmem:[%s5714_s11 + $0x1] ss:$0 sm:$0xff] }
0x1044   : > { %v4493_v2 = vpop.f32.mrf.mxu0 }
0x1045   : > { %v2175_v27 = vsel %vm820_vm1, %v4493_v2, -inf }
0x1046   : > { %2176 = vmax.xlane.f32.xlu0 %v2175_v27  ;;  %v2163_v28 = vpop.f32.mrf.mxu0 }
0x1047   : > { %v2172_v29 = vsel %vm820_vm1, %v2163_v28, -inf }
0x1048   : > { %2173 = vmax.xlane.f32.xlu1 %v2172_v29  ;;  %v4084_v29 = vld [vmem:[%s5717_s14 + $0xf8] sm:$0xff] }
0x10cf   : > { %v2177_v30 = vpop.xlane.xlu0 %2176 }
0x10d0   : > { %v2179_v31 = vsub.f32 %v4493_v2, %v2177_v30  ;;  %v4083_v30 = vld [vmem:[%s5717_s14 + $0xf0] sm:$0xff] }
0x10d1   : > { %v2174_v32 = vpop.xlane.xlu1 %2173 }
0x10d2   : > { %v2182_v33 = vmul.f32 1.442695, %v2179_v31  ;;  %v2178_v34 = vsub.f32 %v2163_v28, %v2174_v32  ;;  %v4082_v31 = vld [vmem:[%s5717_s14 + $0xe8] sm:$0xff]  ;;  %v4081_v32 = vld [vmem:[%s5717_s14 + $0xe0] sm:$0xff] }
0x10d4   : > { %4791 = vpow2.f32 %v2182_v33  ;;  %v2180_v35 = vmul.f32 1.442695, %v2178_v34  ;;  %v4080_v33 = vld [vmem:[%s5717_s14 + $0xd8] sm:$0xff]  ;;  %v4079_v34 = vld [vmem:[%s5717_s14 + $0xd0] sm:$0xff] }
0x10d6   : > { %4793 = vpow2.f32 %v2180_v35  ;;  %v4078_v35 = vld [vmem:[%s5717_s14 + $0xc8] sm:$0xff] }
0x10e1   : > { %v4792_v36 = vpop.eup %4791 }
0x10e2   : > { %v2187_v37 = vsel %vm820_vm1, %v4792_v36, 0.0 }
0x10e3   : > { %v4794_v38 = vpop.eup %4793  ;;  %2188 = vadd.xlane.f32.xlu1 %v2187_v37  ;;  %v4076_v37 = vld [vmem:[%s5717_s14 + $0xb8] sm:$0xff] }
0x10e4   : > { %v2184_v39 = vsel %vm820_vm1, %v4794_v38, 0.0 }
0x10e5   : > { %2185 = vadd.xlane.f32.xlu0 %v2184_v39  ;;  %v4074_v39 = vld [vmem:[%s5717_s14 + $0xa8] sm:$0xff] }
0x10f4   : > { %2194 = vrot.lane.b32.xlu1 %v5193_v53, %s5745_s0  ;;  %v2080_v53 = vadd.f32 %v4486_v25, %v4048_v52 }
0x10fb   : > { %2196 = vrot.lane.b32.xlu0 %v5191_v51, %s5745_s0 }
0x116c   : > { %v2189_v40 = vpop.xlane.xlu1 %2188 }
0x116d   : > { %4795 = vrcp.f32 %v2189_v40  ;;  %v4073_v40 = vld [vmem:[%s5717_s14 + $0xa0] sm:$0xff] }
0x116e   : > { %v2186_v41 = vpop.xlane.xlu0 %2185 }
0x116f   : > { %4797 = vrcp.f32 %v2186_v41  ;;  %v4072_v41 = vld [vmem:[%s5717_s14 + $0x98] sm:$0xff] }
0x1170   : > { %v2195_v43 = vpop.permute.xlu1 %2194 }
0x1172   : > { %v2197_v42 = vpop.permute.xlu0 %2196 }
0x1173   : > { %4494 = vmatprep.subr.mxu1 %v2197_v42 }
0x1174   : > { %4495 = vmatpush3.msra.mxu1 %v2197_v42  ;;  %v4071_v42 = vld [vmem:[%s5717_s14 + $0x90] sm:$0xff] }
0x1175   : > { %4496 = vmatprep.subr.mxu1 %v2195_v43 }
0x1176   : > { %4497 = vmatpush3.msra.mxu1 %v2195_v43  ;;  %v4070_v43 = vld [vmem:[%s5717_s14 + $0x88] sm:$0xff] }
0x1177   : > { %4501 = vmatprep.subr.mxu1 %v4045_v44 }
0x117a   : > { %v4796_v45 = vpop.eup %4795 }
0x117b   : > { %v2193_v48 = vmul.f32 %v4796_v45, %v4792_v36  ;;  %v4077_v36 = vld [vmem:[%s5717_s14 + $0xc0] sm:$0xff] }
0x117c   : > { %v4798_v46 = vpop.eup %4797  ;;  %v4066_v45 = vld [vmem:[%s5716_s13 + $0x1] ss:$0 sm:$0xff] }
0x117d   : > { %v2192_v47 = vmul.f32 %v4798_v46, %v4794_v38  ;;  %v4075_v38 = vld [vmem:[%s5717_s14 + $0xb0] sm:$0xff] }
0x117f   : > { %4498 = vmatprep.mubr.msk.f32.mxu1 %vm820_vm1, %v2192_v47 }
0x1180   : > { %4499 = vmatmul.mubr.msk.f32.vlgmr.msra.gmra.mxu1 %vm820_vm1, %v2193_v48 }
0x1181   : > { %4502 = vmatpush3.msra.mxu1 %v4045_v44  ;;  %v4069_v44 = vld [vmem:[%s5717_s14 + $0x80] sm:$0xff] }
0x1182   : > { %4503 = vmatprep.subr.mxu1 %v4044_v49 }
0x1183   : > { %4504 = vmatpush3.msra.mxu1 %v4044_v49 }
0x1184   : > { %4519 = vmatprep.subr.mxu1 %v4084_v29 }
0x1240   : > { %v4500_v50 = vpop.f32.mrf.mxu1 }
0x1242   : > { %v2272_v51 = vpop.f32.mrf.mxu1 }
0x1243   : > { %4505 = vmatprep.mubr.msk.f32.mxu1 %vm820_vm1, %v2272_v51 }
0x1244   : > { %4506 = vmatmul.mubr.msk.f32.vlgmr.msra.gmra.mxu1 %vm820_vm1, %v4500_v50 }
0x1245   : > { %4520 = vmatpush3.msra.mxu1 %v4084_v29  ;;  %v2673_v29 = vld [vmem:[%s5721_s18] sm:$0xff] }
0x1246   : > { %4521 = vmatprep.subr.mxu1 %v4083_v30 }
0x1247   : > { %4522 = vmatpush3.msra.mxu1 %v4083_v30  ;;  %v4106_v30 = vld [vmem:[%s5721_s18 + $0x88] sm:$0xff] }
0x1248   : > { %4523 = vmatprep.subr.mxu1 %v4082_v31 }
0x1249   : > { %4524 = vmatpush3.msra.mxu1 %v4082_v31  ;;  %v4105_v31 = vld [vmem:[%s5721_s18 + $0x80] sm:$0xff] }
0x124a   : > { %4525 = vmatprep.subr.mxu1 %v4081_v32 }
0x124b   : > { %4526 = vmatpush3.msra.mxu1 %v4081_v32 }
0x124c   : > { %4527 = vmatprep.subr.mxu1 %v4080_v33 }
0x124d   : > { %4528 = vmatpush3.msra.mxu1 %v4080_v33 }
0x124e   : > { %4529 = vmatprep.subr.mxu1 %v4079_v34 }
0x124f   : > { %4530 = vmatpush3.msra.mxu1 %v4079_v34 }
0x1250   : > { %4531 = vmatprep.subr.mxu1 %v4078_v35 }
0x1251   : > { %4532 = vmatpush3.msra.mxu1 %v4078_v35 }
0x1252   : > { %4533 = vmatprep.subr.mxu1 %v4077_v36 }
0x1253   : > { %4534 = vmatpush3.msra.mxu1 %v4077_v36 }
0x1254   : > { %4535 = vmatprep.subr.mxu1 %v4076_v37 }
0x1255   : > { %4536 = vmatpush3.msra.mxu1 %v4076_v37 }
0x1256   : > { %4537 = vmatprep.subr.mxu1 %v4075_v38 }
0x1257   : > { %4538 = vmatpush3.msra.mxu1 %v4075_v38 }
0x1258   : > { %4539 = vmatprep.subr.mxu1 %v4074_v39 }
0x1259   : > { %4540 = vmatpush3.msra.mxu1 %v4074_v39 }
0x125a   : > { %4541 = vmatprep.subr.mxu1 %v4073_v40 }
0x125b   : > { %4542 = vmatpush3.msra.mxu1 %v4073_v40  ;;  %v4087_v40 = vld [vmem:[%s5719_s16] ss:$0 sm:$0xff] }
0x125c   : > { %4543 = vmatprep.subr.mxu1 %v4072_v41 }
0x125d   : > { %4544 = vmatpush3.msra.mxu1 %v4072_v41 }
0x125e   : > { %4545 = vmatprep.subr.mxu1 %v4071_v42 }
0x125f   : > { %4546 = vmatpush3.msra.mxu1 %v4071_v42  ;;  %v5402_v42 = vld [vmem:[%s5720_s17] ss:$0 sm:$0xff] }
0x1260   : > { %4547 = vmatprep.subr.mxu1 %v4070_v43 }
0x1261   : > { %4548 = vmatpush3.msra.mxu1 %v4070_v43 }
0x1262   : > { %4549 = vmatprep.subr.mxu1 %v4069_v44 }
0x1263   : > { %4550 = vmatpush3.msra.mxu1 %v4069_v44  ;;  %v4093_v44 = vld [vmem:[%s5721_s18 + $0x38] sm:$0xff] }
0x1304   : > { %v4507_v54 = vpop.f32.mrf.mxu1 }
0x1305   : > { %v2363_v56 = vadd.f32 %v4507_v54, %v2080_v53 }
0x1306   : > { %v2353_v57 = vpop.f32.mrf.mxu1 }
0x1307   : > { %v5261_v58 = vadd.f32 %v2363_v56, %v5155_v14  ;;  %v2362_v59 = vadd.f32 %v2353_v57, %v2079_v55 }
0x1309   : > { %v5264_v60 = vadd.f32 %v2362_v59, %v5158_v16  ;;  %v2373_v61 = vsel %vm677_vm0, %v5261_v58, 0.0 }
0x130a   : > { %2374 = vadd.xlane.f32.xlu0 %v2373_v61 }
0x130b   : > { %v2370_v62 = vsel %vm677_vm0, %v5264_v60, 0.0 }
0x130c   : > { %2371 = vadd.xlane.f32.xlu1 %v2370_v62 }
0x1393   : > { %v2375_v63 = vpop.xlane.xlu0 %2374 }
0x1394   : > { %v2377_v1 = vmul.f32 0.03125, %v2375_v63 }
0x1395   : > { %v2372_v3 = vpop.xlane.xlu1 %2371 }
0x1396   : > { %v2379_v4 = vsub.f32 %v5261_v58, %v2377_v1  ;;  %v2376_v5 = vmul.f32 0.03125, %v2372_v3 }
0x1398   : > { %v2378_v14 = vsub.f32 %v5264_v60, %v2376_v5  ;;  %v2381_v6 = vmul.f32 %v2379_v4, %v2379_v4 }
0x139a   : > { %v2385_v16 = vsel %vm677_vm0, %v2381_v6, 0.0  ;;  %v2380_v7 = vmul.f32 %v2378_v14, %v2378_v14 }
0x139b   : > { %2386 = vadd.xlane.f32.xlu1 %v2385_v16 }
0x139c   : > { %v2382_v8 = vsel %vm677_vm0, %v2380_v7, 0.0  ;;  %v4086_v7 = vld [vmem:[%s5718_s15 + $0x1] ss:$0 sm:$0xff] }
0x139d   : > { %2383 = vadd.xlane.f32.xlu0 %v2382_v8 }
0x1424   : > { %v2387_v11 = vpop.xlane.xlu1 %2386 }
0x1425   : > { %v2389_v12 = vmul.f32 0.03125, %v2387_v11 }
0x1426   : > { %v2384_v13 = vpop.xlane.xlu0 %2383 }
0x1427   : > { %v2391_v15 = vadd.f32 1e-05, %v2389_v12  ;;  %v2388_v17 = vmul.f32 0.03125, %v2384_v13 }
0x1429   : > { %4799 = vrsqrt.f32 %v2391_v15  ;;  %v2390_v18 = vadd.f32 1e-05, %v2388_v17 }
0x142b   : > { %4801 = vrsqrt.f32 %v2390_v18 }
0x1436   : > { %v4800_v19 = vpop.eup %4799 }
0x1437   : > { %v2395_v23 = vmul.f32 %v4800_v19, %v2379_v4 }
0x1438   : > { %v4802_v0 = vpop.eup %4801 }
0x1439   : > { %v2394_v24 = vmul.f32 %v4802_v0, %v2378_v14  ;;  %v2403_v25 = vmul.f32 %v4059_v20, %v2395_v23 }
0x143b   : > { %v2402_v2 = vmul.f32 %v4059_v20, %v2394_v24  ;;  %v2411_v28 = vadd.f32 %v4060_v26, %v2403_v25  ;;  %v4826_v24 = vmov 0.0   ;;  %v2676_v25 = vld [vmem:[%s5721_s18 + $0x18] sm:$0xff] }
0x143c   : > { %4554 = vmatprep.subr.mxu0 %v4826_v24  ;;  %4598 = vmatprep.subr.mxu1 %v4826_v24 }
0x143d   : > { %v2410_v27 = vadd.f32 %v4060_v26, %v2402_v2  ;;  %v2675_v26 = vld [vmem:[%s5721_s18 + $0x10] sm:$0xff]  ;;  %v4108_v2 = vld [vmem:[%s5721_s18 + $0x98] sm:$0xff] }
0x143f   : > { %4516 = vmatprep.mubr.msk.f32.mxu0 %vm677_vm0, %v2410_v27  ;;  %v2674_v27 = vld [vmem:[%s5721_s18 + $0x8] sm:$0xff] }
0x1440   : > { %4517 = vmatmul.mubr.msk.f32.vlgmr.msra.gmra.mxu0 %vm677_vm0, %v2411_v28  ;;  %v4107_v28 = vld [vmem:[%s5721_s18 + $0x90] sm:$0xff] }
0x1441   : > { %4555 = vmatpush3.msra.mxu0 %v2676_v25  ;;  %4562 = vmatprep.mubr.msk.f32.mxu0 %vm4827_vm2, %v4826_v24  ;;  %v4145_v25 = vld [vmem:[%s5721_s18 + $0x180] sm:$0xff] }
0x1442   : > { %4556 = vmatprep.subr.mxu0 %v4826_v24 }
0x1443   : > { %4557 = vmatpush3.msra.mxu0 %v2675_v26 }
0x1444   : > { %4558 = vmatprep.subr.mxu0 %v4826_v24 }
0x1445   : > { %4559 = vmatpush3.msra.mxu0 %v2674_v27  ;;  %v4158_v27 = vld [vmem:[%s5721_s18 + $0x1d8] sm:$0xff] }
0x1446   : > { %4560 = vmatprep.subr.mxu0 %v4826_v24 }
0x1447   : > { %4561 = vmatpush3.msra.mxu0 %v2673_v29  ;;  %v4157_v29 = vld [vmem:[%s5721_s18 + $0x1d0] sm:$0xff] }
0x1448   : > { %4565 = vmatprep.subr.mxu0 %v4826_v24 }
0x1500   : > { %v4518_v46 = vpop.f32.mrf.mxu0 }
0x1501   : > { %v2503_v47 = vadd.f32 %v4518_v46, %v4066_v45 }
0x1502   : > { %v2497_v48 = vpop.f32.mrf.mxu0 }
0x1503   : > { %v2507_v49 = vmul.f32 %v2503_v47, %v2503_v47  ;;  %v2498_v50 = vadd.f32 %v4066_v45, %v2497_v48  ;;  %v4092_v45 = vld [vmem:[%s5721_s18 + $0x30] sm:$0xff]  ;;  %v4091_v48 = vld [vmem:[%s5721_s18 + $0x28] sm:$0xff] }
0x1505   : > { %v2509_v51 = vmul.f32 %v2507_v49, %v2503_v47  ;;  %v2506_v52 = vmul.f32 %v2498_v50, %v2498_v50  ;;  %v4117_v49 = vld [vmem:[%s5721_s18 + $0xd0] sm:$0xff] }
0x1507   : > { %v2511_v53 = vmul.f32 0.044715, %v2509_v51  ;;  %v2508_v54 = vmul.f32 %v2506_v52, %v2498_v50  ;;  %v4116_v51 = vld [vmem:[%s5721_s18 + $0xc8] sm:$0xff] }
0x1509   : > { %v2513_v55 = vadd.f32 %v2511_v53, %v2503_v47  ;;  %v2510_v56 = vmul.f32 0.044715, %v2508_v54  ;;  %v4098_v53 = vld [vmem:[%s5721_s18 + $0x58] sm:$0xff]  ;;  %v4115_v54 = vld [vmem:[%s5721_s18 + $0xc0] sm:$0xff] }
0x150b   : > { %v2515_v57 = vmul.f32 0.7978846, %v2513_v55  ;;  %v2512_v59 = vadd.f32 %v2510_v56, %v2498_v50 }
0x150d   : > { %4803 = vtanh.f32 %v2515_v57  ;;  %v2514_v61 = vmul.f32 0.7978846, %v2512_v59  ;;  %v4097_v57 = vld [vmem:[%s5721_s18 + $0x50] sm:$0xff]  ;;  %v4128_v59 = vld [vmem:[%s5721_s18 + $0x118] sm:$0xff] }
0x150f   : > { %4805 = vtanh.f32 %v2514_v61 }
0x151a   : > { %v4804_v62 = vpop.eup %4803 }
0x151b   : > { %v2519_v63 = vadd.f32 1.0, %v4804_v62  ;;  %v4096_v62 = vld [vmem:[%s5721_s18 + $0x48] sm:$0xff] }
0x151c   : > { %v4806_v1 = vpop.eup %4805 }
0x151d   : > { %v2518_v3 = vadd.f32 1.0, %v4806_v1  ;;  %v2521_v4 = vmul.f32 0.5, %v2519_v63  ;;  %v4127_v63 = vld [vmem:[%s5721_s18 + $0x110] sm:$0xff]  ;;  %v4095_v1 = vld [vmem:[%s5721_s18 + $0x40] sm:$0xff] }
0x151f   : > { %v2520_v5 = vmul.f32 0.5, %v2518_v3  ;;  %v2523_v6 = vmul.f32 %v2521_v4, %v2503_v47  ;;  %v4118_v47 = vld [vmem:[%s5721_s18 + $0xd8] sm:$0xff]  ;;  %v4126_v3 = vld [vmem:[%s5721_s18 + $0x108] sm:$0xff] }
0x1521   : > { %v2522_v14 = vmul.f32 %v2520_v5, %v2498_v50  ;;  %v4090_v50 = vld [vmem:[%s5721_s18 + $0x20] sm:$0xff] }
0x1523   : > { %4551 = vmatprep.mubr.f32.mxu1 %v2522_v14  ;;  %v4103_v14 = vld [vmem:[%s5721_s18 + $0x78] sm:$0xff] }
0x1524   : > { %4552 = vmatmul.mubr.f32.vlgmr.msra.gmra.mxu1 %v2523_v6  ;;  %v4125_v6 = vld [vmem:[%s5721_s18 + $0x100] sm:$0xff] }
0x1525   : > { %4599 = vmatpush3.msra.mxu1 %v4108_v2  ;;  %4606 = vmatprep.mubr.msk.f32.mxu1 %vm4827_vm2, %v4826_v24  ;;  %v4122_v2 = vld [vmem:[%s5721_s18 + $0xf0] sm:$0xff] }
0x1526   : > { %4600 = vmatprep.subr.mxu1 %v4826_v24 }
0x1527   : > { %4601 = vmatpush3.msra.mxu1 %v4107_v28  ;;  %v4121_v28 = vld [vmem:[%s5721_s18 + $0xe8] sm:$0xff] }
0x1528   : > { %4602 = vmatprep.subr.mxu1 %v4826_v24 }
0x1529   : > { %4603 = vmatpush3.msra.mxu1 %v4106_v30  ;;  %v4120_v30 = vld [vmem:[%s5721_s18 + $0xe0] sm:$0xff] }
0x152a   : > { %4604 = vmatprep.subr.mxu1 %v4826_v24 }
0x152b   : > { %4605 = vmatpush3.msra.mxu1 %v4105_v31  ;;  %v4156_v31 = vld [vmem:[%s5721_s18 + $0x1c8] sm:$0xff] }
0x152c   : > { %4620 = vmatprep.subr.mxu1 %v4826_v24 }
0x15e4   : > { %v4553_v16 = vpop.f32.mrf.mxu1 }
0x15e5   : > { %v2617_v8 = vadd.f32 %v4553_v16, %v5261_v58 }
0x15e6   : > { %v2607_v9 = vpop.f32.mrf.mxu1 }
0x15e7   : > { %v2616_v21 = vadd.f32 %v2607_v9, %v5264_v60  ;;  %v2627_v10 = vadd.f32 %v4086_v7, %v2617_v8  ;;  %v4138_v8 = vld [vmem:[%s5721_s18 + $0x158] sm:$0xff]  ;;  %v4101_v9 = vld [vmem:[%s5721_s18 + $0x68] sm:$0xff] }
0x15e9   : > { %v2633_v22 = vsel %vm677_vm0, %v2627_v10, 0.0  ;;  %v2626_v11 = vadd.f32 %v4086_v7, %v2616_v21  ;;  %v4102_v7 = vld [vmem:[%s5721_s18 + $0x70] sm:$0xff] }
0x15ea   : > { %2634 = vadd.xlane.f32.xlu1 %v2633_v22  ;;  %v4137_v21 = vld [vmem:[%s5721_s18 + $0x150] sm:$0xff]  ;;  %v4136_v22 = vld [vmem:[%s5721_s18 + $0x148] sm:$0xff] }
0x15eb   : > { %v2630_v12 = vsel %vm677_vm0, %v2626_v11, 0.0 }
0x15ec   : > { %2631 = vadd.xlane.f32.xlu0 %v2630_v12  ;;  %v4113_v12 = vld [vmem:[%s5721_s18 + $0xb8] sm:$0xff] }
0x1673   : > { %v2635_v13 = vpop.xlane.xlu1 %2634 }
0x1674   : > { %v2637_v15 = vmul.f32 0.03125, %v2635_v13  ;;  %v4135_v13 = vld [vmem:[%s5721_s18 + $0x140] sm:$0xff] }
0x1675   : > { %v2632_v17 = vpop.xlane.xlu0 %2631 }
0x1676   : > { %v5352_v18 = vsub.f32 %v2627_v10, %v2637_v15  ;;  %v2636_v19 = vmul.f32 0.03125, %v2632_v17  ;;  %v4100_v10 = vld [vmem:[%s5721_s18 + $0x60] sm:$0xff]  ;;  %v4112_v17 = vld [vmem:[%s5721_s18 + $0xb0] sm:$0xff] }
0x1678   : > { %v2638_v20 = vsub.f32 %v2626_v11, %v2636_v19  ;;  %v2641_v58 = vmul.f32 %v5352_v18, %v5352_v18  ;;  %v4111_v19 = vld [vmem:[%s5721_s18 + $0xa8] sm:$0xff] }
0x167a   : > { %v2645_v60 = vsel %vm677_vm0, %v2641_v58, 0.0  ;;  %v2640_v23 = vmul.f32 %v2638_v20, %v2638_v20  ;;  %v4110_v58 = vld [vmem:[%s5721_s18 + $0xa0] sm:$0xff] }
0x167b   : > { %2646 = vadd.xlane.f32.xlu1 %v2645_v60  ;;  %v4146_v60 = vld [vmem:[%s5721_s18 + $0x188] sm:$0xff] }
0x167c   : > { %v2642_v0 = vsel %vm677_vm0, %v2640_v23, 0.0 }
0x167d   : > { %2643 = vadd.xlane.f32.xlu0 %v2642_v0  ;;  %v4123_v0 = vld [vmem:[%s5721_s18 + $0xf8] sm:$0xff] }
0x1704   : > { %v2647_v35 = vpop.xlane.xlu1 %2646 }
0x1705   : > { %v2649_v36 = vmul.f32 0.03125, %v2647_v35 }
0x1706   : > { %v2644_v32 = vpop.xlane.xlu0 %2643 }
0x1707   : > { %v2648_v33 = vmul.f32 0.03125, %v2644_v32  ;;  %v2651_v37 = vadd.f32 1e-05, %v2649_v36  ;;  %v4132_v36 = vld [vmem:[%s5721_s18 + $0x130] sm:$0xff] }
0x1709   : > { %v2650_v34 = vadd.f32 1e-05, %v2648_v33  ;;  %v4133_v33 = vld [vmem:[%s5721_s18 + $0x138] sm:$0xff] }
0x170b   : > { %4807 = vrsqrt.f32 %v2650_v34  ;;  %v4155_v34 = vld [vmem:[%s5721_s18 + $0x1c0] sm:$0xff] }
0x170c   : > { %4809 = vrsqrt.f32 %v2651_v37  ;;  %v4131_v37 = vld [vmem:[%s5721_s18 + $0x128] sm:$0xff] }
0x1718   : > { %v4808_v38 = vpop.eup %4807 }
0x1719   : > { %v2654_v39 = vmul.f32 %v4808_v38, %v2638_v20  ;;  %v4810_v55 = vpop.eup %4809  ;;  %v4147_v20 = vld [vmem:[%s5721_s18 + $0x190] sm:$0xff]  ;;  %v4130_v38 = vld [vmem:[%s5721_s18 + $0x120] sm:$0xff] }
0x171a   : > { %v2655_v61 = vmul.f32 %v4810_v55, %v5352_v18  ;;  %v4148_v18 = vld [vmem:[%s5721_s18 + $0x198] sm:$0xff] }
0x171b   : > { %v2662_v41 = vmul.f32 %v4087_v40, %v2654_v39 }
0x171c   : > { %v2663_v4 = vmul.f32 %v4087_v40, %v2655_v61  ;;  %v4143_v40 = vld [vmem:[%s5721_s18 + $0x178] sm:$0xff] }
0x171d   : > { %v5405_v43 = vadd.f32 %v5402_v42, %v2662_v41  ;;  %v4142_v41 = vld [vmem:[%s5721_s18 + $0x170] sm:$0xff] }
0x171e   : > { %v5490_v16 = vadd.f32 %v5402_v42, %v2663_v4  ;;  %v4141_v42 = vld [vmem:[%s5721_s18 + $0x168] sm:$0xff] }
0x171f   : > { %4563 = vmatmul.mubr.msk.f32.vlgmr.msra.gmra.mxu0 %vm677_vm0, %v5405_v43  ;;  %v2993_v46 = vrot.slane %v5405_v43, 4  ;;  %v2756_v52 = vrot.slane %v5405_v43, 1  ;;  %v3151_v56 = vrot.slane %v5405_v43, 6  ;;  %v2835_v5 = vrot.slane %v5405_v43, 2 }
0x1720   : > { %4566 = vmatpush3.msra.mxu0 %v4093_v44  ;;  %4573 = vmatprep.mubr.msk.f32.mxu0 %vm4827_vm2, %v4826_v24  ;;  %v2914_v11 = vrot.slane %v5405_v43, 3  ;;  %v3467_v15 = vrot.slane %v5490_v16, 2  ;;  %v3072_v23 = vrot.slane %v5405_v43, 5  ;;  %v3625_v26 = vrot.slane %v5490_v16, 4 }
0x1721   : > { %4567 = vmatprep.subr.mxu0 %v4826_v24  ;;  %4607 = vmatmul.mubr.msk.f32.vlgmr.msra.gmra.mxu1 %vm677_vm0, %v2993_v46  ;;  %v3230_v32 = vrot.slane %v5405_v43, 7  ;;  %v3783_v35 = vrot.slane %v5490_v16, 6  ;;  %v3388_v39 = vrot.slane %v5490_v16, 1  ;;  %v4140_v43 = vld [vmem:[%s5721_s18 + $0x160] sm:$0xff]  ;;  %v3546_v44 = vrot.slane %v5490_v16, 3  ;;  %v4152_v46 = vld [vmem:[%s5721_s18 + $0x1b0] sm:$0xff] }
0x1722   : > { %4568 = vmatpush3.msra.mxu0 %v4092_v45  ;;  %4621 = vmatpush3.msra.mxu1 %v4118_v47  ;;  %v4153_v45 = vld [vmem:[%s5721_s18 + $0x1b8] sm:$0xff]  ;;  %v4151_v47 = vld [vmem:[%s5721_s18 + $0x1a8] sm:$0xff] }
0x1723   : > { %4569 = vmatprep.subr.mxu0 %v4826_v24  ;;  %4622 = vmatprep.subr.mxu1 %v4826_v24 }
0x1724   : > { %4570 = vmatpush3.msra.mxu0 %v4091_v48  ;;  %4623 = vmatpush3.msra.mxu1 %v4117_v49  ;;  %v4150_v48 = vld [vmem:[%s5721_s18 + $0x1a0] sm:$0xff]  ;;  %v3704_v49 = vrot.slane %v5490_v16, 5 }
0x1725   : > { %4571 = vmatprep.subr.mxu0 %v4826_v24  ;;  %4624 = vmatprep.subr.mxu1 %v4826_v24 }
0x1726   : > { %4572 = vmatpush3.msra.mxu0 %v4090_v50  ;;  %4625 = vmatpush3.msra.mxu1 %v4116_v51  ;;  %v4163_v50 = vld [vmem:[%s5721_s18 + $0x1f8] sm:$0xff]  ;;  %v4162_v51 = vld [vmem:[%s5721_s18 + $0x1f0] sm:$0xff] }
0x1727   : > { %4574 = vmatmul.mubr.msk.f32.vlgmr.msra.gmra.mxu0 %vm677_vm0, %v2756_v52  ;;  %4576 = vmatprep.subr.mxu0 %v4826_v24  ;;  %v4161_v52 = vld [vmem:[%s5721_s18 + $0x1e8] sm:$0xff] }
0x1728   : > { %4626 = vmatprep.subr.mxu1 %v4826_v24  ;;  %4577 = vmatpush3.msra.mxu0 %v4098_v53  ;;  %v4160_v53 = vld [vmem:[%s5721_s18 + $0x1e0] sm:$0xff] }
0x1729   : > { %4627 = vmatpush3.msra.mxu1 %v4115_v54  ;;  %4628 = vmatprep.mubr.msk.f32.mxu1 %vm4827_vm2, %v4826_v24  ;;  %v3862_v54 = vrot.slane %v5490_v16, 7 }
0x172a   : > { %4578 = vmatprep.subr.mxu0 %v4826_v24  ;;  %4629 = vmatmul.mubr.msk.f32.vlgmr.msra.gmra.mxu1 %vm677_vm0, %v3151_v56 }
0x172b   : > { %4642 = vmatprep.subr.mxu1 %v4826_v24  ;;  %4579 = vmatpush3.msra.mxu0 %v4097_v57 }
0x172c   : > { %4643 = vmatpush3.msra.mxu1 %v4128_v59  ;;  %4580 = vmatprep.subr.mxu0 %v4826_v24 }
0x172d   : > { %4644 = vmatprep.subr.mxu1 %v4826_v24  ;;  %4581 = vmatpush3.msra.mxu0 %v4096_v62 }
0x172e   : > { %4645 = vmatpush3.msra.mxu1 %v4127_v63  ;;  %4582 = vmatprep.subr.mxu0 %v4826_v24 }
0x172f   : > { %4646 = vmatprep.subr.mxu1 %v4826_v24  ;;  %4583 = vmatpush3.msra.mxu0 %v4095_v1 }
0x1730   : > { %4584 = vmatprep.mubr.msk.f32.mxu0 %vm4827_vm2, %v4826_v24  ;;  %4647 = vmatpush3.msra.mxu1 %v4126_v3 }
0x1731   : > { %4585 = vmatmul.mubr.msk.f32.vlgmr.msra.gmra.mxu0 %vm677_vm0, %v2835_v5  ;;  %4587 = vmatprep.subr.mxu0 %v4826_v24 }
0x1732   : > { %4648 = vmatprep.subr.mxu1 %v4826_v24  ;;  %4588 = vmatpush3.msra.mxu0 %v4103_v14 }
0x1733   : > { %4649 = vmatpush3.msra.mxu1 %v4125_v6  ;;  %4650 = vmatprep.mubr.msk.f32.mxu1 %vm4827_vm2, %v4826_v24 }
0x1734   : > { %4589 = vmatprep.subr.mxu0 %v4826_v24  ;;  %4651 = vmatmul.mubr.msk.f32.vlgmr.msra.gmra.mxu1 %vm677_vm0, %v5490_v16  ;;  %v2672_v16 = vld [vmem:[%s5722_s19] sm:$0x1] }
0x1735   : > { %4664 = vmatprep.subr.mxu1 %v4826_v24  ;;  %4590 = vmatpush3.msra.mxu0 %v4102_v7 }
0x1736   : > { %4665 = vmatpush3.msra.mxu1 %v4138_v8  ;;  %4591 = vmatprep.subr.mxu0 %v4826_v24 }
0x1737   : > { %4666 = vmatprep.subr.mxu1 %v4826_v24  ;;  %4592 = vmatpush3.msra.mxu0 %v4101_v9 }
0x1738   : > { %4667 = vmatpush3.msra.mxu1 %v4137_v21  ;;  %4593 = vmatprep.subr.mxu0 %v4826_v24 }
0x1739   : > { %4668 = vmatprep.subr.mxu1 %v4826_v24  ;;  %4594 = vmatpush3.msra.mxu0 %v4100_v10 }
0x173a   : > { %4595 = vmatprep.mubr.msk.f32.mxu0 %vm4827_vm2, %v4826_v24  ;;  %4669 = vmatpush3.msra.mxu1 %v4136_v22 }
0x173b   : > { %4596 = vmatmul.mubr.msk.f32.vlgmr.msra.gmra.mxu0 %vm677_vm0, %v2914_v11  ;;  %4609 = vmatprep.subr.mxu0 %v4826_v24 }
0x173c   : > { %4670 = vmatprep.subr.mxu1 %v4826_v24  ;;  %4610 = vmatpush3.msra.mxu0 %v4113_v12 }
0x173d   : > { %4671 = vmatpush3.msra.mxu1 %v4135_v13  ;;  %4672 = vmatprep.mubr.msk.f32.mxu1 %vm4827_vm2, %v4826_v24 }
0x173e   : > { %4611 = vmatprep.subr.mxu0 %v4826_v24  ;;  %4673 = vmatmul.mubr.msk.f32.vlgmr.msra.gmra.mxu1 %vm677_vm0, %v3467_v15 }
0x173f   : > { %4686 = vmatprep.subr.mxu1 %v4826_v24  ;;  %4612 = vmatpush3.msra.mxu0 %v4112_v17 }
0x1740   : > { %4687 = vmatpush3.msra.mxu1 %v4148_v18  ;;  %4613 = vmatprep.subr.mxu0 %v4826_v24 }
0x1741   : > { %4688 = vmatprep.subr.mxu1 %v4826_v24  ;;  %4614 = vmatpush3.msra.mxu0 %v4111_v19 }
0x1742   : > { %4689 = vmatpush3.msra.mxu1 %v4147_v20  ;;  %4615 = vmatprep.subr.mxu0 %v4826_v24 }
0x1743   : > { %4690 = vmatprep.subr.mxu1 %v4826_v24  ;;  %4616 = vmatpush3.msra.mxu0 %v4110_v58 }
0x1744   : > { %4617 = vmatprep.mubr.msk.f32.mxu0 %vm4827_vm2, %v4826_v24  ;;  %4691 = vmatpush3.msra.mxu1 %v4146_v60 }
0x1745   : > { %4618 = vmatmul.mubr.msk.f32.vlgmr.msra.gmra.mxu0 %vm677_vm0, %v3072_v23  ;;  %4631 = vmatprep.subr.mxu0 %v4826_v24 }
0x1746   : > { %4692 = vmatprep.subr.mxu1 %v4826_v24  ;;  %4632 = vmatpush3.msra.mxu0 %v4123_v0 }
0x1747   : > { %4693 = vmatpush3.msra.mxu1 %v4145_v25  ;;  %4694 = vmatprep.mubr.msk.f32.mxu1 %vm4827_vm2, %v4826_v24 }
0x1748   : > { %4633 = vmatprep.subr.mxu0 %v4826_v24  ;;  %4695 = vmatmul.mubr.msk.f32.vlgmr.msra.gmra.mxu1 %vm677_vm0, %v3625_v26 }
0x1749   : > { %4708 = vmatprep.subr.mxu1 %v4826_v24  ;;  %4634 = vmatpush3.msra.mxu0 %v4122_v2 }
0x174a   : > { %4709 = vmatpush3.msra.mxu1 %v4158_v27  ;;  %4635 = vmatprep.subr.mxu0 %v4826_v24 }
0x174b   : > { %4710 = vmatprep.subr.mxu1 %v4826_v24  ;;  %4636 = vmatpush3.msra.mxu0 %v4121_v28 }
0x174c   : > { %4711 = vmatpush3.msra.mxu1 %v4157_v29  ;;  %4637 = vmatprep.subr.mxu0 %v4826_v24 }
0x174d   : > { %4712 = vmatprep.subr.mxu1 %v4826_v24  ;;  %4638 = vmatpush3.msra.mxu0 %v4120_v30 }
0x174e   : > { %4639 = vmatprep.mubr.msk.f32.mxu0 %vm4827_vm2, %v4826_v24  ;;  %4713 = vmatpush3.msra.mxu1 %v4156_v31 }
0x174f   : > { %4640 = vmatmul.mubr.msk.f32.vlgmr.msra.gmra.mxu0 %vm677_vm0, %v3230_v32  ;;  %4653 = vmatprep.subr.mxu0 %v4826_v24 }
0x1750   : > { %4714 = vmatprep.subr.mxu1 %v4826_v24  ;;  %4654 = vmatpush3.msra.mxu0 %v4133_v33 }
0x1751   : > { %4715 = vmatpush3.msra.mxu1 %v4155_v34  ;;  %4716 = vmatprep.mubr.msk.f32.mxu1 %vm4827_vm2, %v4826_v24 }
0x1752   : > { %4655 = vmatprep.subr.mxu0 %v4826_v24  ;;  %4717 = vmatmul.mubr.msk.f32.vlgmr.msra.gmra.mxu1 %vm677_vm0, %v3783_v35 }
0x1753   : > { %4656 = vmatpush3.msra.mxu0 %v4132_v36  ;;  %4661 = vmatprep.mubr.msk.f32.mxu0 %vm4827_vm2, %v4826_v24 }
0x1754   : > { %4657 = vmatprep.subr.mxu0 %v4826_v24 }
0x1755   : > { %4658 = vmatpush3.msra.mxu0 %v4131_v37 }
0x1756   : > { %4659 = vmatprep.subr.mxu0 %v4826_v24 }
0x1757   : > { %4660 = vmatpush3.msra.mxu0 %v4130_v38 }
0x1758   : > { %4662 = vmatmul.mubr.msk.f32.vlgmr.msra.gmra.mxu0 %vm677_vm0, %v3388_v39  ;;  %4675 = vmatprep.subr.mxu0 %v4826_v24 }
0x1759   : > { %4676 = vmatpush3.msra.mxu0 %v4143_v40  ;;  %4683 = vmatprep.mubr.msk.f32.mxu0 %vm4827_vm2, %v4826_v24 }
0x175a   : > { %4677 = vmatprep.subr.mxu0 %v4826_v24 }
0x175b   : > { %4678 = vmatpush3.msra.mxu0 %v4142_v41 }
0x175c   : > { %4679 = vmatprep.subr.mxu0 %v4826_v24 }
0x175d   : > { %4680 = vmatpush3.msra.mxu0 %v4141_v42 }
0x175e   : > { %4681 = vmatprep.subr.mxu0 %v4826_v24 }
0x175f   : > { %4682 = vmatpush3.msra.mxu0 %v4140_v43 }
0x1760   : > { %4684 = vmatmul.mubr.msk.f32.vlgmr.msra.gmra.mxu0 %vm677_vm0, %v3546_v44  ;;  %4697 = vmatprep.subr.mxu0 %v4826_v24 }
0x1761   : > { %4698 = vmatpush3.msra.mxu0 %v4153_v45  ;;  %4705 = vmatprep.mubr.msk.f32.mxu0 %vm4827_vm2, %v4826_v24 }
0x1762   : > { %4699 = vmatprep.subr.mxu0 %v4826_v24 }
0x1763   : > { %4700 = vmatpush3.msra.mxu0 %v4152_v46 }
0x1764   : > { %4701 = vmatprep.subr.mxu0 %v4826_v24 }
0x1765   : > { %4702 = vmatpush3.msra.mxu0 %v4151_v47 }
0x1766   : > { %4703 = vmatprep.subr.mxu0 %v4826_v24 }
0x1767   : > { %4704 = vmatpush3.msra.mxu0 %v4150_v48 }
0x1768   : > { %4706 = vmatmul.mubr.msk.f32.vlgmr.msra.gmra.mxu0 %vm677_vm0, %v3704_v49  ;;  %4719 = vmatprep.subr.mxu0 %v4826_v24 }
0x1769   : > { %4720 = vmatpush3.msra.mxu0 %v4163_v50  ;;  %4727 = vmatprep.mubr.msk.f32.mxu0 %vm4827_vm2, %v4826_v24 }
0x176a   : > { %4721 = vmatprep.subr.mxu0 %v4826_v24 }
0x176b   : > { %4722 = vmatpush3.msra.mxu0 %v4162_v51 }
0x176c   : > { %4723 = vmatprep.subr.mxu0 %v4826_v24 }
0x176d   : > { %4724 = vmatpush3.msra.mxu0 %v4161_v52 }
0x176e   : > { %4725 = vmatprep.subr.mxu0 %v4826_v24 }
0x176f   : > { %4726 = vmatpush3.msra.mxu0 %v4160_v53 }
0x1770   : > { %4728 = vmatmul.mubr.msk.f32.vlgmr.msra.gmra.mxu0 %vm677_vm0, %v3862_v54 }
0x17df   : > { %v2746_v55 = vpop.f32.mrf.mxu0 }
0x17e0   : > { %v2750_v21 = vadd.f32 %v2746_v55, %v2672_v16 }
0x17e1   : > { %v4564_v56 = vpop.f32.mrf.mxu0  ;;  %v3062_v57 = vpop.f32.mrf.mxu1 }
0x17e3   : > { %v4608_v59 = vpop.f32.mrf.mxu1 }
0x17e7   : > { %v2825_v61 = vpop.f32.mrf.mxu0 }
0x17e8   : > { %v2829_v11 = vadd.f32 %v2825_v61, %v2750_v21 }
0x17e9   : > { %v4575_v62 = vpop.f32.mrf.mxu0 }
0x17ea   : > { %v3220_v63 = vpop.f32.mrf.mxu1 }
0x17ec   : > { %v4630_v1 = vpop.f32.mrf.mxu1 }
0x17f1   : > { %v2904_v3 = vpop.f32.mrf.mxu0 }
0x17f2   : > { %v2908_v13 = vadd.f32 %v2904_v3, %v2829_v11 }
0x17f3   : > { %v4586_v4 = vpop.f32.mrf.mxu0 }
0x17f4   : > { %v3378_v5 = vpop.f32.mrf.mxu1 }
0x17f6   : > { %v4652_v14 = vpop.f32.mrf.mxu1 }
0x17fb   : > { %v2983_v6 = vpop.f32.mrf.mxu0 }
0x17fc   : > { %v2987_v15 = vadd.f32 %v2983_v6, %v2908_v13 }
0x17fd   : > { %v4597_v7 = vpop.f32.mrf.mxu0 }
0x17fe   : > { %v3536_v24 = vpop.f32.mrf.mxu1  ;;  %v3066_v18 = vadd.f32 %v3062_v57, %v2987_v15 }
0x1800   : > { %v4674_v8 = vpop.f32.mrf.mxu1 }
0x1805   : > { %v3141_v9 = vpop.f32.mrf.mxu0 }
0x1806   : > { %v3145_v58 = vadd.f32 %v3141_v9, %v3066_v18 }
0x1807   : > { %v4619_v10 = vpop.f32.mrf.mxu0 }
0x1808   : > { %v3694_v22 = vpop.f32.mrf.mxu1  ;;  %v3224_v23 = vadd.f32 %v3220_v63, %v3145_v58 }
0x180a   : > { %v4696_v12 = vpop.f32.mrf.mxu1 }
0x180f   : > { %v3299_v17 = vpop.f32.mrf.mxu0 }
0x1810   : > { %v3303_v25 = vadd.f32 %v3299_v17, %v3224_v23 }
0x1811   : > { %v4641_v19 = vpop.f32.mrf.mxu0 }
0x1812   : > { %v3852_v20 = vpop.f32.mrf.mxu1  ;;  %v3382_v2 = vadd.f32 %v3378_v5, %v3303_v25 }
0x1814   : > { %v4718_v60 = vpop.f32.mrf.mxu1 }
0x1818   : > { %v3457_v0 = vpop.f32.mrf.mxu0 }
0x1819   : > { %v3461_v27 = vadd.f32 %v3457_v0, %v3382_v2 }
0x181a   : > { %v4663_v26 = vpop.f32.mrf.mxu0 }
0x181b   : > { %v3540_v30 = vadd.f32 %v3536_v24, %v3461_v27 }
0x1820   : > { %v3615_v28 = vpop.f32.mrf.mxu0 }
0x1821   : > { %v3619_v31 = vadd.f32 %v3615_v28, %v3540_v30 }
0x1822   : > { %v4685_v29 = vpop.f32.mrf.mxu0 }
0x1823   : > { %v3698_v33 = vadd.f32 %v3694_v22, %v3619_v31 }
0x1828   : > { %v3773_v32 = vpop.f32.mrf.mxu0 }
0x1829   : > { %v3777_v35 = vadd.f32 %v3773_v32, %v3698_v33 }
0x182a   : > { %v4707_v34 = vpop.f32.mrf.mxu0 }
0x182b   : > { %v3856_v36 = vadd.f32 %v3852_v20, %v3777_v35 }
0x1830   : > { %v3931_v37 = vpop.f32.mrf.mxu0 }
0x1831   : > { %v3935_v38 = vadd.f32 %v3931_v37, %v3856_v36 }
0x1832   : > { %v4729_v39 = vpop.f32.mrf.mxu0 }
0x1833   : > { %3937 = vst.msk [vmem:[%s625_s21] sm:$0x1] %vm3936_vm3, %v3935_v38 }
0x1834 PF: > { %s30_s1 = sadd.s32 1, %s4817_s1  }
0x1835   : > { %p27_p4 = scmp.ge.s32.totalorder %s30_s1, 4  }
0x1837   :  { %29 = sbr.rel (!%p27_p4) target bundleno = 6 (0x6), region = 157 }

// kernel: crypto_forward.3
= control target key start
LH: loop header
LB: loop body
LE: loop exit
PB: predicated region body
PF: predicated region fallthrough
CT: control target
= control target key end

     0   :  { %s4292_s0 = inlined_call_operand.vmem [shape: f32[2,8,2], index: 0, kind: input, shape index: {}]   ;;  %s4293_s1 = inlined_call_operand.vmem [shape: f32[2,32], index: 1, kind: input, shape index: {}]   ;;  %s4294_s2 = inlined_call_operand.vmem [shape: f32[1,32], index: 2, kind: input, shape index: {}]   ;;  %s4295_s3 = inlined_call_operand.vmem [shape: f32[8,32], index: 3, kind: input, shape index: {}]   ;;  %s4296_s4 = inlined_call_operand.vmem [shape: f32[2,1,32], index: 4, kind: input, shape index: {}]   ;;  %s4297_s5 = inlined_call_operand.vmem [shape: f32[2,1,32], index: 5, kind: input, shape index: {}]   ;;  %s4298_s6 = inlined_call_operand.vmem [shape: f32[2,32,96], index: 6, kind: input, shape index: {}]   ;;  %s4299_s7 = inlined_call_operand.vmem [shape: f32[2,1,96], index: 7, kind: input, shape index: {}]   ;;  %s4300_s8 = inlined_call_operand.vmem [shape: f32[2,32,32], index: 8, kind: input, shape index: {}]   ;;  %s4301_s9 = inlined_call_operand.vmem [shape: f32[2,1,32], index: 9, kind: input, shape index: {}]   ;;  %s4302_s10 = inlined_call_operand.vmem [shape: f32[2,1,32], index: 10, kind: input, shape index: {}]   ;;  %s4303_s11 = inlined_call_operand.vmem [shape: f32[2,1,32], index: 11, kind: input, shape index: {}]   ;;  %s4304_s12 = inlined_call_operand.vmem [shape: f32[2,32,128], index: 12, kind: input, shape index: {}]   ;;  %s4305_s13 = inlined_call_operand.vmem [shape: f32[2,1,128], index: 13, kind: input, shape index: {}]   ;;  %s4306_s14 = inlined_call_operand.vmem [shape: f32[2,128,32], index: 14, kind: input, shape index: {}]   ;;  %s4307_s15 = inlined_call_operand.vmem [shape: f32[2,1,32], index: 15, kind: input, shape index: {}]   ;;  %s4308_s16 = inlined_call_operand.vmem [shape: f32[1,32], index: 16, kind: input, shape index: {}]   ;;  %s4309_s17 = inlined_call_operand.vmem [shape: f32[1,32], index: 17, kind: input, shape index: {}]   ;;  %s4310_s18 = inlined_call_operand.vmem [shape: f32[8,32,16], index: 18, kind: input, shape index: {}]   ;;  %s4311_s19 = inlined_call_operand.vmem [shape: f32[1,16], index: 19, kind: input, shape index: {}]   ;;  %s4312_s20 = inlined_call_operand.vmem [shape: f32[2,1,16], index: 20, kind: output, shape index: {}]  }
   0x1   :  { %4317 = sst [smem:[#allocation2_spill]] %s4292_s0 }
   0x2   :  { %4318 = sst [smem:[#allocation3_spill]] %s4293_s1  ;;  %s3704_s1 = smov 0  }
   0x3   :  { %4319 = sst [smem:[#allocation4_spill]] %s4294_s2 }
   0x4   :  { %4320 = sst [smem:[#allocation5_spill]] %s4295_s3 }
   0x5   :  { %4321 = sst [smem:[#allocation6_spill]] %s4296_s4 }
   0x6 LB: > { %s3020_s22 = sadd.s32 4294967295, %s3588_s1   ;;  %p3024_p0 = scmp.ge.s32.totalorder %s3588_s1, 1  ;;  %s3588_s1 = sphi %s3704_s1, %s30_s1  }
   0x7   : > { %p561_p1 = scmp.lt.s32.totalorder %s3588_s1, 3 }
   0x9   : > { %p562_p2 = pnand %p3024_p0, %p561_p1 }
   0xa   : > { %p616_p3 = scmp.lt.s32.totalorder (!%p562_p2), %s3020_s22, 1  ;;  %s4322_s25 = sld [smem:[#allocation2_spill]] (!%p562_p2) }
   0xb   : > { %565 = sbr.rel (%p562_p2) target bundleno = 6598 (0x19c6), region = 100  ;;  %s4323_s28 = sld [smem:[#allocation3_spill]] (!%p562_p2) }
   0xc   : > { %s4324_s21 = sld [smem:[#allocation4_spill]] (!%p562_p2)  ;;  %s3594_s27 = smov (!%p562_p2), 96  }
   0xd   : > { %s4325_s2 = sld [smem:[#allocation5_spill]] (!%p562_p2)  ;;  %s3595_s4 = smov (!%p562_p2), 64  }
   0xe   : > { %s4326_s24 = sld [smem:[#allocation6_spill]] (!%p562_p2)  ;;  %s3596_s29 = smov (!%p562_p2), 112  }
   0xf   : > { %s4316_s30 = smov (!%p562_p2), 80  }
  0x10   : > { %v3590_v0 = vmov 0   ;;  %s4330_s22 = smov (!%p616_p3, %s3020_s22), 1  ;;  %v3591_v2 = vmov 1   ;;  %vm658_vm0 = vcmask 261120   ;;  %v690_v20 = vld [vmem:[%s4298_s6 + $0x18] sm:$0xff]  ;;  %v3592_v21 = vmov 0.0  }
  0x11   : > { %3550 = vset.pattern.permute.xlu0 %v3590_v0  ;;  %s3025_s23 = sshll.u32 %s4330_s22, 3  ;;  %v3026_v4 = vld [vmem:[%s4323_s28] ss:$0 sm:$0xff]  ;;  %v3027_v5 = vld [vmem:[%s4323_s28 + $0x1] ss:$0 sm:$0xff]  ;;  %3263 = vmatprep.subr.mxu0 %v3592_v21  ;;  %v689_v22 = vld [vmem:[%s4298_s6 + $0x10] sm:$0xff] }
  0x12   : > { %s619_s3 = scalar_lea.vmem %s4322_s25, %s3025_s23  ;;  %v3028_v9 = vld [vmem:[%s4324_s21] ss:$0 sm:$0xff]  ;;  %vm3593_vm1 = vmmov 0   ;;  %3264 = vmatpush3.msra.mxu0 %v690_v20  ;;  %3274 = vmatprep.subr.mxu1 %v3592_v21  ;;  %v688_v23 = vld [vmem:[%s4298_s6 + $0x8] sm:$0xff]  ;;  %vm775_vm2 = vcmask 130048   ;;  %vm850_vm3 = vcmask 64512  }
  0x13   : > { %v623_v1 = vld [vmem:[%s619_s3] sm:$0xff]  ;;  %3271 = vmatprep.mubr.msk.f32.mxu0 %vm3593_vm1, %v3592_v21  ;;  %3265 = vmatprep.subr.mxu0 %v3592_v21  ;;  %v939_v51 = vld [vmem:[%s4300_s8 + $0x8] sm:$0xff]  ;;  %s4315_s25 = smov 48   ;;  %vm2971_vm4 = vcmask 122880  }
  0x14   : > { %627 = vperm.xlu0 %3550, %v623_v1   ;;  %v654_v11 = vld [vmem:[%s4325_s2] sm:$0xff]  ;;  %3276 = vmatprep.mubr.msk.f32.mxu1 %vm3593_vm1, %v3592_v21 }
  0x15   : > { %3266 = vmatpush3.msra.mxu0 %v689_v22  ;;  %v687_v24 = vld [vmem:[%s4298_s6] sm:$0xff] }
  0x16   : > { %3267 = vmatprep.subr.mxu0 %v3592_v21  ;;  %v3029_v29 = vld [vmem:[%s4326_s24] ss:$0 sm:$0xff] }
  0x17   : > { %3268 = vmatpush3.msra.mxu0 %v688_v23  ;;  %v3030_v31 = vld [vmem:[%s4297_s5] ss:$0 sm:$0xff] }
  0x18   : > { %3551 = vset.pattern.permute.xlu0 %v3591_v2  ;;  %3269 = vmatprep.subr.mxu0 %v3592_v21  ;;  %v3031_v34 = vld [vmem:[%s4299_s7] ss:$0 sm:$0xff] }
  0x19   : > { %637 = vperm.xlu0 %3551, %v623_v1   ;;  %3270 = vmatpush3.msra.mxu0 %v687_v24  ;;  %v938_v52 = vld [vmem:[%s4300_s8] sm:$0xff] }
  0x1a   : > { %3296 = vmatprep.subr.mxu0 %v3592_v21 }
  0x8f   : > { %v628_v3 = vpop.permute.xlu0 %627 }
  0x90   : > { %v634_v7 = vmul.f32 %v3026_v4, %v628_v3  ;;  %v941_v4 = vld [vmem:[%s4300_s8 + $0x18] sm:$0xff] }
  0x94   : > { %v638_v6 = vpop.permute.xlu0 %637 }
  0x95   : > { %v644_v8 = vmul.f32 %v3027_v5, %v638_v6 }
  0x97   : > { %v645_v10 = vadd.f32 %v644_v8, %v634_v7  ;;  %v940_v8 = vld [vmem:[%s4300_s8 + $0x10] sm:$0xff] }
  0x99   : > { %v653_v12 = vadd.f32 %v3028_v9, %v645_v10 }
  0x9b   : > { %v3730_v13 = vadd.f32 %v654_v11, %v653_v12  ;;  %v3037_v11 = vld [vmem:[%s4301_s9] ss:$0 sm:$0xff] }
  0x9d   : > { %v659_v14 = vsel %vm658_vm0, %v3730_v13, 0.0 }
  0x9e   : > { %660 = vadd.xlane.f32.xlu1 %v659_v14 }
 0x127   : > { %v661_v15 = vpop.xlane.xlu1 %660 }
 0x128   : > { %v663_v16 = vmul.f32 0.03125, %v661_v15 }
 0x12a   : > { %v664_v17 = vsub.f32 %v3730_v13, %v663_v16 }
 0x12c   : > { %v665_v18 = vmul.f32 %v664_v17, %v664_v17 }
 0x12e   : > { %v666_v19 = vsel %vm658_vm0, %v665_v18, 0.0 }
 0x12f   : > { %667 = vadd.xlane.f32.xlu1 %v666_v19 }
 0x1b8   : > { %v668_v25 = vpop.xlane.xlu1 %667 }
 0x1b9   : > { %v669_v26 = vmul.f32 0.03125, %v668_v25  ;;  %v1294_v25 = vld [vmem:[%s4304_s12 + $0x18] sm:$0xff] }
 0x1bb   : > { %v670_v27 = vadd.f32 1e-05, %v669_v26  ;;  %v1292_v26 = vld [vmem:[%s4304_s12 + $0x8] sm:$0xff] }
 0x1bd   : > { %3552 = vrsqrt.f32 %v670_v27  ;;  %v1291_v27 = vld [vmem:[%s4304_s12] sm:$0xff] }
 0x1ca   : > { %v3553_v28 = vpop.eup %3552 }
 0x1cb   : > { %v672_v30 = vmul.f32 %v3553_v28, %v664_v17 }
 0x1cd   : > { %v679_v32 = vmul.f32 %v3029_v29, %v672_v30 }
 0x1cf   : > { %v686_v33 = vadd.f32 %v3030_v31, %v679_v32  ;;  %v3042_v32 = vld [vmem:[%s4302_s10] ss:$0 sm:$0xff] }
 0x1d1   : > { %3272 = vmatmul.mubr.msk.f32.vlgmr.msra.gmra.mxu0 %vm658_vm0, %v686_v33 }
 0x1d2   : > { %3298 = vmatprep.mubr.msk.f32.mxu0 %vm3593_vm1, %v3592_v21 }
 0x291   : > { %v767_v35 = vpop.f32.mrf.mxu0 }
 0x292   : > { %v768_v36 = vadd.f32 %v3031_v34, %v767_v35  ;;  %v3043_v34 = vld [vmem:[%s4303_s11] ss:$0 sm:$0xff] }
 0x293   : > { %v3273_v37 = vpop.f32.mrf.mxu0 }
 0x294   : > { %773 = vrot.lane.b32.xlu1 %v768_v36, %s3594_s27  ;;  %v1399_v37 = vld [vmem:[%s4306_s14 + $0x78] sm:$0xff] }
 0x306   : > { %v774_v38 = vpop.permute.xlu1 %773 }
 0x307   : > { %3275 = vmatpush3.xpose.msk.msra.mxu1 %vm775_vm2, %v774_v38  ;;  %v1398_v38 = vld [vmem:[%s4306_s14 + $0x70] sm:$0xff] }
 0x308   : > { %3279 = vmatprep.subr.mxu1 %v3592_v21 }
 0x30a   : > { %3277 = vmatmul.mubr.msk.f32.vlgmr.msra.gmra.mxu1 %vm775_vm2, %v768_v36 }
 0x30b   : > { %3281 = vmatprep.mubr.msk.f32.mxu1 %vm3593_vm1, %v3592_v21 }
 0x3ca   : > { %v846_v39 = vpop.f32.mrf.mxu1 }
 0x3cb   : > { %v851_v40 = vsel %vm850_vm3, %v846_v39, -inf }
 0x3cc   : > { %852 = vmax.xlane.f32.xlu0 %v851_v40  ;;  %v3278_v41 = vpop.f32.mrf.mxu1  ;;  %v1396_v40 = vld [vmem:[%s4306_s14 + $0x60] sm:$0xff] }
 0x3cd   : > { %v1395_v41 = vld [vmem:[%s4306_s14 + $0x58] sm:$0xff] }
 0x3e2   : > { %862 = vrot.lane.b32.xlu0 %v768_v36, %s3595_s4 }
 0x3e6   : > { %1022 = vrot.lane.b32.xlu0 %v768_v36, %s3596_s29 }
 0x455   : > { %v853_v42 = vpop.xlane.xlu0 %852 }
 0x456   : > { %v854_v43 = vsub.f32 %v846_v39, %v853_v42  ;;  %v1397_v39 = vld [vmem:[%s4306_s14 + $0x68] sm:$0xff]  ;;  %v1394_v42 = vld [vmem:[%s4306_s14 + $0x50] sm:$0xff] }
 0x458   : > { %v855_v44 = vmul.f32 1.442695, %v854_v43  ;;  %v1393_v43 = vld [vmem:[%s4306_s14 + $0x48] sm:$0xff] }
 0x459   : > { %v863_v45 = vpop.permute.xlu0 %862 }
 0x45a   : > { %3554 = vpow2.f32 %v855_v44  ;;  %3280 = vmatpush3.msra.mxu1 %v863_v45  ;;  %v1392_v44 = vld [vmem:[%s4306_s14 + $0x40] sm:$0xff]  ;;  %v1391_v45 = vld [vmem:[%s4306_s14 + $0x38] sm:$0xff] }
 0x45b   : > { %3284 = vmatprep.subr.mxu1 %v3592_v21 }
 0x45d   : > { %v1023_v56 = vpop.permute.xlu0 %1022 }
 0x467   : > { %v3555_v46 = vpop.eup %3554 }
 0x468   : > { %v857_v47 = vsel %vm850_vm3, %v3555_v46, 0.0 }
 0x469   : > { %858 = vadd.xlane.f32.xlu1 %v857_v47  ;;  %v1389_v47 = vld [vmem:[%s4306_s14 + $0x28] sm:$0xff] }
 0x47a   : > { %1024 = vrot.lane.b32.xlu1 %v768_v36, %s4316_s30 }
 0x4f2   : > { %v859_v48 = vpop.xlane.xlu1 %858 }
 0x4f3   : > { %3556 = vrcp.f32 %v859_v48  ;;  %v1388_v48 = vld [vmem:[%s4306_s14 + $0x20] sm:$0xff] }
 0x4f6   : > { %v1025_v54 = vpop.permute.xlu1 %1024 }
 0x500   : > { %v3557_v49 = vpop.eup %3556 }
 0x501   : > { %v861_v50 = vmul.f32 %v3557_v49, %v3555_v46  ;;  %v1390_v46 = vld [vmem:[%s4306_s14 + $0x30] sm:$0xff]  ;;  %v1387_v49 = vld [vmem:[%s4306_s14 + $0x18] sm:$0xff] }
 0x503   : > { %3282 = vmatmul.mubr.msk.f32.vlgmr.msra.gmra.mxu1 %vm850_vm3, %v861_v50  ;;  %v1386_v50 = vld [vmem:[%s4306_s14 + $0x10] sm:$0xff] }
 0x504   : > { %3285 = vmatpush3.msra.mxu1 %v939_v51  ;;  %3288 = vmatprep.mubr.msk.f32.mxu1 %vm3593_vm1, %v3592_v21  ;;  %v1385_v51 = vld [vmem:[%s4306_s14 + $0x8] sm:$0xff] }
 0x505   : > { %3286 = vmatprep.subr.mxu1 %v3592_v21 }
 0x506   : > { %3287 = vmatpush3.msra.mxu1 %v938_v52  ;;  %v1384_v52 = vld [vmem:[%s4306_s14] sm:$0xff] }
 0x507   : > { %3291 = vmatprep.subr.mxu1 %v3592_v21 }
 0x5c3   : > { %v934_v53 = vpop.f32.mrf.mxu1 }
 0x5c4   : > { %3289 = vmatmul.mubr.msk.f32.vlgmr.msra.gmra.mxu1 %vm775_vm2, %v934_v53  ;;  %v3044_v53 = vld [vmem:[%s4305_s13] ss:$0 sm:$0xff] }
 0x5c5   : > { %3292 = vmatpush3.xpose.msk.msra.mxu1 %vm775_vm2, %v1025_v54  ;;  %v3283_v55 = vpop.f32.mrf.mxu1  ;;  %3293 = vmatprep.mubr.msk.f32.mxu1 %vm3593_vm1, %v3592_v21 }
 0x5c6   : > { %3301 = vmatprep.subr.mxu1 %v3592_v21 }
 0x5c8   : > { %3294 = vmatmul.mubr.msk.f32.vlgmr.msra.gmra.mxu1 %vm775_vm2, %v1023_v56 }
 0x5c9   : > { %3305 = vmatprep.mubr.msk.f32.mxu1 %vm3593_vm1, %v3592_v21  ;;  %3302 = vmatpush3.msra.mxu1 %v941_v4 }
 0x5ca   : > { %3303 = vmatprep.subr.mxu1 %v3592_v21 }
 0x5cb   : > { %3304 = vmatpush3.msra.mxu1 %v940_v8 }
 0x5cc   : > { %3319 = vmatprep.subr.mxu1 %v3592_v21 }
 0x684   : > { %v1011_v57 = vpop.f32.mrf.mxu1 }
 0x685   : > { %v1021_v12 = vadd.f32 %v3037_v11, %v1011_v57 }
 0x686   : > { %v3290_v58 = vpop.f32.mrf.mxu1 }
 0x688   : > { %v1096_v59 = vpop.f32.mrf.mxu1 }
 0x689   : > { %v1100_v60 = vsel %vm850_vm3, %v1096_v59, -inf }
 0x68a   : > { %1101 = vmax.xlane.f32.xlu0 %v1100_v60  ;;  %v3295_v61 = vpop.f32.mrf.mxu1 }
 0x6a0   : > { %1111 = vrot.lane.b32.xlu0 %v768_v36, %s4315_s25 }
 0x713   : > { %v1102_v62 = vpop.xlane.xlu0 %1101 }
 0x714   : > { %v1103_v63 = vsub.f32 %v1096_v59, %v1102_v62 }
 0x716   : > { %v1104_v0 = vmul.f32 1.442695, %v1103_v63 }
 0x717   : > { %v1112_v1 = vpop.permute.xlu0 %1111 }
 0x718   : > { %3558 = vpow2.f32 %v1104_v0  ;;  %3297 = vmatpush3.msra.mxu0 %v1112_v1 }
 0x719   : > { %3308 = vmatprep.subr.mxu0 %v3592_v21 }
 0x725   : > { %v3559_v2 = vpop.eup %3558 }
 0x726   : > { %v1106_v3 = vsel %vm850_vm3, %v3559_v2, 0.0 }
 0x727   : > { %1107 = vadd.xlane.f32.xlu1 %v1106_v3  ;;  %v3046_v3 = vld [vmem:[%s4307_s15] ss:$0 sm:$0xff] }
 0x7b0   : > { %v1108_v5 = vpop.xlane.xlu1 %1107 }
 0x7b1   : > { %3560 = vrcp.f32 %v1108_v5 }
 0x7be   : > { %v3561_v6 = vpop.eup %3560 }
 0x7bf   : > { %v1110_v7 = vmul.f32 %v3561_v6, %v3559_v2 }
 0x7c1   : > { %3299 = vmatmul.mubr.msk.f32.vlgmr.msra.gmra.mxu0 %vm850_vm3, %v1110_v7 }
 0x7c2   : > { %3316 = vmatprep.mubr.msk.f32.mxu0 %vm3593_vm1, %v3592_v21  ;;  %3309 = vmatpush3.msra.mxu0 %v1294_v25  ;;  %v3050_v25 = vld [vmem:[%s4297_s5 + $0x1] ss:$0 sm:$0xff] }
 0x7c3   : > { %3310 = vmatprep.subr.mxu0 %v3592_v21 }
 0x881   : > { %v1183_v9 = vpop.f32.mrf.mxu0 }
 0x882   : > { %3306 = vmatmul.mubr.msk.f32.vlgmr.msra.gmra.mxu1 %vm775_vm2, %v1183_v9 }
 0x883   : > { %v3300_v10 = vpop.f32.mrf.mxu0  ;;  %3351 = vmatprep.mubr.msk.f32.mxu1 %vm3593_vm1, %v3592_v21  ;;  %3320 = vmatpush3.msra.mxu1 %v1399_v37 }
 0x884   : > { %3321 = vmatprep.subr.mxu1 %v3592_v21 }
 0x885   : > { %3322 = vmatpush3.msra.mxu1 %v1398_v38 }
 0x886   : > { %3323 = vmatprep.subr.mxu1 %v3592_v21 }
 0x887   : > { %3324 = vmatpush3.msra.mxu1 %v1397_v39 }
 0x888   : > { %3325 = vmatprep.subr.mxu1 %v3592_v21 }
 0x889   : > { %3326 = vmatpush3.msra.mxu1 %v1396_v40 }
 0x88a   : > { %3327 = vmatprep.subr.mxu1 %v3592_v21 }
 0x88b   : > { %3328 = vmatpush3.msra.mxu1 %v1395_v41 }
 0x88c   : > { %3329 = vmatprep.subr.mxu1 %v3592_v21 }
 0x88d   : > { %3330 = vmatpush3.msra.mxu1 %v1394_v42 }
 0x88e   : > { %3331 = vmatprep.subr.mxu1 %v3592_v21 }
 0x88f   : > { %3332 = vmatpush3.msra.mxu1 %v1393_v43 }
 0x890   : > { %3333 = vmatprep.subr.mxu1 %v3592_v21 }
 0x891   : > { %3334 = vmatpush3.msra.mxu1 %v1392_v44  ;;  %v3063_v44 = vld [vmem:[%s4300_s8 + $0x28] sm:$0xff] }
 0x892   : > { %3335 = vmatprep.subr.mxu1 %v3592_v21 }
 0x893   : > { %3336 = vmatpush3.msra.mxu1 %v1391_v45  ;;  %v3062_v45 = vld [vmem:[%s4300_s8 + $0x20] sm:$0xff] }
 0x894   : > { %3337 = vmatprep.subr.mxu1 %v3592_v21 }
 0x895   : > { %3338 = vmatpush3.msra.mxu1 %v1390_v46 }
 0x896   : > { %3339 = vmatprep.subr.mxu1 %v3592_v21 }
 0x897   : > { %3340 = vmatpush3.msra.mxu1 %v1389_v47 }
 0x898   : > { %3341 = vmatprep.subr.mxu1 %v3592_v21 }
 0x899   : > { %3342 = vmatpush3.msra.mxu1 %v1388_v48 }
 0x89a   : > { %3343 = vmatprep.subr.mxu1 %v3592_v21 }
 0x89b   : > { %3344 = vmatpush3.msra.mxu1 %v1387_v49 }
 0x89c   : > { %3345 = vmatprep.subr.mxu1 %v3592_v21 }
 0x89d   : > { %3346 = vmatpush3.msra.mxu1 %v1386_v50 }
 0x89e   : > { %3347 = vmatprep.subr.mxu1 %v3592_v21 }
 0x89f   : > { %3348 = vmatpush3.msra.mxu1 %v1385_v51 }
 0x8a0   : > { %3349 = vmatprep.subr.mxu1 %v3592_v21 }
 0x8a1   : > { %3350 = vmatpush3.msra.mxu1 %v1384_v52 }
 0x8a2   : > { %3392 = vmatprep.subr.mxu1 %v3592_v21 }
 0x942   : > { %v1256_v14 = vpop.f32.mrf.mxu1 }
 0x943   : > { %v1260_v15 = vadd.f32 %v1256_v14, %v1021_v12  ;;  %v3054_v14 = vld [vmem:[%s4298_s6 + $0x38] sm:$0xff] }
 0x944   : > { %v3307_v16 = vpop.f32.mrf.mxu1 }
 0x945   : > { %v3823_v17 = vadd.f32 %v1260_v15, %v3730_v13  ;;  %v1293_v13 = vld [vmem:[%s4304_s12 + $0x10] sm:$0xff]  ;;  %v3052_v16 = vld [vmem:[%s4298_s6 + $0x28] sm:$0xff] }
 0x946   : > { %3311 = vmatpush3.msra.mxu0 %v1293_v13  ;;  %v3053_v15 = vld [vmem:[%s4298_s6 + $0x30] sm:$0xff] }
 0x947   : > { %v1264_v18 = vsel %vm658_vm0, %v3823_v17, 0.0  ;;  %3312 = vmatprep.subr.mxu0 %v3592_v21 }
 0x948   : > { %1265 = vadd.xlane.f32.xlu1 %v1264_v18  ;;  %3313 = vmatpush3.msra.mxu0 %v1292_v26 }
 0x949   : > { %3314 = vmatprep.subr.mxu0 %v3592_v21 }
 0x94a   : > { %3315 = vmatpush3.msra.mxu0 %v1291_v27  ;;  %v3056_v27 = vld [vmem:[%s4299_s7 + $0x1] ss:$0 sm:$0xff] }
 0x94b   : > { %3354 = vmatprep.subr.mxu0 %v3592_v21 }
 0x9d1   : > { %v1266_v19 = vpop.xlane.xlu1 %1265 }
 0x9d2   : > { %v1267_v20 = vmul.f32 0.03125, %v1266_v19 }
 0x9d4   : > { %v1268_v22 = vsub.f32 %v3823_v17, %v1267_v20 }
 0x9d6   : > { %v1269_v23 = vmul.f32 %v1268_v22, %v1268_v22 }
 0x9d8   : > { %v1270_v24 = vsel %vm658_vm0, %v1269_v23, 0.0  ;;  %v3049_v23 = vld [vmem:[%s4326_s24 + $0x1] ss:$0 sm:$0xff] }
 0x9d9   : > { %1271 = vadd.xlane.f32.xlu1 %v1270_v24 }
 0xa62   : > { %v1272_v28 = vpop.xlane.xlu1 %1271 }
 0xa63   : > { %v1273_v29 = vmul.f32 0.03125, %v1272_v28 }
 0xa65   : > { %v1274_v30 = vadd.f32 1e-05, %v1273_v29 }
 0xa67   : > { %3562 = vrsqrt.f32 %v1274_v30 }
 0xa74   : > { %v3563_v31 = vpop.eup %3562 }
 0xa75   : > { %v1276_v33 = vmul.f32 %v3563_v31, %v1268_v22 }
 0xa77   : > { %v1283_v35 = vmul.f32 %v3042_v32, %v1276_v33 }
 0xa79   : > { %v1290_v36 = vadd.f32 %v3043_v34, %v1283_v35 }
 0xa7b   : > { %3317 = vmatmul.mubr.msk.f32.vlgmr.msra.gmra.mxu0 %vm658_vm0, %v1290_v36 }
 0xa7c   : > { %3362 = vmatprep.mubr.msk.f32.mxu0 %vm3593_vm1, %v3592_v21  ;;  %3355 = vmatpush3.msra.mxu0 %v3054_v14 }
 0xa7d   : > { %3356 = vmatprep.subr.mxu0 %v3592_v21 }
 0xa7e   : > { %3357 = vmatpush3.msra.mxu0 %v3053_v15 }
 0xa7f   : > { %3358 = vmatprep.subr.mxu0 %v3592_v21 }
 0xa80   : > { %3359 = vmatpush3.msra.mxu0 %v3052_v16 }
 0xa81   : > { %3360 = vmatprep.subr.mxu0 %v3592_v21 }
 0xb3b   : > { %v1371_v54 = vpop.f32.mrf.mxu0 }
 0xb3c   : > { %v1372_v55 = vadd.f32 %v3044_v53, %v1371_v54 }
 0xb3d   : > { %v3318_v56 = vpop.f32.mrf.mxu0 }
 0xb3e   : > { %v1375_v57 = vmul.f32 %v1372_v55, %v1372_v55 }
 0xb40   : > { %v1376_v58 = vmul.f32 %v1375_v57, %v1372_v55 }
 0xb42   : > { %v1377_v59 = vmul.f32 0.044715, %v1376_v58 }
 0xb44   : > { %v1378_v60 = vadd.f32 %v1377_v59, %v1372_v55 }
 0xb46   : > { %v1379_v61 = vmul.f32 0.7978846, %v1378_v60 }
 0xb48   : > { %3564 = vtanh.f32 %v1379_v61  ;;  %v3065_v61 = vld [vmem:[%s4300_s8 + $0x38] sm:$0xff] }
 0xb55   : > { %v3565_v62 = vpop.eup %3564 }
 0xb56   : > { %v1381_v63 = vadd.f32 1.0, %v3565_v62 }
 0xb58   : > { %v1382_v0 = vmul.f32 0.5, %v1381_v63 }
 0xb5a   : > { %v1383_v1 = vmul.f32 %v1382_v0, %v1372_v55 }
 0xb5c   : > { %3352 = vmatmul.mubr.f32.vlgmr.msra.gmra.mxu1 %v1383_v1  ;;  %v3064_v1 = vld [vmem:[%s4300_s8 + $0x30] sm:$0xff] }
 0xb5d   : > { %3396 = vmatprep.mubr.msk.f32.mxu1 %vm3593_vm1, %v3592_v21  ;;  %3393 = vmatpush3.msra.mxu1 %v3065_v61 }
 0xb5e   : > { %3394 = vmatprep.subr.mxu1 %v3592_v21 }
 0xb5f   : > { %3395 = vmatpush3.msra.mxu1 %v3064_v1 }
 0xb60   : > { %3410 = vmatprep.subr.mxu1 %v3592_v21 }
 0xc1c   : > { %v1466_v2 = vpop.f32.mrf.mxu1 }
 0xc1d   : > { %v1470_v4 = vadd.f32 %v1466_v2, %v3823_v17  ;;  %v3051_v17 = vld [vmem:[%s4298_s6 + $0x20] sm:$0xff] }
 0xc1e   : > { %v3353_v5 = vpop.f32.mrf.mxu1  ;;  %3361 = vmatpush3.msra.mxu0 %v3051_v17 }
 0xc1f   : > { %v3927_v6 = vadd.f32 %v3046_v3, %v1470_v4  ;;  %3365 = vmatprep.subr.mxu0 %v3592_v21  ;;  %v3067_v4 = vld [vmem:[%s4301_s9 + $0x1] ss:$0 sm:$0xff] }
 0xc21   : > { %v1483_v7 = vsel %vm658_vm0, %v3927_v6, 0.0 }
 0xc22   : > { %1484 = vadd.xlane.f32.xlu0 %v1483_v7 }
 0xcab   : > { %v1485_v8 = vpop.xlane.xlu0 %1484 }
 0xcac   : > { %v1486_v9 = vmul.f32 0.03125, %v1485_v8 }
 0xcae   : > { %v1487_v10 = vsub.f32 %v3927_v6, %v1486_v9 }
 0xcb0   : > { %v1488_v11 = vmul.f32 %v1487_v10, %v1487_v10 }
 0xcb2   : > { %v1489_v12 = vsel %vm658_vm0, %v1488_v11, 0.0 }
 0xcb3   : > { %1490 = vadd.xlane.f32.xlu1 %v1489_v12 }
 0xd3c   : > { %v1491_v18 = vpop.xlane.xlu1 %1490 }
 0xd3d   : > { %v1492_v19 = vmul.f32 0.03125, %v1491_v18  ;;  %v3079_v18 = vld [vmem:[%s4304_s12 + $0x38] sm:$0xff] }
 0xd3f   : > { %v1493_v20 = vadd.f32 1e-05, %v1492_v19  ;;  %v3077_v19 = vld [vmem:[%s4304_s12 + $0x28] sm:$0xff] }
 0xd41   : > { %3566 = vrsqrt.f32 %v1493_v20  ;;  %v3076_v20 = vld [vmem:[%s4304_s12 + $0x20] sm:$0xff] }
 0xd4e   : > { %v3567_v22 = vpop.eup %3566 }
 0xd4f   : > { %v1495_v24 = vmul.f32 %v3567_v22, %v1487_v10 }
 0xd51   : > { %v1502_v13 = vmul.f32 %v3049_v23, %v1495_v24 }
 0xd53   : > { %v1509_v26 = vadd.f32 %v3050_v25, %v1502_v13  ;;  %v3074_v13 = vld [vmem:[%s4302_s10 + $0x1] ss:$0 sm:$0xff] }
 0xd55   : > { %3363 = vmatmul.mubr.msk.f32.vlgmr.msra.gmra.mxu0 %vm658_vm0, %v1509_v26 }
 0xd56   : > { %3367 = vmatprep.mubr.msk.f32.mxu0 %vm3593_vm1, %v3592_v21 }
 0xe15   : > { %v1592_v28 = vpop.f32.mrf.mxu0 }
 0xe16   : > { %v1593_v29 = vadd.f32 %v3056_v27, %v1592_v28  ;;  %v3075_v27 = vld [vmem:[%s4303_s11 + $0x1] ss:$0 sm:$0xff] }
 0xe17   : > { %v3364_v30 = vpop.f32.mrf.mxu0 }
 0xe18   : > { %1599 = vrot.lane.b32.xlu1 %v1593_v29, %s3594_s27  ;;  %s4327_s27 = smov 80   ;;  %v3098_v30 = vld [vmem:[%s4306_s14 + $0xf8] sm:$0xff] }
 0xe8a   : > { %v1600_v31 = vpop.permute.xlu1 %1599 }
 0xe8b   : > { %3366 = vmatpush3.xpose.msk.msra.mxu0 %vm775_vm2, %v1600_v31  ;;  %v3097_v31 = vld [vmem:[%s4306_s14 + $0xf0] sm:$0xff] }
 0xe8c   : > { %3370 = vmatprep.subr.mxu0 %v3592_v21 }
 0xe8e   : > { %3368 = vmatmul.mubr.msk.f32.vlgmr.msra.gmra.mxu0 %vm775_vm2, %v1593_v29 }
 0xe8f   : > { %3372 = vmatprep.mubr.msk.f32.mxu0 %vm3593_vm1, %v3592_v21 }
 0xf4e   : > { %v1671_v32 = vpop.f32.mrf.mxu0 }
 0xf4f   : > { %v1675_v33 = vsel %vm850_vm3, %v1671_v32, -inf }
 0xf50   : > { %1676 = vmax.xlane.f32.xlu1 %v1675_v33  ;;  %v3369_v34 = vpop.f32.mrf.mxu0  ;;  %v3095_v33 = vld [vmem:[%s4306_s14 + $0xe0] sm:$0xff] }
 0xf51   : > { %v3094_v34 = vld [vmem:[%s4306_s14 + $0xd8] sm:$0xff] }
 0xf61   : > { %1847 = vrot.lane.b32.xlu1 %v1593_v29, %s3596_s29 }
 0xfd9   : > { %v1677_v35 = vpop.xlane.xlu1 %1676 }
 0xfda   : > { %v1678_v36 = vsub.f32 %v1671_v32, %v1677_v35  ;;  %v3096_v32 = vld [vmem:[%s4306_s14 + $0xe8] sm:$0xff]  ;;  %v3093_v35 = vld [vmem:[%s4306_s14 + $0xd0] sm:$0xff] }
 0xfdc   : > { %v1679_v37 = vmul.f32 1.442695, %v1678_v36  ;;  %v3092_v36 = vld [vmem:[%s4306_s14 + $0xc8] sm:$0xff] }
 0xfdd   : > { %v1848_v49 = vpop.permute.xlu1 %1847 }
 0xfde   : > { %3568 = vpow2.f32 %v1679_v37  ;;  %v3091_v37 = vld [vmem:[%s4306_s14 + $0xc0] sm:$0xff] }
 0xfeb   : > { %v3569_v38 = vpop.eup %3568 }
 0xfec   : > { %v1681_v39 = vsel %vm850_vm3, %v3569_v38, 0.0 }
 0xfed   : > { %1682 = vadd.xlane.f32.xlu0 %v1681_v39  ;;  %v3089_v39 = vld [vmem:[%s4306_s14 + $0xb0] sm:$0xff] }
0x1003   : > { %1686 = vrot.lane.b32.xlu0 %v1593_v29, %s3595_s4  ;;  %s4328_s4 = smov 48  }
0x1007   : > { %1849 = vrot.lane.b32.xlu0 %v1593_v29, %s4327_s27  ;;  %s622_s27 = scalar_lea.vmem %s4312_s20, %s4330_s22 }
0x1076   : > { %v1683_v40 = vpop.xlane.xlu0 %1682 }
0x1077   : > { %3570 = vrcp.f32 %v1683_v40  ;;  %v3088_v40 = vld [vmem:[%s4306_s14 + $0xa8] sm:$0xff] }
0x107a   : > { %v1687_v41 = vpop.permute.xlu0 %1686 }
0x107b   : > { %3371 = vmatpush3.msra.mxu0 %v1687_v41  ;;  %v3087_v41 = vld [vmem:[%s4306_s14 + $0xa0] sm:$0xff] }
0x107c   : > { %3375 = vmatprep.subr.mxu0 %v3592_v21 }
0x107e   : > { %v1850_v47 = vpop.permute.xlu0 %1849 }
0x1084   : > { %v3571_v42 = vpop.eup %3570 }
0x1085   : > { %v1685_v43 = vmul.f32 %v3571_v42, %v3569_v38  ;;  %v3090_v38 = vld [vmem:[%s4306_s14 + $0xb8] sm:$0xff] }
0x1086   : > { %v3086_v42 = vld [vmem:[%s4306_s14 + $0x98] sm:$0xff] }
0x1087   : > { %3373 = vmatmul.mubr.msk.f32.vlgmr.msra.gmra.mxu0 %vm850_vm3, %v1685_v43  ;;  %v3085_v43 = vld [vmem:[%s4306_s14 + $0x90] sm:$0xff] }
0x1088   : > { %3376 = vmatpush3.msra.mxu0 %v3063_v44  ;;  %3379 = vmatprep.mubr.msk.f32.mxu0 %vm3593_vm1, %v3592_v21  ;;  %v3084_v44 = vld [vmem:[%s4306_s14 + $0x88] sm:$0xff] }
0x1089   : > { %3377 = vmatprep.subr.mxu0 %v3592_v21 }
0x108a   : > { %3378 = vmatpush3.msra.mxu0 %v3062_v45  ;;  %v3083_v45 = vld [vmem:[%s4306_s14 + $0x80] sm:$0xff] }
0x108b   : > { %3382 = vmatprep.subr.mxu0 %v3592_v21 }
0x1147   : > { %v1758_v46 = vpop.f32.mrf.mxu0 }
0x1148   : > { %3380 = vmatmul.mubr.msk.f32.vlgmr.msra.gmra.mxu0 %vm775_vm2, %v1758_v46  ;;  %v3081_v46 = vld [vmem:[%s4305_s13 + $0x1] ss:$0 sm:$0xff] }
0x1149   : > { %3383 = vmatpush3.xpose.msk.msra.mxu0 %vm775_vm2, %v1850_v47  ;;  %v3374_v48 = vpop.f32.mrf.mxu0  ;;  %3384 = vmatprep.mubr.msk.f32.mxu0 %vm3593_vm1, %v3592_v21 }
0x114a   : > { %3387 = vmatprep.subr.mxu0 %v3592_v21 }
0x114c   : > { %3385 = vmatmul.mubr.msk.f32.vlgmr.msra.gmra.mxu0 %vm775_vm2, %v1848_v49 }
0x114d   : > { %3389 = vmatprep.mubr.msk.f32.mxu0 %vm3593_vm1, %v3592_v21 }
0x1208   : > { %v1836_v50 = vpop.f32.mrf.mxu0 }
0x1209   : > { %v1846_v5 = vadd.f32 %v3067_v4, %v1836_v50 }
0x120a   : > { %v3381_v51 = vpop.f32.mrf.mxu0 }
0x120c   : > { %v1921_v52 = vpop.f32.mrf.mxu0 }
0x120d   : > { %v1925_v53 = vsel %vm850_vm3, %v1921_v52, -inf }
0x120e   : > { %1926 = vmax.xlane.f32.xlu0 %v1925_v53  ;;  %v3386_v54 = vpop.f32.mrf.mxu0 }
0x1224   : > { %1936 = vrot.lane.b32.xlu0 %v1593_v29, %s4328_s4 }
0x1297   : > { %v1927_v55 = vpop.xlane.xlu0 %1926 }
0x1298   : > { %v1928_v56 = vsub.f32 %v1921_v52, %v1927_v55 }
0x129a   : > { %v1929_v57 = vmul.f32 1.442695, %v1928_v56 }
0x129b   : > { %v1937_v58 = vpop.permute.xlu0 %1936 }
0x129c   : > { %3572 = vpow2.f32 %v1929_v57  ;;  %3388 = vmatpush3.msra.mxu0 %v1937_v58 }
0x129d   : > { %3399 = vmatprep.subr.mxu0 %v3592_v21 }
0x12a9   : > { %v3573_v59 = vpop.eup %3572 }
0x12aa   : > { %v1931_v60 = vsel %vm850_vm3, %v3573_v59, 0.0 }
0x12ab   : > { %1932 = vadd.xlane.f32.xlu1 %v1931_v60  ;;  %v3100_v60 = vld [vmem:[%s4307_s15 + $0x1] ss:$0 sm:$0xff] }
0x1334   : > { %v1933_v62 = vpop.xlane.xlu1 %1932 }
0x1335   : > { %3574 = vrcp.f32 %v1933_v62 }
0x1342   : > { %v3575_v63 = vpop.eup %3574 }
0x1343   : > { %v1935_v0 = vmul.f32 %v3575_v63, %v3573_v59 }
0x1345   : > { %3390 = vmatmul.mubr.msk.f32.vlgmr.msra.gmra.mxu0 %vm850_vm3, %v1935_v0 }
0x1346   : > { %3407 = vmatprep.mubr.msk.f32.mxu0 %vm3593_vm1, %v3592_v21  ;;  %3400 = vmatpush3.msra.mxu0 %v3079_v18 }
0x1347   : > { %3401 = vmatprep.subr.mxu0 %v3592_v21 }
0x1405   : > { %v2008_v2 = vpop.f32.mrf.mxu0 }
0x1406   : > { %3397 = vmatmul.mubr.msk.f32.vlgmr.msra.gmra.mxu1 %vm775_vm2, %v2008_v2 }
0x1407   : > { %v3391_v3 = vpop.f32.mrf.mxu0  ;;  %3442 = vmatprep.mubr.msk.f32.mxu1 %vm3593_vm1, %v3592_v21  ;;  %3411 = vmatpush3.msra.mxu1 %v3098_v30  ;;  %v3104_v30 = vld [vmem:[%s4310_s18 + $0x20] sm:$0xff] }
0x1408   : > { %3412 = vmatprep.subr.mxu1 %v3592_v21 }
0x1409   : > { %3413 = vmatpush3.msra.mxu1 %v3097_v31  ;;  %v3130_v31 = vld [vmem:[%s4310_s18 + $0xc8] sm:$0xff] }
0x140a   : > { %3414 = vmatprep.subr.mxu1 %v3592_v21 }
0x140b   : > { %3415 = vmatpush3.msra.mxu1 %v3096_v32 }
0x140c   : > { %3416 = vmatprep.subr.mxu1 %v3592_v21 }
0x140d   : > { %3417 = vmatpush3.msra.mxu1 %v3095_v33  ;;  %v3112_v33 = vld [vmem:[%s4310_s18 + $0x58] sm:$0xff] }
0x140e   : > { %3418 = vmatprep.subr.mxu1 %v3592_v21 }
0x140f   : > { %3419 = vmatpush3.msra.mxu1 %v3094_v34  ;;  %v3129_v34 = vld [vmem:[%s4310_s18 + $0xc0] sm:$0xff] }
0x1410   : > { %3420 = vmatprep.subr.mxu1 %v3592_v21 }
0x1411   : > { %3421 = vmatpush3.msra.mxu1 %v3093_v35 }
0x1412   : > { %3422 = vmatprep.subr.mxu1 %v3592_v21 }
0x1413   : > { %3423 = vmatpush3.msra.mxu1 %v3092_v36  ;;  %v3111_v36 = vld [vmem:[%s4310_s18 + $0x50] sm:$0xff] }
0x1414   : > { %3424 = vmatprep.subr.mxu1 %v3592_v21 }
0x1415   : > { %3425 = vmatpush3.msra.mxu1 %v3091_v37  ;;  %v3110_v37 = vld [vmem:[%s4310_s18 + $0x48] sm:$0xff] }
0x1416   : > { %3426 = vmatprep.subr.mxu1 %v3592_v21 }
0x1417   : > { %3427 = vmatpush3.msra.mxu1 %v3090_v38  ;;  %v3109_v38 = vld [vmem:[%s4310_s18 + $0x40] sm:$0xff] }
0x1418   : > { %3428 = vmatprep.subr.mxu1 %v3592_v21 }
0x1419   : > { %3429 = vmatpush3.msra.mxu1 %v3089_v39 }
0x141a   : > { %3430 = vmatprep.subr.mxu1 %v3592_v21 }
0x141b   : > { %3431 = vmatpush3.msra.mxu1 %v3088_v40  ;;  %v3117_v40 = vld [vmem:[%s4310_s18 + $0x78] sm:$0xff] }
0x141c   : > { %3432 = vmatprep.subr.mxu1 %v3592_v21 }
0x141d   : > { %3433 = vmatpush3.msra.mxu1 %v3087_v41  ;;  %v3116_v41 = vld [vmem:[%s4310_s18 + $0x70] sm:$0xff] }
0x141e   : > { %3434 = vmatprep.subr.mxu1 %v3592_v21 }
0x141f   : > { %3435 = vmatpush3.msra.mxu1 %v3086_v42  ;;  %v3115_v42 = vld [vmem:[%s4310_s18 + $0x68] sm:$0xff] }
0x1420   : > { %3436 = vmatprep.subr.mxu1 %v3592_v21 }
0x1421   : > { %3437 = vmatpush3.msra.mxu1 %v3085_v43  ;;  %v3114_v43 = vld [vmem:[%s4310_s18 + $0x60] sm:$0xff] }
0x1422   : > { %3438 = vmatprep.subr.mxu1 %v3592_v21 }
0x1423   : > { %3439 = vmatpush3.msra.mxu1 %v3084_v44 }
0x1424   : > { %3440 = vmatprep.subr.mxu1 %v3592_v21 }
0x1425   : > { %3441 = vmatpush3.msra.mxu1 %v3083_v45  ;;  %v3127_v45 = vld [vmem:[%s4310_s18 + $0xb8] sm:$0xff] }
0x1426   : > { %3489 = vmatprep.subr.mxu1 %v3592_v21 }
0x14c6   : > { %v2081_v7 = vpop.f32.mrf.mxu1 }
0x14c7   : > { %v2085_v8 = vadd.f32 %v2081_v7, %v1846_v5  ;;  %v2343_v7 = vld [vmem:[%s4310_s18 + $0x18] sm:$0xff] }
0x14c8   : > { %v3398_v9 = vpop.f32.mrf.mxu1 }
0x14c9   : > { %v4014_v10 = vadd.f32 %v2085_v8, %v3927_v6  ;;  %v3078_v6 = vld [vmem:[%s4304_s12 + $0x30] sm:$0xff]  ;;  %v3122_v9 = vld [vmem:[%s4310_s18 + $0x98] sm:$0xff] }
0x14ca   : > { %3402 = vmatpush3.msra.mxu0 %v3078_v6  ;;  %v2342_v8 = vld [vmem:[%s4310_s18 + $0x10] sm:$0xff] }
0x14cb   : > { %v2091_v11 = vsel %vm658_vm0, %v4014_v10, 0.0  ;;  %3403 = vmatprep.subr.mxu0 %v3592_v21 }
0x14cc   : > { %2092 = vadd.xlane.f32.xlu1 %v2091_v11  ;;  %3404 = vmatpush3.msra.mxu0 %v3077_v19  ;;  %v3121_v11 = vld [vmem:[%s4310_s18 + $0x90] sm:$0xff]  ;;  %v3101_v19 = vld [vmem:[%s4308_s16] ss:$0 sm:$0xff] }
0x14cd   : > { %3405 = vmatprep.subr.mxu0 %v3592_v21 }
0x14ce   : > { %3406 = vmatpush3.msra.mxu0 %v3076_v20 }
0x14cf   : > { %3445 = vmatprep.subr.mxu0 %v3592_v21 }
0x1555   : > { %v2093_v12 = vpop.xlane.xlu1 %2092 }
0x1556   : > { %v2094_v14 = vmul.f32 0.03125, %v2093_v12  ;;  %v2340_v12 = vld [vmem:[%s4310_s18] sm:$0xff] }
0x1558   : > { %v2095_v15 = vsub.f32 %v4014_v10, %v2094_v14  ;;  %v3120_v14 = vld [vmem:[%s4310_s18 + $0x88] sm:$0xff] }
0x155a   : > { %v2096_v16 = vmul.f32 %v2095_v15, %v2095_v15 }
0x155c   : > { %v2097_v17 = vsel %vm658_vm0, %v2096_v16, 0.0 }
0x155d   : > { %2098 = vadd.xlane.f32.xlu0 %v2097_v17 }
0x15e6   : > { %v2099_v22 = vpop.xlane.xlu0 %2098 }
0x15e7   : > { %v2100_v23 = vmul.f32 0.03125, %v2099_v22  ;;  %v3102_v22 = vld [vmem:[%s4309_s17] ss:$0 sm:$0xff] }
0x15e9   : > { %v2101_v24 = vadd.f32 1e-05, %v2100_v23 }
0x15eb   : > { %3576 = vrsqrt.f32 %v2101_v24 }
0x15f8   : > { %v3577_v25 = vpop.eup %3576 }
0x15f9   : > { %v2103_v26 = vmul.f32 %v3577_v25, %v2095_v15  ;;  %v3119_v15 = vld [vmem:[%s4310_s18 + $0x80] sm:$0xff]  ;;  %v3107_v25 = vld [vmem:[%s4310_s18 + $0x38] sm:$0xff] }
0x15fb   : > { %v2110_v28 = vmul.f32 %v3074_v13, %v2103_v26  ;;  %v3106_v13 = vld [vmem:[%s4310_s18 + $0x30] sm:$0xff] }
0x15fd   : > { %v2117_v29 = vadd.f32 %v3075_v27, %v2110_v28  ;;  %v3132_v27 = vld [vmem:[%s4310_s18 + $0xd8] sm:$0xff]  ;;  %v3105_v28 = vld [vmem:[%s4310_s18 + $0x28] sm:$0xff] }
0x15ff   : > { %3408 = vmatmul.mubr.msk.f32.vlgmr.msra.gmra.mxu0 %vm658_vm0, %v2117_v29  ;;  %v3131_v29 = vld [vmem:[%s4310_s18 + $0xd0] sm:$0xff] }
0x1600   : > { %3453 = vmatprep.mubr.msk.f32.mxu0 %vm3593_vm1, %v3592_v21  ;;  %3446 = vmatpush3.msra.mxu0 %v2343_v7 }
0x1601   : > { %3447 = vmatprep.subr.mxu0 %v3592_v21 }
0x1602   : > { %3448 = vmatpush3.msra.mxu0 %v2342_v8 }
0x1603   : > { %3449 = vmatprep.subr.mxu0 %v3592_v21 }
0x16bf   : > { %v2200_v47 = vpop.f32.mrf.mxu0 }
0x16c0   : > { %v2201_v48 = vadd.f32 %v3081_v46, %v2200_v47  ;;  %v3126_v46 = vld [vmem:[%s4310_s18 + $0xb0] sm:$0xff]  ;;  %v3125_v47 = vld [vmem:[%s4310_s18 + $0xa8] sm:$0xff] }
0x16c1   : > { %v3409_v49 = vpop.f32.mrf.mxu0 }
0x16c2   : > { %v2204_v50 = vmul.f32 %v2201_v48, %v2201_v48 }
0x16c4   : > { %v2205_v51 = vmul.f32 %v2204_v50, %v2201_v48  ;;  %v3137_v50 = vld [vmem:[%s4310_s18 + $0xf8] sm:$0xff] }
0x16c6   : > { %v2206_v52 = vmul.f32 0.044715, %v2205_v51  ;;  %v3136_v51 = vld [vmem:[%s4310_s18 + $0xf0] sm:$0xff] }
0x16c8   : > { %v2207_v53 = vadd.f32 %v2206_v52, %v2201_v48  ;;  %v3135_v52 = vld [vmem:[%s4310_s18 + $0xe8] sm:$0xff] }
0x16ca   : > { %v2208_v54 = vmul.f32 0.7978846, %v2207_v53  ;;  %v3134_v53 = vld [vmem:[%s4310_s18 + $0xe0] sm:$0xff] }
0x16cc   : > { %3578 = vtanh.f32 %v2208_v54 }
0x16d9   : > { %v3579_v55 = vpop.eup %3578 }
0x16da   : > { %v2210_v56 = vadd.f32 1.0, %v3579_v55 }
0x16dc   : > { %v2211_v57 = vmul.f32 0.5, %v2210_v56 }
0x16de   : > { %v2212_v58 = vmul.f32 %v2211_v57, %v2201_v48  ;;  %v3124_v48 = vld [vmem:[%s4310_s18 + $0xa0] sm:$0xff] }
0x16e0   : > { %3443 = vmatmul.mubr.f32.vlgmr.msra.gmra.mxu1 %v2212_v58 }
0x16e1   : > { %3497 = vmatprep.mubr.msk.f32.mxu1 %vm3593_vm1, %v3592_v21  ;;  %3490 = vmatpush3.msra.mxu1 %v3122_v9 }
0x16e2   : > { %3491 = vmatprep.subr.mxu1 %v3592_v21 }
0x16e3   : > { %3492 = vmatpush3.msra.mxu1 %v3121_v11 }
0x16e4   : > { %3493 = vmatprep.subr.mxu1 %v3592_v21 }
0x16e5   : > { %3494 = vmatpush3.msra.mxu1 %v3120_v14 }
0x16e6   : > { %3495 = vmatprep.subr.mxu1 %v3592_v21 }
0x16e7   : > { %3496 = vmatpush3.msra.mxu1 %v3119_v15 }
0x16e8   : > { %3511 = vmatprep.subr.mxu1 %v3592_v21 }
0x17a0   : > { %v2296_v59 = vpop.f32.mrf.mxu1 }
0x17a1   : > { %v2300_v61 = vadd.f32 %v2296_v59, %v4014_v10  ;;  %v2341_v10 = vld [vmem:[%s4310_s18 + $0x8] sm:$0xff] }
0x17a2   : > { %v3444_v62 = vpop.f32.mrf.mxu1  ;;  %3450 = vmatpush3.msra.mxu0 %v2341_v10 }
0x17a3   : > { %v2309_v63 = vadd.f32 %v3100_v60, %v2300_v61  ;;  %3451 = vmatprep.subr.mxu0 %v3592_v21 }
0x17a4   : > { %3452 = vmatpush3.msra.mxu0 %v2340_v12 }
0x17a5   : > { %v2312_v0 = vsel %vm658_vm0, %v2309_v63, 0.0  ;;  %3456 = vmatprep.subr.mxu0 %v3592_v21 }
0x17a6   : > { %2313 = vadd.xlane.f32.xlu1 %v2312_v0 }
0x182f   : > { %v2314_v1 = vpop.xlane.xlu1 %2313 }
0x1830   : > { %v2315_v2 = vmul.f32 0.03125, %v2314_v1 }
0x1832   : > { %v2316_v3 = vsub.f32 %v2309_v63, %v2315_v2 }
0x1834   : > { %v2317_v4 = vmul.f32 %v2316_v3, %v2316_v3 }
0x1836   : > { %v2318_v5 = vsel %vm658_vm0, %v2317_v4, 0.0 }
0x1837   : > { %2319 = vadd.xlane.f32.xlu1 %v2318_v5 }
0x18c0   : > { %v2320_v16 = vpop.xlane.xlu1 %2319 }
0x18c1   : > { %v2321_v17 = vmul.f32 0.03125, %v2320_v16 }
0x18c3   : > { %v2322_v18 = vadd.f32 1e-05, %v2321_v17 }
0x18c5   : > { %3580 = vrsqrt.f32 %v2322_v18 }
0x18d2   : > { %v3581_v6 = vpop.eup %3580 }
0x18d3   : > { %v2324_v20 = vmul.f32 %v3581_v6, %v2316_v3 }
0x18d5   : > { %v2331_v23 = vmul.f32 %v3101_v19, %v2324_v20 }
0x18d7   : > { %v4158_v24 = vadd.f32 %v3102_v22, %v2331_v23 }
0x18d9   : > { %3454 = vmatmul.mubr.msk.f32.vlgmr.msra.gmra.mxu0 %vm658_vm0, %v4158_v24  ;;  %v2660_v26 = vrot.slane %v4158_v24, 4  ;;  %v2423_v32 = vrot.slane %v4158_v24, 1  ;;  %v2818_v35 = vrot.slane %v4158_v24, 6  ;;  %v2502_v39 = vrot.slane %v4158_v24, 2 }
0x18da   : > { %3457 = vmatpush3.msra.mxu0 %v3107_v25  ;;  %3464 = vmatprep.mubr.msk.f32.mxu0 %vm3593_vm1, %v3592_v21  ;;  %v2581_v44 = vrot.slane %v4158_v24, 3  ;;  %v2739_v49 = vrot.slane %v4158_v24, 5  ;;  %v2897_v54 = vrot.slane %v4158_v24, 7 }
0x18db   : > { %3458 = vmatprep.subr.mxu0 %v3592_v21  ;;  %3498 = vmatmul.mubr.msk.f32.vlgmr.msra.gmra.mxu1 %vm658_vm0, %v2660_v26 }
0x18dc   : > { %3459 = vmatpush3.msra.mxu0 %v3106_v13  ;;  %3512 = vmatpush3.msra.mxu1 %v3132_v27 }
0x18dd   : > { %3460 = vmatprep.subr.mxu0 %v3592_v21  ;;  %3513 = vmatprep.subr.mxu1 %v3592_v21 }
0x18de   : > { %3461 = vmatpush3.msra.mxu0 %v3105_v28  ;;  %3514 = vmatpush3.msra.mxu1 %v3131_v29 }
0x18df   : > { %3462 = vmatprep.subr.mxu0 %v3592_v21  ;;  %3515 = vmatprep.subr.mxu1 %v3592_v21 }
0x18e0   : > { %3463 = vmatpush3.msra.mxu0 %v3104_v30  ;;  %3516 = vmatpush3.msra.mxu1 %v3130_v31 }
0x18e1   : > { %3465 = vmatmul.mubr.msk.f32.vlgmr.msra.gmra.mxu0 %vm658_vm0, %v2423_v32  ;;  %3467 = vmatprep.subr.mxu0 %v3592_v21 }
0x18e2   : > { %3517 = vmatprep.subr.mxu1 %v3592_v21  ;;  %3468 = vmatpush3.msra.mxu0 %v3112_v33 }
0x18e3   : > { %3518 = vmatpush3.msra.mxu1 %v3129_v34  ;;  %3519 = vmatprep.mubr.msk.f32.mxu1 %vm3593_vm1, %v3592_v21 }
0x18e4   : > { %3469 = vmatprep.subr.mxu0 %v3592_v21  ;;  %3520 = vmatmul.mubr.msk.f32.vlgmr.msra.gmra.mxu1 %vm658_vm0, %v2818_v35 }
0x18e5   : > { %3470 = vmatpush3.msra.mxu0 %v3111_v36  ;;  %3475 = vmatprep.mubr.msk.f32.mxu0 %vm3593_vm1, %v3592_v21 }
0x18e6   : > { %3471 = vmatprep.subr.mxu0 %v3592_v21 }
0x18e7   : > { %3472 = vmatpush3.msra.mxu0 %v3110_v37 }
0x18e8   : > { %3473 = vmatprep.subr.mxu0 %v3592_v21 }
0x18e9   : > { %3474 = vmatpush3.msra.mxu0 %v3109_v38 }
0x18ea   : > { %3476 = vmatmul.mubr.msk.f32.vlgmr.msra.gmra.mxu0 %vm658_vm0, %v2502_v39  ;;  %3478 = vmatprep.subr.mxu0 %v3592_v21 }
0x18eb   : > { %3479 = vmatpush3.msra.mxu0 %v3117_v40  ;;  %3486 = vmatprep.mubr.msk.f32.mxu0 %vm3593_vm1, %v3592_v21 }
0x18ec   : > { %3480 = vmatprep.subr.mxu0 %v3592_v21 }
0x18ed   : > { %3481 = vmatpush3.msra.mxu0 %v3116_v41 }
0x18ee   : > { %3482 = vmatprep.subr.mxu0 %v3592_v21 }
0x18ef   : > { %3483 = vmatpush3.msra.mxu0 %v3115_v42 }
0x18f0   : > { %3484 = vmatprep.subr.mxu0 %v3592_v21 }
0x18f1   : > { %3485 = vmatpush3.msra.mxu0 %v3114_v43 }
0x18f2   : > { %3487 = vmatmul.mubr.msk.f32.vlgmr.msra.gmra.mxu0 %vm658_vm0, %v2581_v44  ;;  %3500 = vmatprep.subr.mxu0 %v3592_v21 }
0x18f3   : > { %3501 = vmatpush3.msra.mxu0 %v3127_v45  ;;  %3508 = vmatprep.mubr.msk.f32.mxu0 %vm3593_vm1, %v3592_v21 }
0x18f4   : > { %3502 = vmatprep.subr.mxu0 %v3592_v21 }
0x18f5   : > { %3503 = vmatpush3.msra.mxu0 %v3126_v46 }
0x18f6   : > { %3504 = vmatprep.subr.mxu0 %v3592_v21 }
0x18f7   : > { %3505 = vmatpush3.msra.mxu0 %v3125_v47 }
0x18f8   : > { %3506 = vmatprep.subr.mxu0 %v3592_v21 }
0x18f9   : > { %3507 = vmatpush3.msra.mxu0 %v3124_v48 }
0x18fa   : > { %3509 = vmatmul.mubr.msk.f32.vlgmr.msra.gmra.mxu0 %vm658_vm0, %v2739_v49  ;;  %3522 = vmatprep.subr.mxu0 %v3592_v21 }
0x18fb   : > { %3523 = vmatpush3.msra.mxu0 %v3137_v50  ;;  %3530 = vmatprep.mubr.msk.f32.mxu0 %vm3593_vm1, %v3592_v21 }
0x18fc   : > { %3524 = vmatprep.subr.mxu0 %v3592_v21 }
0x18fd   : > { %3525 = vmatpush3.msra.mxu0 %v3136_v51 }
0x18fe   : > { %3526 = vmatprep.subr.mxu0 %v3592_v21 }
0x18ff   : > { %3527 = vmatpush3.msra.mxu0 %v3135_v52 }
0x1900   : > { %3528 = vmatprep.subr.mxu0 %v3592_v21  ;;  %v2339_v21 = vld [vmem:[%s4311_s19] sm:$0x1] }
0x1901   : > { %3529 = vmatpush3.msra.mxu0 %v3134_v53 }
0x1902   : > { %3531 = vmatmul.mubr.msk.f32.vlgmr.msra.gmra.mxu0 %vm658_vm0, %v2897_v54 }
0x1999   : > { %v2413_v55 = vpop.f32.mrf.mxu0 }
0x199a   : > { %v2417_v1 = vadd.f32 %v2413_v55, %v2339_v21 }
0x199b   : > { %v3455_v56 = vpop.f32.mrf.mxu0  ;;  %v2729_v57 = vpop.f32.mrf.mxu1 }
0x199d   : > { %v3499_v58 = vpop.f32.mrf.mxu1 }
0x19a1   : > { %v2492_v59 = vpop.f32.mrf.mxu0 }
0x19a2   : > { %v2496_v3 = vadd.f32 %v2492_v59, %v2417_v1 }
0x19a3   : > { %v3466_v60 = vpop.f32.mrf.mxu0 }
0x19a4   : > { %v2887_v61 = vpop.f32.mrf.mxu1 }
0x19a6   : > { %v3521_v62 = vpop.f32.mrf.mxu1 }
0x19aa   : > { %v2571_v63 = vpop.f32.mrf.mxu0 }
0x19ab   : > { %v2575_v5 = vadd.f32 %v2571_v63, %v2496_v3 }
0x19ac   : > { %v3477_v0 = vpop.f32.mrf.mxu0 }
0x19b2   : > { %v2650_v2 = vpop.f32.mrf.mxu0 }
0x19b3   : > { %v2654_v7 = vadd.f32 %v2650_v2, %v2575_v5 }
0x19b4   : > { %v3488_v4 = vpop.f32.mrf.mxu0 }
0x19b5   : > { %v2733_v9 = vadd.f32 %v2729_v57, %v2654_v7 }
0x19ba   : > { %v2808_v8 = vpop.f32.mrf.mxu0 }
0x19bb   : > { %v2812_v11 = vadd.f32 %v2808_v8, %v2733_v9 }
0x19bc   : > { %v3510_v10 = vpop.f32.mrf.mxu0 }
0x19bd   : > { %v2891_v12 = vadd.f32 %v2887_v61, %v2812_v11 }
0x19c2   : > { %v2966_v14 = vpop.f32.mrf.mxu0 }
0x19c3   : > { %v2970_v15 = vadd.f32 %v2966_v14, %v2891_v12 }
0x19c4   : > { %v3532_v16 = vpop.f32.mrf.mxu0 }
0x19c5   : > { %2972 = vst.msk [vmem:[%s622_s27] sm:$0x1] %vm2971_vm4, %v2970_v15 }
0x19c6 PF: > { %s30_s1 = sadd.s32 1, %s3588_s1  }
0x19c7   : > { %p27_p4 = scmp.ge.s32.totalorder %s30_s1, 4  }
0x19c9   :  { %29 = sbr.rel (!%p27_p4) target bundleno = 6 (0x6), region = 149 }

</bundles_post_ra>
